<compile_context>
chip_gen: v5e
topology: v5e:2x2
jax: 0.10.0
libtpu: 0.0.40
codegen_flags: <defaults>
</compile_context>

<pallas_src>
import functools
import math

import jax
import jax.numpy as jnp
from jax import lax
from jax.experimental import pallas as pl
from jax.experimental.pallas import tpu as pltpu


def _graph_learning_kernel(box_num_ref, a_ref, bt_ref, lw_ref, adj_ref, out_ref,
                           *, n_real, learning_dim, has_mask, fold_lw, j_chunk):
    # Per grid step: one (batch, row-tile).
    #   box_num_ref: (B,)             int32 SMEM (scalar prefetch)
    #   a_ref:       (1, TILE_I, L)   projected rows i (learn_w-folded if fold_lw)
    #   bt_ref:      (1, L, Np)       projected features^T, neighbours j on lanes
    #   lw_ref:      (L + 1,) f32     SMEM: learn_w with sum(learn_w) appended
    #   adj_ref:     (1, TILE_I, Np)  adjacency tile
    #   out_ref:     (1, TILE_I, Np)  soft adjacency tile (also used as the
    #                                 row buffer between the chunked passes)
    b = pl.program_id(0)
    it = pl.program_id(1)
    tile_i = out_ref.shape[1]
    n_pad = out_ref.shape[2]
    i0 = it * tile_i
    n_chunks = n_pad // j_chunk

    a = a_ref[0]                                          # (TILE_I, L)

    if has_mask:
        bn = box_num_ref[b]
        row = lax.broadcasted_iota(jnp.int32, (tile_i, 1), 0) + i0
        row_valid = row < bn                              # (TILE_I, 1)
        neg_lw_sum = -lw_ref[learning_dim]

    # ---- pass 1: weighted-L1 pairwise distance + mask + leaky-relu ---------
    # The neighbour axis is chunked so the per-feature accumulator stays in
    # vregs; each finished chunk is written once into out_ref.
    m = jnp.full((tile_i, 1), -jnp.inf, jnp.float32)      # running row max
    for c in range(n_chunks):
        j0 = c * j_chunk
        btc = bt_ref[0, :, j0:j0 + j_chunk]               # (L, j_chunk)

        acc = jnp.zeros((tile_i, j_chunk), jnp.float32)
        if learning_dim <= 64:
            # Small L: static unroll (live set bounded by the chunk size).
            for l in range(learning_dim):
                d = jnp.abs(a[:, l:l + 1] - btc[l:l + 1, :])
                acc = acc + (d if fold_lw else d * lw_ref[l])
        else:
            # Large L: cap live ranges with a fori_loop and modest unroll.
            def body(l, acc):
                a_col = lax.dynamic_slice_in_dim(a, l, 1, axis=1)
                b_row = lax.dynamic_slice_in_dim(btc, l, 1, axis=0)
                d = jnp.abs(a_col - b_row)
                return acc + (d if fold_lw else d * lw_ref[l])
            acc = lax.fori_loop(0, learning_dim, body, acc, unroll=8)

        has_pad = (j0 + j_chunk) > n_real
        if has_mask or has_pad:
            col = lax.broadcasted_iota(jnp.int32, (tile_i, j_chunk), 1) + j0
        if has_mask:
            # Reference adds a {-1, 0} per-feature mask before the learn_w
            # reduction == adding -sum(learn_w) to invalid pairs afterwards.
            acc = jnp.where(row_valid & (col < bn), acc, acc + neg_lw_sum)
        out_c = jnp.where(acc >= 0, acc, 0.01 * acc)      # leaky_relu(0.01)
        if has_pad:
            # Padded neighbour columns must not affect the row max.
            out_c = jnp.where(col < n_real, out_c, -1e30)
        out_ref[0, :, j0:j0 + j_chunk] = out_c
        m = jnp.maximum(m, jnp.max(out_c, axis=-1, keepdims=True))

    # ---- pass 2: exp, adjacency weighting, row sum (chunked) ---------------
    s = jnp.zeros((tile_i, 1), jnp.float32)
    for c in range(n_chunks):
        j0 = c * j_chunk
        soft = adj_ref[0, :, j0:j0 + j_chunk] * jnp.exp(
            out_ref[0, :, j0:j0 + j_chunk] - m)
        out_ref[0, :, j0:j0 + j_chunk] = soft
        s = s + jnp.sum(soft, axis=-1, keepdims=True)

    # ---- pass 3: normalize --------------------------------------------------
    # Padded rows have adj == 0 everywhere -> s == 0; the clamp keeps them
    # finite.  (For a genuinely all-zero adjacency row inside the valid range
    # this deviates from the reference, which would produce inf/NaN.)
    inv = pl.reciprocal(jnp.maximum(s, 1e-30), approx=False)
    for c in range(n_chunks):
        j0 = c * j_chunk
        out_ref[0, :, j0:j0 + j_chunk] = (
            out_ref[0, :, j0:j0 + j_chunk] * inv + 1e-10)


def graph_learning_forward(x, adj, proj_w, learn_w, box_num=None,
                           tile_i=128, j_chunk=128,
                           assume_nonneg_learn_w=True):
    """Eval-mode forward of GraphLearningLayer. Returns (soft_adj, None)."""
    B, N, D = x.shape
    L = int(learn_w.shape[0])

    # Lane-pad the node axis to a multiple of 128 so all stores are full-lane.
    n_pad = ((max(N, 128) + 127) // 128) * 128
    tile_i = min(tile_i, n_pad)
    if tile_i % 8 or n_pad % tile_i:
        tile_i = 128
    j_chunk = min(j_chunk, n_pad)
    if j_chunk % 128 or n_pad % j_chunk:
        j_chunk = 128

    # VMEM limit derived from the chip; auto-shrink tile_i if the estimated
    # per-step footprint (double-buffered blocks + chunk temporaries) is too
    # large for the chip's VMEM (matters on v7x / large N).
    try:
        vmem_cap = int(pltpu.get_tpu_info().vmem_capacity_bytes)
    except Exception:       # query unavailable: assume the smallest (v7x, 64 MiB)
        vmem_cap = 64 * 1024 * 1024
    budget = int(vmem_cap * 0.7)

    def _need(ti):
        return (2 * ti * L * 4            # x_hat row tile (double buffered)
                + 2 * L * n_pad * 4       # x_hat^T (re-fetched only per batch)
                + 4 * ti * n_pad * 4      # adj + out tiles, double buffered
                + 8 * ti * j_chunk * 4    # chunk-local working values
                + (2 << 20))              # headroom

    while _need(tile_i) > budget and tile_i > 8 and n_pad % (tile_i // 2) == 0:
        tile_i //= 2
    vmem_limit = int(min(max(_need(tile_i), 16 * 1024 * 1024), budget))

    pad_n = n_pad - N

    # Projection once in the wrapper (tiny O(B*N*D*L) matmul), optionally with
    # learn_w folded into the weight (exact iff learn_w >= 0, as the module's
    # U(0,1) init implies).
    lw = learn_w.astype(jnp.float32)
    fold_lw = bool(assume_nonneg_learn_w)
    w_eff = proj_w.astype(jnp.float32)
    if fold_lw:
        w_eff = w_eff * lw[:, None]
    x_hat = jnp.einsum('bnd,ld->bnl', x.astype(jnp.float32), w_eff)   # (B,N,L)
    if pad_n:
        x_hat = jnp.pad(x_hat, ((0, 0), (0, pad_n), (0, 0)))
    x_hat_t = jnp.transpose(x_hat, (0, 2, 1))                         # (B,L,Np)

    adj_pad = adj.astype(jnp.float32)
    if pad_n:
        adj_pad = jnp.pad(adj_pad, ((0, 0), (0, pad_n), (0, pad_n)))

    lw_ext = jnp.concatenate([lw, jnp.sum(lw, keepdims=True)])        # (L+1,)

    has_mask = box_num is not None
    bn_arr = (box_num.astype(jnp.int32).reshape(B) if has_mask
              else jnp.zeros((B,), jnp.int32))

    kernel = functools.partial(
        _graph_learning_kernel, n_real=N, learning_dim=L, has_mask=has_mask,
        fold_lw=fold_lw, j_chunk=j_chunk)

    n_tiles = n_pad // tile_i

    soft_pad = pl.pallas_call(
        kernel,
        out_shape=jax.ShapeDtypeStruct((B, n_pad, n_pad), jnp.float32),
        grid_spec=pltpu.PrefetchScalarGridSpec(
            num_scalar_prefetch=1,
            grid=(B, n_tiles),
            in_specs=[
                pl.BlockSpec((1, tile_i, L), lambda b, i, bn: (b, i, 0)),
                pl.BlockSpec((1, L, n_pad), lambda b, i, bn: (b, 0, 0)),
                pl.BlockSpec(memory_space=pltpu.MemorySpace.SMEM),
                pl.BlockSpec((1, tile_i, n_pad), lambda b, i, bn: (b, i, 0)),
            ],
            out_specs=pl.BlockSpec((1, tile_i, n_pad),
                                   lambda b, i, bn: (b, i, 0)),
        ),
        compiler_params=pltpu.CompilerParams(
            dimension_semantics=("parallel", "parallel"),
            vmem_limit_bytes=vmem_limit),
    )(bn_arr, x_hat, x_hat_t, lw_ext, adj_pad)

    soft_adj = soft_pad[:, :N, :N]
    # TODO(synk): training-mode _graph_learning_loss is not implemented; the
    # eval forward returns gl_loss=None exactly like the module with
    # self.training == False.
    return soft_adj, None


def reference_forward(x, adj, proj_w, learn_w, box_num=None):
    """Pure-JAX reference mirroring the PyTorch forward (eval mode)."""
    B, N, D = x.shape
    x_hat = x @ proj_w.T                                           # (B, N, L)
    diff = jnp.abs(x_hat[:, :, None, :] - x_hat[:, None, :, :])    # (B, N, N, L)
    if box_num is not None:
        valid = jnp.arange(N)[None, :] < box_num.reshape(B, 1)
        pair = valid[:, :, None] & valid[:, None, :]
        mask = (~pair).astype(jnp.float32) * -1.0
        diff = diff + mask[..., None]
    dist = jnp.einsum('bijd,d->bij', diff, learn_w)
    out = jnp.where(dist >= 0, dist, 0.01 * dist)
    out = out - jnp.max(out, axis=-1, keepdims=True)
    soft = adj * jnp.exp(out)
    s = jnp.sum(soft, axis=-1, keepdims=True)
    return soft / s + 1e-10


if __name__ == "__main__":
    B, N, D, L = 2, 8, 16, 32           # batch, num boxes, in_dim, learning_dim

    key = jax.random.PRNGKey(0)
    k1, k2, k3, k4 = jax.random.split(key, 4)

    x = jax.random.normal(k1, (B, N, D), jnp.float32)
    adj = jax.random.uniform(k2, (B, N, N), jnp.float32, minval=0.1, maxval=1.0)

    # nn.Linear(in_dim, learning_dim, bias=False): weight shape (L, D),
    # default init ~ U(-1/sqrt(D), 1/sqrt(D)). learn_w ~ U(0, 1).
    bound = 1.0 / math.sqrt(D)
    proj_w = jax.random.uniform(k3, (L, D), jnp.float32, minval=-bound, maxval=bound)
    learn_w = jax.random.uniform(k4, (L,), jnp.float32, minval=0.0, maxval=1.0)

    # 1) box_num=None, learn_w folded into the projection (default fast path).
    soft_adj, gl_loss = graph_learning_forward(x, adj, proj_w, learn_w)
    soft_adj = jax.block_until_ready(soft_adj)
    ref = reference_forward(x, adj, proj_w, learn_w)
    assert gl_loss is None
    assert jnp.allclose(soft_adj, ref, atol=2e-5, rtol=2e-5), "mismatch (no mask)"

    # 2) dynamic box_num mask (built in-kernel from scalar-prefetched box_num).
    box_num = jnp.array([N, 5], dtype=jnp.int32)
    soft_m, _ = graph_learning_forward(x, adj, proj_w, learn_w, box_num=box_num)
    soft_m = jax.block_until_ready(soft_m)
    ref_m = reference_forward(x, adj, proj_w, learn_w, box_num=box_num)
    assert jnp.allclose(soft_m, ref_m, atol=2e-5, rtol=2e-5), "mismatch (mask)"

    # 3) exact (non-folded) path, for learn_w not guaranteed non-negative.
    soft_e, _ = graph_learning_forward(x, adj, proj_w, learn_w, box_num=box_num,
                                       assume_nonneg_learn_w=False)
    soft_e = jax.block_until_ready(soft_e)
    assert jnp.allclose(soft_e, ref_m, atol=2e-5, rtol=2e-5), "mismatch (exact)"

    print("KERNEL_OK")
</pallas_src>

<mosaic_0001>
module attributes {stable_mosaic.version = 11 : i64} {
  func.func @_graph_learning_kernel(%arg0: i32, %arg1: i32, %arg2: memref<2xi32, #tpu.memory_space<smem>>, %arg3: memref<1x128x32xf32, #tpu.memory_space<vmem>>, %arg4: memref<1x32x128xf32, #tpu.memory_space<vmem>>, %arg5: memref<33xf32, #tpu.memory_space<smem>>, %arg6: memref<1x128x128xf32, #tpu.memory_space<vmem>>, %arg7: memref<1x128x128xf32, #tpu.memory_space<vmem>>) attributes {dimension_semantics = [#tpu.dimension_semantics<parallel>, #tpu.dimension_semantics<parallel>], iteration_bounds = array<i64: 2, 1>, scalar_prefetch = 1 : i64, scratch_operands = 0 : i64, tpu.core_type = #tpu.core_type<tc>, window_params = [{transform_indices = @transform_0, window_bounds = array<i64: 1, 128, 32>}, {transform_indices = @transform_1, window_bounds = array<i64: 1, 32, 128>}, {transform_indices = @transform_2, window_bounds = array<i64: 33>}, {transform_indices = @transform_3, window_bounds = array<i64: 1, 128, 128>}, {transform_indices = @transform_4, window_bounds = array<i64: 1, 128, 128>}]} {
    %c0 = arith.constant 0 : index
    %c0_0 = arith.constant 0 : index
    %c0_1 = arith.constant 0 : index
    %0 = vector.load %arg3[%c0, %c0_0, %c0_1] : memref<1x128x32xf32, #tpu.memory_space<vmem>>, vector<1x128x32xf32>
    %1 = vector.shape_cast %0 : vector<1x128x32xf32> to vector<128x32xf32>
    %cst = arith.constant 0xFF800000 : f32
    %2 = vector.broadcast %cst : f32 to vector<128x1xf32>
    %c0_2 = arith.constant 0 : index
    %c0_3 = arith.constant 0 : index
    %c0_4 = arith.constant 0 : index
    %3 = vector.load %arg4[%c0_2, %c0_3, %c0_4] : memref<1x32x128xf32, #tpu.memory_space<vmem>>, vector<1x32x128xf32>
    %4 = vector.shape_cast %3 : vector<1x32x128xf32> to vector<32x128xf32>
    %cst_5 = arith.constant 0.000000e+00 : f32
    %5 = vector.broadcast %cst_5 : f32 to vector<128x128xf32>
    %6 = vector.extract_strided_slice %1 {offsets = [0, 0], sizes = [128, 1], strides = [1, 1]} : vector<128x32xf32> to vector<128x1xf32>
    %7 = vector.extract_strided_slice %4 {offsets = [0, 0], sizes = [1, 128], strides = [1, 1]} : vector<32x128xf32> to vector<1x128xf32>
    %8 = vector.broadcast %6 : vector<128x1xf32> to vector<128x128xf32>
    %9 = vector.broadcast %7 : vector<1x128xf32> to vector<128x128xf32>
    %10 = arith.subf %8, %9 : vector<128x128xf32>
    %11 = math.absf %10 : vector<128x128xf32>
    %12 = arith.addf %5, %11 : vector<128x128xf32>
    %13 = vector.extract_strided_slice %1 {offsets = [0, 1], sizes = [128, 1], strides = [1, 1]} : vector<128x32xf32> to vector<128x1xf32>
    %14 = vector.extract_strided_slice %4 {offsets = [1, 0], sizes = [1, 128], strides = [1, 1]} : vector<32x128xf32> to vector<1x128xf32>
    %15 = vector.broadcast %13 : vector<128x1xf32> to vector<128x128xf32>
    %16 = vector.broadcast %14 : vector<1x128xf32> to vector<128x128xf32>
    %17 = arith.subf %15, %16 : vector<128x128xf32>
    %18 = math.absf %17 : vector<128x128xf32>
    %19 = arith.addf %12, %18 : vector<128x128xf32>
    %20 = vector.extract_strided_slice %1 {offsets = [0, 2], sizes = [128, 1], strides = [1, 1]} : vector<128x32xf32> to vector<128x1xf32>
    %21 = vector.extract_strided_slice %4 {offsets = [2, 0], sizes = [1, 128], strides = [1, 1]} : vector<32x128xf32> to vector<1x128xf32>
    %22 = vector.broadcast %20 : vector<128x1xf32> to vector<128x128xf32>
    %23 = vector.broadcast %21 : vector<1x128xf32> to vector<128x128xf32>
    %24 = arith.subf %22, %23 : vector<128x128xf32>
    %25 = math.absf %24 : vector<128x128xf32>
    %26 = arith.addf %19, %25 : vector<128x128xf32>
    %27 = vector.extract_strided_slice %1 {offsets = [0, 3], sizes = [128, 1], strides = [1, 1]} : vector<128x32xf32> to vector<128x1xf32>
    %28 = vector.extract_strided_slice %4 {offsets = [3, 0], sizes = [1, 128], strides = [1, 1]} : vector<32x128xf32> to vector<1x128xf32>
    %29 = vector.broadcast %27 : vector<128x1xf32> to vector<128x128xf32>
    %30 = vector.broadcast %28 : vector<1x128xf32> to vector<128x128xf32>
    %31 = arith.subf %29, %30 : vector<128x128xf32>
    %32 = math.absf %31 : vector<128x128xf32>
    %33 = arith.addf %26, %32 : vector<128x128xf32>
    %34 = vector.extract_strided_slice %1 {offsets = [0, 4], sizes = [128, 1], strides = [1, 1]} : vector<128x32xf32> to vector<128x1xf32>
    %35 = vector.extract_strided_slice %4 {offsets = [4, 0], sizes = [1, 128], strides = [1, 1]} : vector<32x128xf32> to vector<1x128xf32>
    %36 = vector.broadcast %34 : vector<128x1xf32> to vector<128x128xf32>
    %37 = vector.broadcast %35 : vector<1x128xf32> to vector<128x128xf32>
    %38 = arith.subf %36, %37 : vector<128x128xf32>
    %39 = math.absf %38 : vector<128x128xf32>
    %40 = arith.addf %33, %39 : vector<128x128xf32>
    %41 = vector.extract_strided_slice %1 {offsets = [0, 5], sizes = [128, 1], strides = [1, 1]} : vector<128x32xf32> to vector<128x1xf32>
    %42 = vector.extract_strided_slice %4 {offsets = [5, 0], sizes = [1, 128], strides = [1, 1]} : vector<32x128xf32> to vector<1x128xf32>
    %43 = vector.broadcast %41 : vector<128x1xf32> to vector<128x128xf32>
    %44 = vector.broadcast %42 : vector<1x128xf32> to vector<128x128xf32>
    %45 = arith.subf %43, %44 : vector<128x128xf32>
    %46 = math.absf %45 : vector<128x128xf32>
    %47 = arith.addf %40, %46 : vector<128x128xf32>
    %48 = vector.extract_strided_slice %1 {offsets = [0, 6], sizes = [128, 1], strides = [1, 1]} : vector<128x32xf32> to vector<128x1xf32>
    %49 = vector.extract_strided_slice %4 {offsets = [6, 0], sizes = [1, 128], strides = [1, 1]} : vector<32x128xf32> to vector<1x128xf32>
    %50 = vector.broadcast %48 : vector<128x1xf32> to vector<128x128xf32>
    %51 = vector.broadcast %49 : vector<1x128xf32> to vector<128x128xf32>
    %52 = arith.subf %50, %51 : vector<128x128xf32>
    %53 = math.absf %52 : vector<128x128xf32>
    %54 = arith.addf %47, %53 : vector<128x128xf32>
    %55 = vector.extract_strided_slice %1 {offsets = [0, 7], sizes = [128, 1], strides = [1, 1]} : vector<128x32xf32> to vector<128x1xf32>
    %56 = vector.extract_strided_slice %4 {offsets = [7, 0], sizes = [1, 128], strides = [1, 1]} : vector<32x128xf32> to vector<1x128xf32>
    %57 = vector.broadcast %55 : vector<128x1xf32> to vector<128x128xf32>
    %58 = vector.broadcast %56 : vector<1x128xf32> to vector<128x128xf32>
    %59 = arith.subf %57, %58 : vector<128x128xf32>
    %60 = math.absf %59 : vector<128x128xf32>
    %61 = arith.addf %54, %60 : vector<128x128xf32>
    %62 = vector.extract_strided_slice %1 {offsets = [0, 8], sizes = [128, 1], strides = [1, 1]} : vector<128x32xf32> to vector<128x1xf32>
    %63 = vector.extract_strided_slice %4 {offsets = [8, 0], sizes = [1, 128], strides = [1, 1]} : vector<32x128xf32> to vector<1x128xf32>
    %64 = vector.broadcast %62 : vector<128x1xf32> to vector<128x128xf32>
    %65 = vector.broadcast %63 : vector<1x128xf32> to vector<128x128xf32>
    %66 = arith.subf %64, %65 : vector<128x128xf32>
    %67 = math.absf %66 : vector<128x128xf32>
    %68 = arith.addf %61, %67 : vector<128x128xf32>
    %69 = vector.extract_strided_slice %1 {offsets = [0, 9], sizes = [128, 1], strides = [1, 1]} : vector<128x32xf32> to vector<128x1xf32>
    %70 = vector.extract_strided_slice %4 {offsets = [9, 0], sizes = [1, 128], strides = [1, 1]} : vector<32x128xf32> to vector<1x128xf32>
    %71 = vector.broadcast %69 : vector<128x1xf32> to vector<128x128xf32>
    %72 = vector.broadcast %70 : vector<1x128xf32> to vector<128x128xf32>
    %73 = arith.subf %71, %72 : vector<128x128xf32>
    %74 = math.absf %73 : vector<128x128xf32>
    %75 = arith.addf %68, %74 : vector<128x128xf32>
    %76 = vector.extract_strided_slice %1 {offsets = [0, 10], sizes = [128, 1], strides = [1, 1]} : vector<128x32xf32> to vector<128x1xf32>
    %77 = vector.extract_strided_slice %4 {offsets = [10, 0], sizes = [1, 128], strides = [1, 1]} : vector<32x128xf32> to vector<1x128xf32>
    %78 = vector.broadcast %76 : vector<128x1xf32> to vector<128x128xf32>
    %79 = vector.broadcast %77 : vector<1x128xf32> to vector<128x128xf32>
    %80 = arith.subf %78, %79 : vector<128x128xf32>
    %81 = math.absf %80 : vector<128x128xf32>
    %82 = arith.addf %75, %81 : vector<128x128xf32>
    %83 = vector.extract_strided_slice %1 {offsets = [0, 11], sizes = [128, 1], strides = [1, 1]} : vector<128x32xf32> to vector<128x1xf32>
    %84 = vector.extract_strided_slice %4 {offsets = [11, 0], sizes = [1, 128], strides = [1, 1]} : vector<32x128xf32> to vector<1x128xf32>
    %85 = vector.broadcast %83 : vector<128x1xf32> to vector<128x128xf32>
    %86 = vector.broadcast %84 : vector<1x128xf32> to vector<128x128xf32>
    %87 = arith.subf %85, %86 : vector<128x128xf32>
    %88 = math.absf %87 : vector<128x128xf32>
    %89 = arith.addf %82, %88 : vector<128x128xf32>
    %90 = vector.extract_strided_slice %1 {offsets = [0, 12], sizes = [128, 1], strides = [1, 1]} : vector<128x32xf32> to vector<128x1xf32>
    %91 = vector.extract_strided_slice %4 {offsets = [12, 0], sizes = [1, 128], strides = [1, 1]} : vector<32x128xf32> to vector<1x128xf32>
    %92 = vector.broadcast %90 : vector<128x1xf32> to vector<128x128xf32>
    %93 = vector.broadcast %91 : vector<1x128xf32> to vector<128x128xf32>
    %94 = arith.subf %92, %93 : vector<128x128xf32>
    %95 = math.absf %94 : vector<128x128xf32>
    %96 = arith.addf %89, %95 : vector<128x128xf32>
    %97 = vector.extract_strided_slice %1 {offsets = [0, 13], sizes = [128, 1], strides = [1, 1]} : vector<128x32xf32> to vector<128x1xf32>
    %98 = vector.extract_strided_slice %4 {offsets = [13, 0], sizes = [1, 128], strides = [1, 1]} : vector<32x128xf32> to vector<1x128xf32>
    %99 = vector.broadcast %97 : vector<128x1xf32> to vector<128x128xf32>
    %100 = vector.broadcast %98 : vector<1x128xf32> to vector<128x128xf32>
    %101 = arith.subf %99, %100 : vector<128x128xf32>
    %102 = math.absf %101 : vector<128x128xf32>
    %103 = arith.addf %96, %102 : vector<128x128xf32>
    %104 = vector.extract_strided_slice %1 {offsets = [0, 14], sizes = [128, 1], strides = [1, 1]} : vector<128x32xf32> to vector<128x1xf32>
    %105 = vector.extract_strided_slice %4 {offsets = [14, 0], sizes = [1, 128], strides = [1, 1]} : vector<32x128xf32> to vector<1x128xf32>
    %106 = vector.broadcast %104 : vector<128x1xf32> to vector<128x128xf32>
    %107 = vector.broadcast %105 : vector<1x128xf32> to vector<128x128xf32>
    %108 = arith.subf %106, %107 : vector<128x128xf32>
    %109 = math.absf %108 : vector<128x128xf32>
    %110 = arith.addf %103, %109 : vector<128x128xf32>
    %111 = vector.extract_strided_slice %1 {offsets = [0, 15], sizes = [128, 1], strides = [1, 1]} : vector<128x32xf32> to vector<128x1xf32>
    %112 = vector.extract_strided_slice %4 {offsets = [15, 0], sizes = [1, 128], strides = [1, 1]} : vector<32x128xf32> to vector<1x128xf32>
    %113 = vector.broadcast %111 : vector<128x1xf32> to vector<128x128xf32>
    %114 = vector.broadcast %112 : vector<1x128xf32> to vector<128x128xf32>
    %115 = arith.subf %113, %114 : vector<128x128xf32>
    %116 = math.absf %115 : vector<128x128xf32>
    %117 = arith.addf %110, %116 : vector<128x128xf32>
    %118 = vector.extract_strided_slice %1 {offsets = [0, 16], sizes = [128, 1], strides = [1, 1]} : vector<128x32xf32> to vector<128x1xf32>
    %119 = vector.extract_strided_slice %4 {offsets = [16, 0], sizes = [1, 128], strides = [1, 1]} : vector<32x128xf32> to vector<1x128xf32>
    %120 = vector.broadcast %118 : vector<128x1xf32> to vector<128x128xf32>
    %121 = vector.broadcast %119 : vector<1x128xf32> to vector<128x128xf32>
    %122 = arith.subf %120, %121 : vector<128x128xf32>
    %123 = math.absf %122 : vector<128x128xf32>
    %124 = arith.addf %117, %123 : vector<128x128xf32>
    %125 = vector.extract_strided_slice %1 {offsets = [0, 17], sizes = [128, 1], strides = [1, 1]} : vector<128x32xf32> to vector<128x1xf32>
    %126 = vector.extract_strided_slice %4 {offsets = [17, 0], sizes = [1, 128], strides = [1, 1]} : vector<32x128xf32> to vector<1x128xf32>
    %127 = vector.broadcast %125 : vector<128x1xf32> to vector<128x128xf32>
    %128 = vector.broadcast %126 : vector<1x128xf32> to vector<128x128xf32>
    %129 = arith.subf %127, %128 : vector<128x128xf32>
    %130 = math.absf %129 : vector<128x128xf32>
    %131 = arith.addf %124, %130 : vector<128x128xf32>
    %132 = vector.extract_strided_slice %1 {offsets = [0, 18], sizes = [128, 1], strides = [1, 1]} : vector<128x32xf32> to vector<128x1xf32>
    %133 = vector.extract_strided_slice %4 {offsets = [18, 0], sizes = [1, 128], strides = [1, 1]} : vector<32x128xf32> to vector<1x128xf32>
    %134 = vector.broadcast %132 : vector<128x1xf32> to vector<128x128xf32>
    %135 = vector.broadcast %133 : vector<1x128xf32> to vector<128x128xf32>
    %136 = arith.subf %134, %135 : vector<128x128xf32>
    %137 = math.absf %136 : vector<128x128xf32>
    %138 = arith.addf %131, %137 : vector<128x128xf32>
    %139 = vector.extract_strided_slice %1 {offsets = [0, 19], sizes = [128, 1], strides = [1, 1]} : vector<128x32xf32> to vector<128x1xf32>
    %140 = vector.extract_strided_slice %4 {offsets = [19, 0], sizes = [1, 128], strides = [1, 1]} : vector<32x128xf32> to vector<1x128xf32>
    %141 = vector.broadcast %139 : vector<128x1xf32> to vector<128x128xf32>
    %142 = vector.broadcast %140 : vector<1x128xf32> to vector<128x128xf32>
    %143 = arith.subf %141, %142 : vector<128x128xf32>
    %144 = math.absf %143 : vector<128x128xf32>
    %145 = arith.addf %138, %144 : vector<128x128xf32>
    %146 = vector.extract_strided_slice %1 {offsets = [0, 20], sizes = [128, 1], strides = [1, 1]} : vector<128x32xf32> to vector<128x1xf32>
    %147 = vector.extract_strided_slice %4 {offsets = [20, 0], sizes = [1, 128], strides = [1, 1]} : vector<32x128xf32> to vector<1x128xf32>
    %148 = vector.broadcast %146 : vector<128x1xf32> to vector<128x128xf32>
    %149 = vector.broadcast %147 : vector<1x128xf32> to vector<128x128xf32>
    %150 = arith.subf %148, %149 : vector<128x128xf32>
    %151 = math.absf %150 : vector<128x128xf32>
    %152 = arith.addf %145, %151 : vector<128x128xf32>
    %153 = vector.extract_strided_slice %1 {offsets = [0, 21], sizes = [128, 1], strides = [1, 1]} : vector<128x32xf32> to vector<128x1xf32>
    %154 = vector.extract_strided_slice %4 {offsets = [21, 0], sizes = [1, 128], strides = [1, 1]} : vector<32x128xf32> to vector<1x128xf32>
    %155 = vector.broadcast %153 : vector<128x1xf32> to vector<128x128xf32>
    %156 = vector.broadcast %154 : vector<1x128xf32> to vector<128x128xf32>
    %157 = arith.subf %155, %156 : vector<128x128xf32>
    %158 = math.absf %157 : vector<128x128xf32>
    %159 = arith.addf %152, %158 : vector<128x128xf32>
    %160 = vector.extract_strided_slice %1 {offsets = [0, 22], sizes = [128, 1], strides = [1, 1]} : vector<128x32xf32> to vector<128x1xf32>
    %161 = vector.extract_strided_slice %4 {offsets = [22, 0], sizes = [1, 128], strides = [1, 1]} : vector<32x128xf32> to vector<1x128xf32>
    %162 = vector.broadcast %160 : vector<128x1xf32> to vector<128x128xf32>
    %163 = vector.broadcast %161 : vector<1x128xf32> to vector<128x128xf32>
    %164 = arith.subf %162, %163 : vector<128x128xf32>
    %165 = math.absf %164 : vector<128x128xf32>
    %166 = arith.addf %159, %165 : vector<128x128xf32>
    %167 = vector.extract_strided_slice %1 {offsets = [0, 23], sizes = [128, 1], strides = [1, 1]} : vector<128x32xf32> to vector<128x1xf32>
    %168 = vector.extract_strided_slice %4 {offsets = [23, 0], sizes = [1, 128], strides = [1, 1]} : vector<32x128xf32> to vector<1x128xf32>
    %169 = vector.broadcast %167 : vector<128x1xf32> to vector<128x128xf32>
    %170 = vector.broadcast %168 : vector<1x128xf32> to vector<128x128xf32>
    %171 = arith.subf %169, %170 : vector<128x128xf32>
    %172 = math.absf %171 : vector<128x128xf32>
    %173 = arith.addf %166, %172 : vector<128x128xf32>
    %174 = vector.extract_strided_slice %1 {offsets = [0, 24], sizes = [128, 1], strides = [1, 1]} : vector<128x32xf32> to vector<128x1xf32>
    %175 = vector.extract_strided_slice %4 {offsets = [24, 0], sizes = [1, 128], strides = [1, 1]} : vector<32x128xf32> to vector<1x128xf32>
    %176 = vector.broadcast %174 : vector<128x1xf32> to vector<128x128xf32>
    %177 = vector.broadcast %175 : vector<1x128xf32> to vector<128x128xf32>
    %178 = arith.subf %176, %177 : vector<128x128xf32>
    %179 = math.absf %178 : vector<128x128xf32>
    %180 = arith.addf %173, %179 : vector<128x128xf32>
    %181 = vector.extract_strided_slice %1 {offsets = [0, 25], sizes = [128, 1], strides = [1, 1]} : vector<128x32xf32> to vector<128x1xf32>
    %182 = vector.extract_strided_slice %4 {offsets = [25, 0], sizes = [1, 128], strides = [1, 1]} : vector<32x128xf32> to vector<1x128xf32>
    %183 = vector.broadcast %181 : vector<128x1xf32> to vector<128x128xf32>
    %184 = vector.broadcast %182 : vector<1x128xf32> to vector<128x128xf32>
    %185 = arith.subf %183, %184 : vector<128x128xf32>
    %186 = math.absf %185 : vector<128x128xf32>
    %187 = arith.addf %180, %186 : vector<128x128xf32>
    %188 = vector.extract_strided_slice %1 {offsets = [0, 26], sizes = [128, 1], strides = [1, 1]} : vector<128x32xf32> to vector<128x1xf32>
    %189 = vector.extract_strided_slice %4 {offsets = [26, 0], sizes = [1, 128], strides = [1, 1]} : vector<32x128xf32> to vector<1x128xf32>
    %190 = vector.broadcast %188 : vector<128x1xf32> to vector<128x128xf32>
    %191 = vector.broadcast %189 : vector<1x128xf32> to vector<128x128xf32>
    %192 = arith.subf %190, %191 : vector<128x128xf32>
    %193 = math.absf %192 : vector<128x128xf32>
    %194 = arith.addf %187, %193 : vector<128x128xf32>
    %195 = vector.extract_strided_slice %1 {offsets = [0, 27], sizes = [128, 1], strides = [1, 1]} : vector<128x32xf32> to vector<128x1xf32>
    %196 = vector.extract_strided_slice %4 {offsets = [27, 0], sizes = [1, 128], strides = [1, 1]} : vector<32x128xf32> to vector<1x128xf32>
    %197 = vector.broadcast %195 : vector<128x1xf32> to vector<128x128xf32>
    %198 = vector.broadcast %196 : vector<1x128xf32> to vector<128x128xf32>
    %199 = arith.subf %197, %198 : vector<128x128xf32>
    %200 = math.absf %199 : vector<128x128xf32>
    %201 = arith.addf %194, %200 : vector<128x128xf32>
    %202 = vector.extract_strided_slice %1 {offsets = [0, 28], sizes = [128, 1], strides = [1, 1]} : vector<128x32xf32> to vector<128x1xf32>
    %203 = vector.extract_strided_slice %4 {offsets = [28, 0], sizes = [1, 128], strides = [1, 1]} : vector<32x128xf32> to vector<1x128xf32>
    %204 = vector.broadcast %202 : vector<128x1xf32> to vector<128x128xf32>
    %205 = vector.broadcast %203 : vector<1x128xf32> to vector<128x128xf32>
    %206 = arith.subf %204, %205 : vector<128x128xf32>
    %207 = math.absf %206 : vector<128x128xf32>
    %208 = arith.addf %201, %207 : vector<128x128xf32>
    %209 = vector.extract_strided_slice %1 {offsets = [0, 29], sizes = [128, 1], strides = [1, 1]} : vector<128x32xf32> to vector<128x1xf32>
    %210 = vector.extract_strided_slice %4 {offsets = [29, 0], sizes = [1, 128], strides = [1, 1]} : vector<32x128xf32> to vector<1x128xf32>
    %211 = vector.broadcast %209 : vector<128x1xf32> to vector<128x128xf32>
    %212 = vector.broadcast %210 : vector<1x128xf32> to vector<128x128xf32>
    %213 = arith.subf %211, %212 : vector<128x128xf32>
    %214 = math.absf %213 : vector<128x128xf32>
    %215 = arith.addf %208, %214 : vector<128x128xf32>
    %216 = vector.extract_strided_slice %1 {offsets = [0, 30], sizes = [128, 1], strides = [1, 1]} : vector<128x32xf32> to vector<128x1xf32>
    %217 = vector.extract_strided_slice %4 {offsets = [30, 0], sizes = [1, 128], strides = [1, 1]} : vector<32x128xf32> to vector<1x128xf32>
    %218 = vector.broadcast %216 : vector<128x1xf32> to vector<128x128xf32>
    %219 = vector.broadcast %217 : vector<1x128xf32> to vector<128x128xf32>
    %220 = arith.subf %218, %219 : vector<128x128xf32>
    %221 = math.absf %220 : vector<128x128xf32>
    %222 = arith.addf %215, %221 : vector<128x128xf32>
    %223 = vector.extract_strided_slice %1 {offsets = [0, 31], sizes = [128, 1], strides = [1, 1]} : vector<128x32xf32> to vector<128x1xf32>
    %224 = vector.extract_strided_slice %4 {offsets = [31, 0], sizes = [1, 128], strides = [1, 1]} : vector<32x128xf32> to vector<1x128xf32>
    %225 = vector.broadcast %223 : vector<128x1xf32> to vector<128x128xf32>
    %226 = vector.broadcast %224 : vector<1x128xf32> to vector<128x128xf32>
    %227 = arith.subf %225, %226 : vector<128x128xf32>
    %228 = math.absf %227 : vector<128x128xf32>
    %229 = arith.addf %222, %228 : vector<128x128xf32>
    %230 = tpu.iota {dimensions = array<i32: 1>} : vector<128x128xi32>
    %c0_i32 = arith.constant 0 : i32
    %231 = vector.broadcast %c0_i32 : i32 to vector<128x128xi32>
    %232 = arith.addi %230, %231 : vector<128x128xi32>
    %cst_6 = arith.constant 0.000000e+00 : f32
    %233 = vector.broadcast %cst_6 : f32 to vector<128x128xf32>
    %234 = arith.cmpf oge, %229, %233 : vector<128x128xf32>
    %cst_7 = arith.constant 0.00999999977 : f32
    %235 = vector.broadcast %cst_7 : f32 to vector<128x128xf32>
    %236 = arith.mulf %235, %229 : vector<128x128xf32>
    %237 = arith.select %234, %229, %236 : vector<128x128xi1>, vector<128x128xf32>
    %c8_i32 = arith.constant 8 : i32
    %238 = vector.broadcast %c8_i32 : i32 to vector<128x128xi32>
    %239 = arith.cmpi slt, %232, %238 : vector<128x128xi32>
    %cst_8 = arith.constant -1.000000e+30 : f32
    %240 = vector.broadcast %cst_8 : f32 to vector<128x128xf32>
    %241 = arith.select %239, %237, %240 : vector<128x128xi1>, vector<128x128xf32>
    %c0_9 = arith.constant 0 : index
    %c0_10 = arith.constant 0 : index
    %c0_11 = arith.constant 0 : index
    %242 = vector.load %arg7[%c0_9, %c0_10, %c0_11] : memref<1x128x128xf32, #tpu.memory_space<vmem>>, vector<1x128x128xf32>
    %243 = vector.shape_cast %242 : vector<1x128x128xf32> to vector<128x128xf32>
    %244 = vector.shape_cast %241 : vector<128x128xf32> to vector<1x128x128xf32>
    tpu.vector_store %arg7[%c0_9, %c0_10, %c0_11], %244 {strides = array<i32>} : memref<1x128x128xf32, #tpu.memory_space<vmem>>, vector<1x128x128xf32>,
    %cst_12 = arith.constant dense<0xFF800000> : vector<128xf32>
    %245 = vector.multi_reduction <maximumf>, %241, %cst_12 [1] : vector<128x128xf32> to vector<128xf32>
    %246 = vector.shape_cast %245 : vector<128xf32> to vector<128x1xf32>
    %247 = arith.maximumf %2, %246 : vector<128x1xf32>
    %cst_13 = arith.constant 0.000000e+00 : f32
    %248 = vector.broadcast %cst_13 : f32 to vector<128x1xf32>
    %c0_14 = arith.constant 0 : index
    %c0_15 = arith.constant 0 : index
    %c0_16 = arith.constant 0 : index
    %249 = vector.load %arg6[%c0_14, %c0_15, %c0_16] : memref<1x128x128xf32, #tpu.memory_space<vmem>>, vector<1x128x128xf32>
    %250 = vector.shape_cast %249 : vector<1x128x128xf32> to vector<128x128xf32>
    %c0_17 = arith.constant 0 : index
    %c0_18 = arith.constant 0 : index
    %c0_19 = arith.constant 0 : index
    %251 = vector.load %arg7[%c0_17, %c0_18, %c0_19] : memref<1x128x128xf32, #tpu.memory_space<vmem>>, vector<1x128x128xf32>
    %252 = vector.shape_cast %251 : vector<1x128x128xf32> to vector<128x128xf32>
    %253 = vector.broadcast %247 : vector<128x1xf32> to vector<128x128xf32>
    %254 = arith.subf %252, %253 : vector<128x128xf32>
    %255 = math.exp %254 : vector<128x128xf32>
    %256 = arith.mulf %250, %255 : vector<128x128xf32>
    %c0_20 = arith.constant 0 : index
    %c0_21 = arith.constant 0 : index
    %c0_22 = arith.constant 0 : index
    %257 = vector.load %arg7[%c0_20, %c0_21, %c0_22] : memref<1x128x128xf32, #tpu.memory_space<vmem>>, vector<1x128x128xf32>
    %258 = vector.shape_cast %257 : vector<1x128x128xf32> to vector<128x128xf32>
    %259 = vector.shape_cast %256 : vector<128x128xf32> to vector<1x128x128xf32>
    tpu.vector_store %arg7[%c0_20, %c0_21, %c0_22], %259 {strides = array<i32>} : memref<1x128x128xf32, #tpu.memory_space<vmem>>, vector<1x128x128xf32>,
    %cst_23 = arith.constant dense<0.000000e+00> : vector<128xf32>
    %260 = vector.multi_reduction <add>, %256, %cst_23 [1] : vector<128x128xf32> to vector<128xf32>
    %261 = vector.shape_cast %260 : vector<128xf32> to vector<128x1xf32>
    %262 = arith.addf %248, %261 : vector<128x1xf32>
    %cst_24 = arith.constant 1.000000e-30 : f32
    %263 = vector.broadcast %cst_24 : f32 to vector<128x1xf32>
    %264 = arith.maximumf %262, %263 : vector<128x1xf32>
    %265 = tpu.reciprocal %264 : vector<128x1xf32> -> vector<128x1xf32>
    %c0_25 = arith.constant 0 : index
    %c0_26 = arith.constant 0 : index
    %c0_27 = arith.constant 0 : index
    %266 = vector.load %arg7[%c0_25, %c0_26, %c0_27] : memref<1x128x128xf32, #tpu.memory_space<vmem>>, vector<1x128x128xf32>
    %267 = vector.shape_cast %266 : vector<1x128x128xf32> to vector<128x128xf32>
    %268 = vector.broadcast %265 : vector<128x1xf32> to vector<128x128xf32>
    %269 = arith.mulf %267, %268 : vector<128x128xf32>
    %cst_28 = arith.constant 1.000000e-10 : f32
    %270 = vector.broadcast %cst_28 : f32 to vector<128x128xf32>
    %271 = arith.addf %269, %270 : vector<128x128xf32>
    %c0_29 = arith.constant 0 : index
    %c0_30 = arith.constant 0 : index
    %c0_31 = arith.constant 0 : index
    %272 = vector.load %arg7[%c0_29, %c0_30, %c0_31] : memref<1x128x128xf32, #tpu.memory_space<vmem>>, vector<1x128x128xf32>
    %273 = vector.shape_cast %272 : vector<1x128x128xf32> to vector<128x128xf32>
    %274 = vector.shape_cast %271 : vector<128x128xf32> to vector<1x128x128xf32>
    tpu.vector_store %arg7[%c0_29, %c0_30, %c0_31], %274 {strides = array<i32>} : memref<1x128x128xf32, #tpu.memory_space<vmem>>, vector<1x128x128xf32>,
    return
  }
  func.func @transform_0(%arg0: i32, %arg1: i32, %arg2: memref<2xi32, #tpu.memory_space<smem>>) -> (i32, i32, i32) {
    %c0_i32 = arith.constant 0 : i32
    %c0_i32_0 = arith.constant 0 : i32
    return %arg0, %arg1, %c0_i32 : i32, i32, i32
  }
  func.func @transform_1(%arg0: i32, %arg1: i32, %arg2: memref<2xi32, #tpu.memory_space<smem>>) -> (i32, i32, i32) {
    %c0_i32 = arith.constant 0 : i32
    %c0_i32_0 = arith.constant 0 : i32
    %c0_i32_1 = arith.constant 0 : i32
    return %arg0, %c0_i32, %c0_i32_0 : i32, i32, i32
  }
  func.func @transform_2(%arg0: i32, %arg1: i32, %arg2: memref<2xi32, #tpu.memory_space<smem>>) -> i32 {
    %c0_i32 = arith.constant 0 : i32
    %c0_i32_0 = arith.constant 0 : i32
    return %c0_i32 : i32
  }
  func.func @transform_3(%arg0: i32, %arg1: i32, %arg2: memref<2xi32, #tpu.memory_space<smem>>) -> (i32, i32, i32) {
    %c0_i32 = arith.constant 0 : i32
    %c0_i32_0 = arith.constant 0 : i32
    return %arg0, %arg1, %c0_i32 : i32, i32, i32
  }
  func.func @transform_4(%arg0: i32, %arg1: i32, %arg2: memref<2xi32, #tpu.memory_space<smem>>) -> (i32, i32, i32) {
    %c0_i32 = arith.constant 0 : i32
    %c0_i32_0 = arith.constant 0 : i32
    return %arg0, %arg1, %c0_i32 : i32, i32, i32
  }
}

</mosaic_0001>

<bundles_post_ra>
// kernel: tpu_custom_call.1
= control target key start
LH: loop header
LB: loop body
LE: loop exit
PB: predicated region body
PF: predicated region fallthrough
CT: control target
= control target key end

     0   :  { %s5135_s21 = smov [#allocation3]   ;;  %s8755_s0 = inlined_call_operand.vmem [shape: s32[2], index: 0, kind: input, shape index: {}]   ;;  %s8756_s1 = inlined_call_operand.vmem [shape: f32[2,128,32], index: 1, kind: input, shape index: {}]   ;;  %s8757_s2 = inlined_call_operand.vmem [shape: f32[2,32,128], index: 2, kind: input, shape index: {}]   ;;  %s8758_s3 = inlined_call_operand.vmem [shape: f32[33], index: 3, kind: input, shape index: {}]   ;;  %s8759_s4 = inlined_call_operand.vmem [shape: f32[2,128,128], index: 4, kind: input, shape index: {}]   ;;  %s8760_s5 = inlined_call_operand.hbm [shape: f32[2,128,128], index: 5, kind: output, shape index: {}]  }
   0x1   :  { %s11_s20 = sshll.u32 %s8755_s0, 4  ;;  %s12_s20 = int_to_ptr.vmem [resolvable:$true] %s11_s20 }
   0x2   :  { %14 = dma.vmem_to_smem %s12_s20, 16, %s5135_s21, [#allocation2] }
   0x3   :  { %5101 = dma.done.wait [#allocation2], 16 }
   0x4   :  { %5102 = vsyncadd [#allocation2], 4294967280 }
   0x5   :  { %17 = sfence }
   0x6   :  { %18 = vsyncpa [#allocation6], 0 }
   0x7   :  { %19 = vsyncpa [#allocation5], 0 }
   0x8   :  { %21 = vsyncpa [#allocation5 + $0x1], 0  ;;  %s5204_s22 = smov 0   ;;  %s5206_s23 = smov 0  }
   0x9   :  { %s5208_s24 = smov 0   ;;  %s5210_s25 = smov 0  }
   0xa   :  { %s5212_s26 = smov 0   ;;  %s5214_s0 = smov 0  }
   0xb LB: > { %s4676_s27 = sadd.s32 4294967295, %s5133_s0   ;;  %s4677_s28 = sadd.s32 4294967294, %s5133_s0   ;;  %s5133_s0 = sphi %s5214_s0, %s27_s0   ;;  %s5129_s26 = sphi %s5212_s26, %s9489_s26   ;;  %s5125_s25 = sphi %s5210_s25, %s9488_s25   ;;  %s5121_s24 = sphi %s5208_s24, %s9487_s24   ;;  %s5117_s23 = sphi %s5206_s23, %s9486_s23   ;;  %s5113_s22 = sphi %s5204_s22, %s9485_s22  }
   0xc   : > { %s39_s29 = sadd.s32 1, %s5129_s26  ;;  %s151_s30 = sadd.s32 1, %s5121_s24 }
   0xd   : > { %p41_p0 = scmp.ge.s32.totalorder %s39_s29, 2  ;;  %p161_p1 = scmp.ne.s32.totalorder %s5121_s24, %s5117_s23 }
   0xe   : > { %p162_p2 = scmp.eq.s32.totalorder %s4676_s27, 1  ;;  %p167_p3 = scmp.ne.s32.totalorder %s5117_s23, %s5113_s22 }
   0xf   : > { %s9491_s29 = smov (%p41_p0, %s39_s29), 0  ;;  %p168_p5 = scmp.eq.s32.totalorder %s4677_s28, 1 }
  0x10   : > { %p5244_p4 = por %p162_p2, %p161_p1  ;;  %s146_s7 = ssub.s32 %s5129_s26, %s9491_s29 }
  0x11   : > { %p4678_p6 = scmp.ge.s32.totalorder %s5133_s0, 1  ;;  %p149_p7 = scmp.eq.s32.totalorder %s146_s7, 0 }
  0x12   : > { %p5251_p8 = por %p168_p5, %p167_p3  ;;  %p175_p9 = scmp.lt.s32.totalorder %s5133_s0, 3 }
  0x13   : > { %s5257_s9 = scalar_select %p149_p7, %s5121_s24, %s151_s30  }
  0x14   : > { %p176_p10 = pnand %p4678_p6, %p175_p9  ;;  %p4713_p11 = scmp.eq.s32.totalorder %s4676_s27, 0 }
  0x15   : > { %s187_s12 = sshll.u32 %s8758_s3, 4  ;;  %s5136_s13 = smov [#allocation4]   ;;  %s188_s12 = int_to_ptr.vmem [resolvable:$true] %s187_s12 }
  0x16   : > { %p4705_p12 = pneg %p176_p10  ;;  %234 = sbr.rel (%p176_p10) target bundleno = 1918 (0x77e), region = 36 }
  0x18   : > { %p4706_p13 = pnand %p4713_p11, %p4705_p12 }
  0x1a   : > { %4708 = dma.vmem_to_smem (!%p4706_p13), %s188_s12, 16, %s5136_s13, [#allocation6]  }
  0x1b   : > { %5104 = dma.done.wait (%p4713_p11), [#allocation6], 16  }
  0x1c   : > { %5106 = vsyncadd (%p4713_p11), [#allocation6], 4294967280 }
  0x1d   : > { %241 = sfence }
  0x1e   : > { %p281_p0 = scmp.lt.s32.totalorder %s5125_s25, 1  ;;  %v5137_v0 = vmov 0   ;;  %v5138_v17 = vmov 1   ;;  %v5139_v18 = vmov 2   ;;  %v5140_v27 = vmov 3   ;;  %s277_s10 = sand.u32 1, %s5117_s23  }
  0x1f   : > { %4802 = vset.pattern.permute.xlu2 %v5137_v0  ;;  %4801 = vset.pattern.permute.xlu1 %v5137_v0  ;;  %v5141_v43 = vmov 4   ;;  %v5142_v56 = vmov 5   ;;  %s4683_s11 = sshll.u32 %s277_s10, 7  ;;  %s4698_s13 = sshll.u32 %s5125_s25, 7 }
  0x20   : > { %4800 = vset.pattern.permute.xlu0 %v5137_v0  ;;  %s5264_s14 = scalar_select %p281_p0, %s5125_s25, 1 }
  0x21   : > { %s8577_s12 = scalar_lea.vmem [#allocation7], %s4683_s11  ;;  %s4551_s25 = scalar_lea.hbm %s8760_s5, %s4698_s13 }
  0x22   : > { %s4695_s15 = sshll.u32 %s5264_s14, 7  ;;  %s4696_s19 = sshll.u32 %s5264_s14, 5 }
  0x23   : > { %s5272_s18 = scalar_lea.vmem %s8756_s1, %s4695_s15  ;;  %s5552_s27 = scalar_lea.vmem %s8757_s2, %s4696_s19 }
  0x24   : > { %v5275_v1 = vld [vmem:[%s5272_s18 + $0x20] sm:$0xff]  ;;  %v5278_v2 = vld [vmem:[%s5272_s18 + $0x10] sm:$0xff]  ;;  %v5287_v4 = vld [vmem:[%s5272_s18 + $0x28] sm:$0xff]  ;;  %s8492_s7 = scalar_lea.vmem %s8759_s4, %s4695_s15  ;;  %s4552_s16 = sshll.u32 %s8577_s12, 4  ;;  %s4553_s16 = int_to_ptr.vmem [resolvable:$true] %s4552_s16 }
  0x25   : > { %8797 = vst [vmem:[#allocation11_spill] sm:$0xff] %v5278_v2  ;;  %v5281_v3 = vld [vmem:[%s5272_s18] sm:$0xff]  ;;  %348 = vperm.xlu2 %4802, %v5275_v1   ;;  %338 = vperm.xlu1 %4801, %v5278_v2   ;;  %v5290_v5 = vld [vmem:[%s5272_s18 + $0x18] sm:$0xff]  ;;  %v5293_v6 = vld [vmem:[%s5272_s18 + $0x8] sm:$0xff]  ;;  %s4554_s17 = sshll.u32 %s4551_s25, 4  ;;  %s5069_s28 = scalar_lea.hbm %s8760_s5, 256  ;;  %s4555_s17 = int_to_ptr.hbm [resolvable:$true] %s4554_s17 }
  0x26   : > { %328 = vperm.xlu0 %4800, %v5281_v3   ;;  %v5299_v7 = vld [vmem:[%s5272_s18 + $0x40] sm:$0xff]  ;;  %v5302_v8 = vld [vmem:[%s5272_s18 + $0x38] sm:$0xff]  ;;  %v5305_v9 = vld [vmem:[%s5272_s18 + $0x30] sm:$0xff]  ;;  %s5063_s19 = sshra.s32 %s4555_s17, 4  ;;  %s5064_s19 = int_to_ptr.hbm [resolvable:$true] %s5063_s19 }
  0x27   : > { %v5311_v10 = vld [vmem:[%s5272_s18 + $0x58] sm:$0xff]  ;;  %v5314_v11 = vld [vmem:[%s5272_s18 + $0x50] sm:$0xff]  ;;  %v5317_v12 = vld [vmem:[%s5272_s18 + $0x48] sm:$0xff]  ;;  %s5065_s20 = scalar_lea.hbm %s5064_s19, 128  ;;  %p5070_p5 = scmp.lt.s32.totalorder %s5064_s19, %s8760_s5 }
  0x28   : > { %v5323_v13 = vld [vmem:[%s5272_s18 + $0x70] sm:$0xff]  ;;  %v5326_v14 = vld [vmem:[%s5272_s18 + $0x68] sm:$0xff]  ;;  %v5329_v15 = vld [vmem:[%s5272_s18 + $0x60] sm:$0xff]  ;;  %p5066_p1 = scmp.ne.s32.totalorder %s5064_s19, %s5065_s20  ;;  %p5071_p6 = scmp.lt.s32.totalorder %s5069_s28, %s5065_s20 }
  0x29   : > { %8798 = vst [vmem:[#allocation12_spill] sm:$0xff] %v5329_v15  ;;  %v5335_v16 = vld [vmem:[%s5272_s18 + $0x78] sm:$0xff] }
  0x2a   : > { %8799 = vst [vmem:[#allocation13_spill] sm:$0xff] %v5335_v16  ;;  %p5067_p2 = pnand %p5066_p1, %p5244_p4  ;;  %p5072_p7 = por %p5071_p6, %p5070_p5 }
  0x2c   : > { %p5068_p3 = pneg %p5067_p2 }
  0x2d   : > { %353 = vperm.xlu2 %4802, %v5287_v4   ;;  %343 = vperm.xlu1 %4801, %v5290_v5  }
  0x2e   : > { %333 = vperm.xlu0 %4800, %v5293_v6   ;;  %p5073_p9 = pnand %p5072_p7, %p5068_p3 }
  0x35   : > { %368 = vperm.xlu2 %4802, %v5299_v7   ;;  %363 = vperm.xlu1 %4801, %v5302_v8  }
  0x36   : > { %358 = vperm.xlu0 %4800, %v5305_v9  }
  0x3d   : > { %383 = vperm.xlu2 %4802, %v5311_v10   ;;  %378 = vperm.xlu1 %4801, %v5314_v11  }
  0x3e   : > { %373 = vperm.xlu0 %4800, %v5317_v12  }
  0x45   : > { %398 = vperm.xlu2 %4802, %v5323_v13   ;;  %393 = vperm.xlu1 %4801, %v5326_v14  }
  0x46   : > { %388 = vperm.xlu0 %4800, %v5329_v15  }
  0x4d   : > { %4804 = vset.pattern.permute.xlu2 %v5138_v17  ;;  %4803 = vset.pattern.permute.xlu1 %v5138_v17 }
  0x4e   : > { %403 = vperm.xlu0 %4800, %v5335_v16   ;;  %460 = vperm.xlu2 %4804, %v5293_v6  }
  0x4f   : > { %456 = vperm.xlu1 %4803, %v5281_v3  }
  0x56   : > { %4805 = vset.pattern.permute.xlu0 %v5138_v17  ;;  %472 = vperm.xlu2 %4804, %v5275_v1  }
  0x57   : > { %468 = vperm.xlu1 %4803, %v5290_v5   ;;  %464 = vperm.xlu0 %4805, %v5278_v2  }
  0x5e   : > { %480 = vperm.xlu2 %4804, %v5305_v9  }
  0x5f   : > { %476 = vperm.xlu1 %4803, %v5287_v4   ;;  %484 = vperm.xlu0 %4805, %v5302_v8  }
  0x66   : > { %492 = vperm.xlu2 %4804, %v5317_v12  }
  0x67   : > { %488 = vperm.xlu1 %4803, %v5299_v7   ;;  %496 = vperm.xlu0 %4805, %v5314_v11  }
  0x6e   : > { %504 = vperm.xlu2 %4804, %v5329_v15  }
  0x6f   : > { %500 = vperm.xlu1 %4803, %v5311_v10   ;;  %508 = vperm.xlu0 %4805, %v5326_v14  }
  0x76   : > { %516 = vperm.xlu2 %4804, %v5335_v16  }
  0x77   : > { %512 = vperm.xlu1 %4803, %v5323_v13   ;;  %4806 = vset.pattern.permute.xlu0 %v5139_v18 }
  0x78   : > { %569 = vperm.xlu0 %4806, %v5281_v3  }
  0x7e   : > { %4808 = vset.pattern.permute.xlu2 %v5139_v18 }
  0x7f   : > { %4807 = vset.pattern.permute.xlu1 %v5139_v18  ;;  %v5355_v19 = vpop.permute.xlu2 %348  ;;  %577 = vperm.xlu2 %4808, %v5278_v2  }
  0x80   : > { %8800 = vst [vmem:[#allocation14_spill] sm:$0xff] %v5355_v19  ;;  %573 = vperm.xlu1 %4807, %v5293_v6   ;;  %589 = vperm.xlu0 %4806, %v5287_v4  }
  0x87   : > { %v5360_v20 = vpop.permute.xlu2 %353  ;;  %585 = vperm.xlu2 %4808, %v5275_v1  }
  0x88   : > { %8801 = vst [vmem:[#allocation15_spill] sm:$0xff] %v5360_v20  ;;  %581 = vperm.xlu1 %4807, %v5290_v5   ;;  %601 = vperm.xlu0 %4806, %v5299_v7  }
  0x8f   : > { %v5365_v21 = vpop.permute.xlu2 %368  ;;  %597 = vperm.xlu2 %4808, %v5302_v8  }
  0x90   : > { %593 = vperm.xlu1 %4807, %v5305_v9   ;;  %613 = vperm.xlu0 %4806, %v5311_v10  }
  0x97   : > { %v5370_v22 = vpop.permute.xlu2 %383  ;;  %v5372_v23 = vpop.permute.xlu1 %338  ;;  %609 = vperm.xlu2 %4808, %v5314_v11  }
  0x98   : > { %8802 = vst [vmem:[#allocation16_spill] sm:$0xff] %v5372_v23  ;;  %605 = vperm.xlu1 %4807, %v5317_v12   ;;  %625 = vperm.xlu0 %4806, %v5323_v13   ;;  %v5377_v24 = vpop.permute.xlu0 %328 }
  0x99   : > { %8803 = vst [vmem:[#allocation17_spill] sm:$0xff] %v5377_v24 }
  0x9f   : > { %v5379_v25 = vpop.permute.xlu2 %398  ;;  %v5381_v26 = vpop.permute.xlu1 %343  ;;  %621 = vperm.xlu2 %4808, %v5326_v14  }
  0xa0   : > { %8804 = vst [vmem:[#allocation18_spill] sm:$0xff] %v5381_v26  ;;  %617 = vperm.xlu1 %4807, %v5329_v15   ;;  %4810 = vset.pattern.permute.xlu0 %v5140_v27  ;;  %v5385_v28 = vpop.permute.xlu0 %333 }
  0xa1   : > { %8805 = vst [vmem:[#allocation19_spill] sm:$0xff] %v5385_v28  ;;  %686 = vperm.xlu0 %4810, %v5293_v6  }
  0xa7   : > { %v5388_v29 = vpop.permute.xlu1 %363  ;;  %4809 = vset.pattern.permute.xlu2 %v5140_v27 }
  0xa8   : > { %8806 = vst [vmem:[#allocation20_spill] sm:$0xff] %v5388_v29  ;;  %629 = vperm.xlu1 %4807, %v5335_v16   ;;  %v5391_v30 = vpop.permute.xlu2 %460  ;;  %682 = vperm.xlu2 %4809, %v5281_v3   ;;  %v5394_v31 = vpop.permute.xlu0 %358 }
  0xa9   : > { %8807 = vst [vmem:[#allocation21_spill] sm:$0xff] %v5391_v30  ;;  %706 = vperm.xlu0 %4810, %v5305_v9  }
  0xaa   : > { %8808 = vst [vmem:[#allocation22_spill] sm:$0xff] %v5394_v31 }
  0xaf   : > { %v5397_v32 = vpop.permute.xlu1 %378 }
  0xb0   : > { %4811 = vset.pattern.permute.xlu1 %v5140_v27  ;;  %v5399_v33 = vpop.permute.xlu2 %472  ;;  %694 = vperm.xlu2 %4809, %v5290_v5   ;;  %v5402_v34 = vpop.permute.xlu0 %373 }
  0xb1   : > { %8809 = vst [vmem:[#allocation23_spill] sm:$0xff] %v5399_v33  ;;  %690 = vperm.xlu1 %4811, %v5278_v2   ;;  %718 = vperm.xlu0 %4810, %v5317_v12  }
  0xb7   : > { %v5406_v35 = vpop.permute.xlu1 %393 }
  0xb8   : > { %v5408_v36 = vpop.permute.xlu2 %480  ;;  %702 = vperm.xlu2 %4809, %v5287_v4   ;;  %v5411_v37 = vpop.permute.xlu0 %388 }
  0xb9   : > { %8810 = vst [vmem:[#allocation24_spill] sm:$0xff] %v5408_v36  ;;  %698 = vperm.xlu1 %4811, %v5275_v1   ;;  %730 = vperm.xlu0 %4810, %v5329_v15  }
  0xc0   : > { %v5415_v38 = vpop.permute.xlu2 %492  ;;  %714 = vperm.xlu2 %4809, %v5299_v7   ;;  %v5418_v39 = vpop.permute.xlu0 %403 }
  0xc1   : > { %710 = vperm.xlu1 %4811, %v5302_v8   ;;  %v5421_v40 = vpop.permute.xlu1 %456  ;;  %742 = vperm.xlu0 %4810, %v5335_v16  }
  0xc2   : > { %8811 = vst [vmem:[#allocation25_spill] sm:$0xff] %v5421_v40 }
  0xc8   : > { %v5424_v41 = vpop.permute.xlu2 %504  ;;  %726 = vperm.xlu2 %4809, %v5311_v10  }
  0xc9   : > { %722 = vperm.xlu1 %4811, %v5314_v11   ;;  %v5428_v42 = vpop.permute.xlu1 %468  ;;  %4814 = vset.pattern.permute.xlu0 %v5141_v43  ;;  %v5430_v44 = vpop.permute.xlu0 %464 }
  0xca   : > { %8812 = vst [vmem:[#allocation26_spill] sm:$0xff] %v5428_v42  ;;  %803 = vperm.xlu0 %4814, %v5278_v2   ;;  %v322_v42 = vld [vmem:[%s5552_s27] sm:$0xff] }
  0xcb   : > { %8813 = vst [vmem:[#allocation27_spill] sm:$0xff] %v5430_v44  ;;  %v5563_v40 = vperm.slane %v322_v42, 0  ;;  %v5565_v36 = vperm.slane %v322_v42, 1  ;;  %v5571_v31 = vperm.slane %v322_v42, 2  ;;  %v5581_v26 = vperm.slane %v322_v42, 3 }
  0xd0   : > { %v5433_v45 = vpop.permute.xlu2 %516  ;;  %738 = vperm.xlu2 %4809, %v5323_v13  }
  0xd1   : > { %734 = vperm.xlu1 %4811, %v5326_v14   ;;  %v5437_v46 = vpop.permute.xlu1 %476  ;;  %v5439_v47 = vpop.permute.xlu0 %484 }
  0xd2   : > { %8814 = vst [vmem:[#allocation28_spill] sm:$0xff] %v5437_v46  ;;  %823 = vperm.xlu0 %4814, %v5302_v8  }
  0xd3   : > { %8815 = vst [vmem:[#allocation29_spill] sm:$0xff] %v5439_v47 }
  0xd8   : > { %4813 = vset.pattern.permute.xlu2 %v5141_v43 }
  0xd9   : > { %4812 = vset.pattern.permute.xlu1 %v5141_v43  ;;  %v5442_v48 = vpop.permute.xlu1 %488  ;;  %v5444_v49 = vpop.permute.xlu0 %496  ;;  %799 = vperm.xlu2 %4813, %v5293_v6  }
  0xda   : > { %v5447_v50 = vpop.permute.xlu2 %577  ;;  %795 = vperm.xlu1 %4812, %v5281_v3   ;;  %835 = vperm.xlu0 %4814, %v5314_v11  }
  0xdb   : > { %8816 = vst [vmem:[#allocation30_spill] sm:$0xff] %v5447_v50 }
  0xe1   : > { %v5451_v51 = vpop.permute.xlu1 %500  ;;  %v5453_v52 = vpop.permute.xlu0 %508  ;;  %811 = vperm.xlu2 %4813, %v5275_v1  }
  0xe2   : > { %v5456_v53 = vpop.permute.xlu2 %585  ;;  %807 = vperm.xlu1 %4812, %v5290_v5   ;;  %847 = vperm.xlu0 %4814, %v5326_v14  }
  0xe3   : > { %8817 = vst [vmem:[#allocation31_spill] sm:$0xff] %v5456_v53 }
  0xe9   : > { %v5460_v54 = vpop.permute.xlu1 %512  ;;  %819 = vperm.xlu2 %4813, %v5305_v9  }
  0xea   : > { %v5463_v55 = vpop.permute.xlu2 %597  ;;  %815 = vperm.xlu1 %4812, %v5287_v4   ;;  %4815 = vset.pattern.permute.xlu0 %v5142_v56  ;;  %v5466_v57 = vpop.permute.xlu0 %569 }
  0xeb   : > { %8818 = vst [vmem:[#allocation32_spill] sm:$0xff] %v5463_v55  ;;  %908 = vperm.xlu0 %4815, %v5281_v3  }
  0xec   : > { %8819 = vst [vmem:[#allocation33_spill] sm:$0xff] %v5466_v57 }
  0xf1   : > { %831 = vperm.xlu2 %4813, %v5317_v12  }
  0xf2   : > { %v5470_v58 = vpop.permute.xlu2 %609  ;;  %827 = vperm.xlu1 %4812, %v5299_v7   ;;  %v5473_v59 = vpop.permute.xlu1 %573 }
  0xf3   : > { %8820 = vst [vmem:[#allocation34_spill] sm:$0xff] %v5473_v59  ;;  %v5475_v60 = vpop.permute.xlu0 %589  ;;  %928 = vperm.xlu0 %4815, %v5287_v4   ;;  %v643_v24 = vsub.f32 %v5470_v58, %v5571_v31 }
  0xf4   : > { %8821 = vst [vmem:[#allocation35_spill] sm:$0xff] %v5475_v60 }
  0xf5   : > { %v659_v19 = vand.u32 2147483647, %v643_v24  ;;  %v420_v24 = vsub.f32 %v5406_v35, %v5563_v40 }
  0xf9   : > { %843 = vperm.xlu2 %4813, %v5329_v15  }
  0xfa   : > { %v5479_v61 = vpop.permute.xlu2 %621  ;;  %839 = vperm.xlu1 %4812, %v5311_v10   ;;  %v5482_v62 = vpop.permute.xlu1 %581 }
  0xfb   : > { %8822 = vst [vmem:[#allocation36_spill] sm:$0xff] %v5482_v62  ;;  %v5484_v63 = vpop.permute.xlu0 %601  ;;  %940 = vperm.xlu0 %4815, %v5299_v7  }
 0x101   : > { %855 = vperm.xlu2 %4813, %v5335_v16  }
 0x102   : > { %851 = vperm.xlu1 %4812, %v5323_v13   ;;  %v5489_v0 = vpop.permute.xlu1 %593  ;;  %v5491_v17 = vpop.permute.xlu2 %682 }
 0x103   : > { %8823 = vst [vmem:[#allocation37_spill] sm:$0xff] %v5489_v0  ;;  %v5493_v18 = vpop.permute.xlu0 %613  ;;  %952 = vperm.xlu0 %4815, %v5311_v10  }
 0x104   : > { %8824 = vst [vmem:[#allocation38_spill] sm:$0xff] %v5491_v17 }
 0x109   : > { %4817 = vset.pattern.permute.xlu2 %v5142_v56 }
 0x10a   : > { %4816 = vset.pattern.permute.xlu1 %v5142_v56  ;;  %v5496_v27 = vpop.permute.xlu1 %605  ;;  %916 = vperm.xlu2 %4817, %v5278_v2   ;;  %v5499_v43 = vpop.permute.xlu2 %694  ;;  %v5143_v56 = vmov 6  }
 0x10b   : > { %8825 = vst [vmem:[#allocation39_spill] sm:$0xff] %v5499_v43  ;;  %v5501_v62 = vpop.permute.xlu0 %625  ;;  %912 = vperm.xlu1 %4816, %v5293_v6   ;;  %964 = vperm.xlu0 %4815, %v5323_v13  }
 0x112   : > { %v5505_v0 = vpop.permute.xlu1 %617  ;;  %924 = vperm.xlu2 %4817, %v5275_v1   ;;  %v5508_v17 = vpop.permute.xlu2 %702 }
 0x113   : > { %8826 = vst [vmem:[#allocation40_spill] sm:$0xff] %v5508_v17  ;;  %920 = vperm.xlu1 %4816, %v5290_v5   ;;  %4819 = vset.pattern.permute.xlu0 %v5143_v56  ;;  %v5511_v60 = vpop.permute.xlu0 %686 }
 0x114   : > { %8827 = vst [vmem:[#allocation41_spill] sm:$0xff] %v5511_v60  ;;  %1025 = vperm.xlu0 %4819, %v5293_v6  }
 0x11a   : > { %v5514_v43 = vpop.permute.xlu1 %629  ;;  %936 = vperm.xlu2 %4817, %v5302_v8   ;;  %v5517_v59 = vpop.permute.xlu2 %714 }
 0x11b   : > { %932 = vperm.xlu1 %4816, %v5305_v9   ;;  %v5520_v57 = vpop.permute.xlu0 %706 }
 0x11c   : > { %8828 = vst [vmem:[#allocation42_spill] sm:$0xff] %v5520_v57  ;;  %1045 = vperm.xlu0 %4819, %v5305_v9  }
 0x122   : > { %948 = vperm.xlu2 %4817, %v5314_v11   ;;  %v5524_v17 = vpop.permute.xlu2 %726 }
 0x123   : > { %944 = vperm.xlu1 %4816, %v5317_v12   ;;  %v5527_v60 = vpop.permute.xlu1 %690  ;;  %v719_v55 = vpop.permute.xlu0 %718 }
 0x124   : > { %8829 = vst [vmem:[#allocation43_spill] sm:$0xff] %v5527_v60  ;;  %1057 = vperm.xlu0 %4819, %v5317_v12  }
 0x12a   : > { %960 = vperm.xlu2 %4817, %v5326_v14   ;;  %v5531_v53 = vpop.permute.xlu2 %738 }
 0x12b   : > { %956 = vperm.xlu1 %4816, %v5329_v15   ;;  %v5534_v57 = vpop.permute.xlu1 %698  ;;  %v5536_v50 = vpop.permute.xlu0 %730 }
 0x12c   : > { %8830 = vst [vmem:[#allocation44_spill] sm:$0xff] %v5534_v57  ;;  %1069 = vperm.xlu0 %4819, %v5329_v15   ;;  %v5596_v15 = vperm.slane %v322_v42, 4 }
 0x132   : > { %4818 = vset.pattern.permute.xlu2 %v5143_v56 }
 0x133   : > { %968 = vperm.xlu1 %4816, %v5335_v16   ;;  %v5540_v60 = vpop.permute.xlu1 %710  ;;  %v5542_v46 = vpop.permute.xlu0 %742  ;;  %1021 = vperm.xlu2 %4818, %v5281_v3  }
 0x134   : > { %8831 = vst [vmem:[#allocation45_spill] sm:$0xff] %v5540_v60  ;;  %v5545_v47 = vpop.permute.xlu2 %799  ;;  %1081 = vperm.xlu0 %4819, %v5335_v16  }
 0x135   : > { %8832 = vst [vmem:[#allocation46_spill] sm:$0xff] %v5545_v47  ;;  %v8761_v47 = vmov 7  }
 0x13b   : > { %4820 = vset.pattern.permute.xlu1 %v5143_v56  ;;  %v723_v57 = vpop.permute.xlu1 %722  ;;  %1033 = vperm.xlu2 %4818, %v5290_v5   ;;  %v416_v56 = vsub.f32 %v5402_v34, %v5563_v40  ;;  %v642_v34 = vsub.f32 %v5496_v27, %v5571_v31  ;;  %v419_v27 = vsub.f32 %v5411_v37, %v5563_v40 }
 0x13c   : > { %v5555_v60 = vpop.permute.xlu2 %811  ;;  %1029 = vperm.xlu1 %4820, %v5278_v2   ;;  %v5558_v44 = vpop.permute.xlu0 %803  ;;  %4823 = vset.pattern.permute.xlu0 %v8761_v47  ;;  %v530_v47 = vsub.f32 %v5444_v49, %v5565_v36  ;;  %v645_v37 = vsub.f32 %v5505_v0, %v5571_v31 }
 0x13d   : > { %8833 = vst [vmem:[#allocation47_spill] sm:$0xff] %v5555_v60  ;;  %1142 = vperm.xlu0 %4823, %v5278_v2   ;;  %v529_v60 = vsub.f32 %v5415_v38, %v5565_v36  ;;  %v417_v38 = vsub.f32 %v5397_v32, %v5563_v40  ;;  %v432_v49 = vand.u32 2147483647, %v416_v56  ;;  %v658_v23 = vand.u32 2147483647, %v642_v34 }
 0x13e   : > { %8834 = vst [vmem:[#allocation48_spill] sm:$0xff] %v5558_v44  ;;  %v546_v28 = vand.u32 2147483647, %v530_v47  ;;  %v532_v32 = vsub.f32 %v5424_v41, %v5565_v36  ;;  %v533_v47 = vsub.f32 %v5453_v52, %v5565_v36 }
 0x13f   : > { %v545_v30 = vand.u32 2147483647, %v529_v60  ;;  %v433_v20 = vand.u32 2147483647, %v417_v38 }
 0x140   : > { %v548_v52 = vand.u32 2147483647, %v532_v32  ;;  %v549_v35 = vand.u32 2147483647, %v533_v47 }
 0x141   : > { %v561_v2 = vadd.f32 %v545_v30, %v432_v49  ;;  %v562_v58 = vadd.f32 %v546_v28, %v433_v20  ;;  %v435_v20 = vand.u32 2147483647, %v419_v27  ;;  %v661_v49 = vand.u32 2147483647, %v645_v37 }
 0x143   : > { %v735_v33 = vpop.permute.xlu1 %734  ;;  %1041 = vperm.xlu2 %4818, %v5287_v4   ;;  %v674_v30 = vadd.f32 %v658_v23, %v561_v2  ;;  %v675_v28 = vadd.f32 %v659_v19, %v562_v58  ;;  %v758_v2 = vsub.f32 %v5536_v50, %v5581_v26  ;;  %v436_v19 = vand.u32 2147483647, %v420_v24 }
 0x144   : > { %v5576_v44 = vpop.permute.xlu2 %819  ;;  %1037 = vperm.xlu1 %4820, %v5275_v1   ;;  %v5579_v29 = vpop.permute.xlu0 %823  ;;  %v759_v34 = vsub.f32 %v735_v33, %v5581_v26  ;;  %v535_v50 = vsub.f32 %v5433_v45, %v5565_v36 }
 0x145   : > { %8835 = vst [vmem:[#allocation49_spill] sm:$0xff] %v5576_v44  ;;  %1162 = vperm.xlu0 %4823, %v5302_v8   ;;  %v755_v44 = vsub.f32 %v719_v55, %v5581_v26  ;;  %v774_v32 = vand.u32 2147483647, %v758_v2  ;;  %v565_v47 = vadd.f32 %v549_v35, %v436_v19 }
 0x146   : > { %8836 = vst [vmem:[#allocation50_spill] sm:$0xff] %v5579_v29  ;;  %v756_v29 = vsub.f32 %v723_v57, %v5581_v26  ;;  %v775_v33 = vand.u32 2147483647, %v759_v34  ;;  %v528_v34 = vsub.f32 %v5442_v48, %v5565_v36  ;;  %v5145_v48 = vmov 8  }
 0x147   : > { %v771_v16 = vand.u32 2147483647, %v755_v44 }
 0x148   : > { %v772_v55 = vand.u32 2147483647, %v756_v29  ;;  %v646_v29 = vsub.f32 %v5479_v61, %v5571_v31  ;;  %v422_v61 = vsub.f32 %v5418_v39, %v5563_v40  ;;  %v648_v39 = vsub.f32 %v5514_v43, %v5571_v31 }
 0x149   : > { %v787_v56 = vadd.f32 %v771_v16, %v674_v30  ;;  %v564_v16 = vadd.f32 %v548_v52, %v435_v20 }
 0x14a   : > { %v788_v0 = vadd.f32 %v772_v55, %v675_v28  ;;  %v662_v27 = vand.u32 2147483647, %v646_v29  ;;  %v438_v45 = vand.u32 2147483647, %v422_v61  ;;  %v551_v28 = vand.u32 2147483647, %v535_v50 }
 0x14b   : > { %1053 = vperm.xlu2 %4818, %v5299_v7   ;;  %v677_v24 = vadd.f32 %v661_v49, %v564_v16  ;;  %v641_v61 = vsub.f32 %v5484_v63, %v5571_v31 }
 0x14c   : > { %v832_v57 = vpop.permute.xlu2 %831  ;;  %1049 = vperm.xlu1 %4820, %v5302_v8   ;;  %v5602_v60 = vpop.permute.xlu1 %795 }
 0x14d   : > { %v868_v41 = vsub.f32 %v832_v57, %v5596_v15  ;;  %v836_v42 = vpop.permute.xlu0 %835  ;;  %1174 = vperm.xlu0 %4823, %v5314_v11   ;;  %v790_v29 = vadd.f32 %v774_v32, %v677_v24  ;;  %v544_v32 = vand.u32 2147483647, %v528_v34  ;;  %v657_v24 = vand.u32 2147483647, %v641_v61 }
 0x14e   : > { %v869_v44 = vsub.f32 %v836_v42, %v5596_v15  ;;  %v678_v42 = vadd.f32 %v662_v27, %v565_v47  ;;  %v754_v47 = vsub.f32 %v5517_v59, %v5581_v26  ;;  %v418_v59 = vsub.f32 %v5370_v22, %v5563_v40 }
 0x14f   : > { %v884_v23 = vand.u32 2147483647, %v868_v41 }
 0x150   : > { %v885_v38 = vand.u32 2147483647, %v869_v44  ;;  %v761_v44 = vsub.f32 %v5542_v46, %v5581_v26  ;;  %v415_v46 = vsub.f32 %v5365_v21, %v5563_v40 }
 0x151   : > { %v5616_v57 = vadd.f32 %v884_v23, %v787_v56  ;;  %v791_v56 = vadd.f32 %v775_v33, %v678_v42  ;;  %v664_v23 = vand.u32 2147483647, %v648_v39 }
 0x152   : > { %v5620_v58 = vadd.f32 %v885_v38, %v788_v0  ;;  %v567_v0 = vadd.f32 %v551_v28, %v438_v45  ;;  %v777_v38 = vand.u32 2147483647, %v761_v44  ;;  %v431_v21 = vand.u32 2147483647, %v415_v46 }
 0x153   : > { %8837 = vst [vmem:[#allocation51_spill] sm:$0xff] %v5616_v57  ;;  %1065 = vperm.xlu2 %4818, %v5311_v10   ;;  %v8842_v45 = vmov 7   ;;  %v9086_v57 = vld [vmem:[#allocation18_spill] sm:$0xff] }
 0x154   : > { %8838 = vst [vmem:[#allocation52_spill] sm:$0xff] %v5620_v58  ;;  %v844_v55 = vpop.permute.xlu2 %843  ;;  %1061 = vperm.xlu1 %4820, %v5314_v11   ;;  %v5626_v30 = vpop.permute.xlu1 %807  ;;  %v680_v27 = vadd.f32 %v664_v23, %v567_v0  ;;  %v560_v63 = vadd.f32 %v544_v32, %v431_v21  ;;  %v434_v0 = vand.u32 2147483647, %v418_v59 }
 0x155   : > { %v871_v37 = vsub.f32 %v844_v55, %v5596_v15  ;;  %v848_v41 = vpop.permute.xlu0 %847  ;;  %1186 = vperm.xlu0 %4823, %v5326_v14  }
 0x156   : > { %v872_v20 = vsub.f32 %v848_v41, %v5596_v15  ;;  %v793_v33 = vadd.f32 %v777_v38, %v680_v27  ;;  %v770_v41 = vand.u32 2147483647, %v754_v47  ;;  %v673_v28 = vadd.f32 %v657_v24, %v560_v63 }
 0x157   : > { %v887_v52 = vand.u32 2147483647, %v871_v37  ;;  %v531_v37 = vsub.f32 %v5451_v51, %v5565_v36  ;;  %v421_v27 = vsub.f32 %v5379_v25, %v5563_v40 }
 0x158   : > { %v888_v2 = vand.u32 2147483647, %v872_v20 }
 0x159   : > { %v5635_v35 = vadd.f32 %v887_v52, %v790_v29  ;;  %v644_v29 = vsub.f32 %v5493_v18, %v5571_v31  ;;  %v547_v52 = vand.u32 2147483647, %v531_v37  ;;  %v534_v18 = vsub.f32 %v5460_v54, %v5565_v36 }
 0x15a   : > { %v5637_v43 = vadd.f32 %v888_v2, %v791_v56  ;;  %v786_v56 = vadd.f32 %v770_v41, %v673_v28  ;;  %v757_v2 = vsub.f32 %v5524_v17, %v5581_v26  ;;  %v647_v17 = vsub.f32 %v5501_v62, %v5571_v31 }
 0x15b   : > { %8839 = vst [vmem:[#allocation53_spill] sm:$0xff] %v5635_v35  ;;  %1077 = vperm.xlu2 %4818, %v5323_v13   ;;  %v660_v22 = vand.u32 2147483647, %v644_v29  ;;  %v563_v38 = vadd.f32 %v547_v52, %v434_v0  ;;  %v550_v54 = vand.u32 2147483647, %v534_v18 }
 0x15c   : > { %8840 = vst [vmem:[#allocation54_spill] sm:$0xff] %v5637_v43  ;;  %v856_v49 = vpop.permute.xlu2 %855  ;;  %1073 = vperm.xlu1 %4820, %v5326_v14   ;;  %v5643_v19 = vpop.permute.xlu1 %815  ;;  %v437_v24 = vand.u32 2147483647, %v421_v27  ;;  %v663_v25 = vand.u32 2147483647, %v647_v17 }
 0x15d   : > { %v874_v16 = vsub.f32 %v856_v49, %v5596_v15  ;;  %v5650_v50 = vpop.permute.xlu0 %908  ;;  %4824 = vset.pattern.permute.xlu0 %v5145_v48  ;;  %v773_v49 = vand.u32 2147483647, %v757_v2 }
 0x15e   : > { %1247 = vperm.xlu0 %4824, %v5281_v3   ;;  %v566_v37 = vadd.f32 %v550_v54, %v437_v24 }
 0x15f   : > { %v890_v55 = vand.u32 2147483647, %v874_v16  ;;  %v676_v16 = vadd.f32 %v660_v22, %v563_v38  ;;  %v5146_v38 = vmov 9  }
 0x161   : > { %v5656_v39 = vadd.f32 %v890_v55, %v793_v33  ;;  %v789_v33 = vadd.f32 %v773_v49, %v676_v16  ;;  %v760_v55 = vsub.f32 %v5531_v53, %v5581_v26  ;;  %v8847_v49 = vld [vmem:[#allocation13_spill] sm:$0xff] }
 0x163   : > { %8841 = vst [vmem:[#allocation55_spill] sm:$0xff] %v5656_v39  ;;  %4822 = vset.pattern.permute.xlu2 %v8842_v45  ;;  %v776_v62 = vand.u32 2147483647, %v760_v55 }
 0x164   : > { %4821 = vset.pattern.permute.xlu1 %v8842_v45  ;;  %v828_v42 = vpop.permute.xlu1 %827  ;;  %1138 = vperm.xlu2 %4822, %v5293_v6   ;;  %v5663_v20 = vpop.permute.xlu2 %916 }
 0x165   : > { %v867_v44 = vsub.f32 %v828_v42, %v5596_v15  ;;  %1134 = vperm.xlu1 %4821, %v5281_v3   ;;  %v5671_v51 = vpop.permute.xlu0 %928  ;;  %v679_v42 = vadd.f32 %v663_v25, %v566_v37 }
 0x166   : > { %1267 = vperm.xlu0 %4824, %v5287_v4  }
 0x167   : > { %v883_v23 = vand.u32 2147483647, %v867_v44  ;;  %v792_v53 = vadd.f32 %v776_v62, %v679_v42 }
 0x169   : > { %v5676_v34 = vadd.f32 %v883_v23, %v786_v56  ;;  %v8846_v23 = vld [vmem:[#allocation12_spill] sm:$0xff] }
 0x16b   : > { %8843 = vst [vmem:[#allocation56_spill] sm:$0xff] %v5676_v34 }
 0x16c   : > { %v840_v46 = vpop.permute.xlu1 %839  ;;  %1150 = vperm.xlu2 %4822, %v5275_v1   ;;  %v5681_v61 = vpop.permute.xlu2 %924 }
 0x16d   : > { %v870_v32 = vsub.f32 %v840_v46, %v5596_v15  ;;  %1146 = vperm.xlu1 %4821, %v5290_v5   ;;  %v5689_v47 = vpop.permute.xlu0 %940 }
 0x16e   : > { %1279 = vperm.xlu0 %4824, %v5299_v7  }
 0x16f   : > { %v886_v21 = vand.u32 2147483647, %v870_v32  ;;  %v8852_v32 = vld [vmem:[#allocation11_spill] sm:$0xff] }
 0x171   : > { %v5694_v63 = vadd.f32 %v886_v21, %v789_v33 }
 0x173   : > { %8844 = vst [vmem:[#allocation57_spill] sm:$0xff] %v5694_v63 }
 0x174   : > { %v852_v41 = vpop.permute.xlu1 %851  ;;  %1158 = vperm.xlu2 %4822, %v5305_v9   ;;  %v5697_v45 = vpop.permute.xlu2 %936 }
 0x175   : > { %v873_v59 = vsub.f32 %v852_v41, %v5596_v15  ;;  %1154 = vperm.xlu1 %4821, %v5287_v4   ;;  %v5701_v28 = vpop.permute.xlu0 %952  ;;  %v5147_v41 = vmov 10  }
 0x176   : > { %1291 = vperm.xlu0 %4824, %v5311_v10  }
 0x177   : > { %v889_v29 = vand.u32 2147483647, %v873_v59 }
 0x179   : > { %v5704_v44 = vadd.f32 %v889_v29, %v792_v53 }
 0x17b   : > { %8845 = vst [vmem:[#allocation58_spill] sm:$0xff] %v5704_v44 }
 0x17c   : > { %1170 = vperm.xlu2 %4822, %v5317_v12   ;;  %v5707_v52 = vpop.permute.xlu2 %948 }
 0x17d   : > { %1166 = vperm.xlu1 %4821, %v5299_v7   ;;  %v5710_v56 = vpop.permute.xlu1 %912  ;;  %v5712_v2 = vpop.permute.xlu0 %964 }
 0x17e   : > { %1303 = vperm.xlu0 %4824, %v5323_v13  }
 0x184   : > { %1182 = vperm.xlu2 %4822, %v8846_v23   ;;  %v5716_v0 = vpop.permute.xlu2 %960 }
 0x185   : > { %1178 = vperm.xlu1 %4821, %v5311_v10   ;;  %v5719_v22 = vpop.permute.xlu1 %920 }
 0x186   : > { %4828 = vset.pattern.permute.xlu0 %v5146_v38  ;;  %v5722_v18 = vpop.permute.xlu0 %1025 }
 0x187   : > { %1364 = vperm.xlu0 %4828, %v5293_v6  }
 0x18c   : > { %1194 = vperm.xlu2 %4822, %v8847_v49  }
 0x18d   : > { %1190 = vperm.xlu1 %4821, %v5323_v13   ;;  %v5726_v46 = vpop.permute.xlu1 %932  ;;  %v5728_v27 = vpop.permute.xlu2 %1021 }
 0x18e   : > { %8848 = vst [vmem:[#allocation12_spill] sm:$0xff] %v5726_v46  ;;  %v5731_v16 = vpop.permute.xlu0 %1045 }
 0x18f   : > { %8849 = vst [vmem:[#allocation13_spill] sm:$0xff] %v5728_v27  ;;  %1384 = vperm.xlu0 %4828, %v5305_v9  }
 0x190   : > { %8850 = vst [vmem:[#allocation59_spill] sm:$0xff] %v5731_v16 }
 0x194   : > { %4826 = vset.pattern.permute.xlu2 %v5145_v48 }
 0x195   : > { %4825 = vset.pattern.permute.xlu1 %v5145_v48  ;;  %v5735_v17 = vpop.permute.xlu1 %944  ;;  %1255 = vperm.xlu2 %4826, %v8852_v32   ;;  %v5738_v54 = vpop.permute.xlu2 %1033 }
 0x196   : > { %8851 = vst [vmem:[#allocation60_spill] sm:$0xff] %v5735_v17  ;;  %1251 = vperm.xlu1 %4825, %v5293_v6   ;;  %v5742_v33 = vpop.permute.xlu0 %1057 }
 0x197   : > { %8853 = vst [vmem:[#allocation11_spill] sm:$0xff] %v5738_v54  ;;  %1396 = vperm.xlu0 %4828, %v5317_v12   ;;  %v9096_v54 = vld [vmem:[#allocation27_spill] sm:$0xff] }
 0x198   : > { %8854 = vst [vmem:[#allocation61_spill] sm:$0xff] %v5742_v33  ;;  %v9093_v33 = vld [vmem:[#allocation24_spill] sm:$0xff]  ;;  %v522_v16 = vsub.f32 %v9096_v54, %v5565_v36 }
 0x19d   : > { %v5744_v55 = vpop.permute.xlu1 %956  ;;  %1263 = vperm.xlu2 %4826, %v5275_v1   ;;  %v5747_v21 = vpop.permute.xlu2 %1041 }
 0x19e   : > { %8855 = vst [vmem:[#allocation62_spill] sm:$0xff] %v5744_v55  ;;  %1259 = vperm.xlu1 %4825, %v5290_v5   ;;  %v5757_v25 = vpop.permute.xlu0 %1069 }
 0x19f   : > { %8856 = vst [vmem:[#allocation63_spill] sm:$0xff] %v5747_v21  ;;  %1408 = vperm.xlu0 %4828, %v8846_v23   ;;  %v9092_v21 = vld [vmem:[#allocation22_spill] sm:$0xff] }
 0x1a0   : > { %8859 = vst [vmem:[#allocation66_spill] sm:$0xff] %v5757_v25  ;;  %v9089_v25 = vld [vmem:[#allocation23_spill] sm:$0xff] }
 0x1a5   : > { %v5751_v48 = vpop.permute.xlu1 %968  ;;  %1275 = vperm.xlu2 %4826, %v5302_v8   ;;  %v5754_v24 = vpop.permute.xlu2 %1053 }
 0x1a6   : > { %8857 = vst [vmem:[#allocation64_spill] sm:$0xff] %v5751_v48  ;;  %1271 = vperm.xlu1 %4825, %v5305_v9   ;;  %v5767_v42 = vpop.permute.xlu0 %1081 }
 0x1a7   : > { %8858 = vst [vmem:[#allocation65_spill] sm:$0xff] %v5754_v24  ;;  %1420 = vperm.xlu0 %4828, %v8847_v49  }
 0x1a8   : > { %8862 = vst [vmem:[#allocation69_spill] sm:$0xff] %v5767_v42 }
 0x1ad   : > { %1287 = vperm.xlu2 %4826, %v5314_v11   ;;  %v5761_v37 = vpop.permute.xlu2 %1065 }
 0x1ae   : > { %8860 = vst [vmem:[#allocation67_spill] sm:$0xff] %v5761_v37  ;;  %1283 = vperm.xlu1 %4825, %v5317_v12   ;;  %v5764_v62 = vpop.permute.xlu1 %1029 }
 0x1af   : > { %8861 = vst [vmem:[#allocation68_spill] sm:$0xff] %v5764_v62  ;;  %4832 = vset.pattern.permute.xlu0 %v5147_v41  ;;  %v5776_v29 = vpop.permute.xlu0 %1142  ;;  %v9088_v62 = vmov 22  }
 0x1b0   : > { %1481 = vperm.xlu0 %4832, %v8852_v32   ;;  %8865 = vst [vmem:[#allocation72_spill] sm:$0xff] %v5776_v29 }
 0x1b5   : > { %1299 = vperm.xlu2 %4826, %v5326_v14   ;;  %v5770_v59 = vpop.permute.xlu2 %1077 }
 0x1b6   : > { %8863 = vst [vmem:[#allocation70_spill] sm:$0xff] %v5770_v59  ;;  %1295 = vperm.xlu1 %4825, %v8846_v23   ;;  %v5773_v53 = vpop.permute.xlu1 %1037 }
 0x1b7   : > { %8864 = vst [vmem:[#allocation71_spill] sm:$0xff] %v5773_v53  ;;  %v5785_v59 = vpop.permute.xlu0 %1162 }
 0x1b8   : > { %1501 = vperm.xlu0 %4832, %v5302_v8   ;;  %8868 = vst [vmem:[#allocation75_spill] sm:$0xff] %v5785_v59 }
 0x1bd   : > { %4827 = vset.pattern.permute.xlu2 %v5146_v38 }
 0x1be   : > { %1307 = vperm.xlu1 %4825, %v8847_v49   ;;  %v5779_v39 = vpop.permute.xlu1 %1049  ;;  %1360 = vperm.xlu2 %4827, %v5281_v3   ;;  %v5782_v37 = vpop.permute.xlu2 %1138 }
 0x1bf   : > { %8866 = vst [vmem:[#allocation73_spill] sm:$0xff] %v5779_v39  ;;  %v5794_v39 = vpop.permute.xlu0 %1174 }
 0x1c0   : > { %8867 = vst [vmem:[#allocation74_spill] sm:$0xff] %v5782_v37  ;;  %1513 = vperm.xlu0 %4832, %v5314_v11  }
 0x1c1   : > { %8871 = vst [vmem:[#allocation78_spill] sm:$0xff] %v5794_v39 }
 0x1c6   : > { %4829 = vset.pattern.permute.xlu1 %v5146_v38  ;;  %v5787_v35 = vpop.permute.xlu1 %1061  ;;  %1372 = vperm.xlu2 %4827, %v5290_v5   ;;  %v5790_v53 = vpop.permute.xlu2 %1150  ;;  %v5148_v38 = vmov 11  }
 0x1c7   : > { %8869 = vst [vmem:[#allocation76_spill] sm:$0xff] %v5787_v35  ;;  %1368 = vperm.xlu1 %4829, %v8852_v32   ;;  %v5809_v39 = vpop.permute.xlu0 %1186 }
 0x1c8   : > { %8870 = vst [vmem:[#allocation77_spill] sm:$0xff] %v5790_v53  ;;  %1525 = vperm.xlu0 %4832, %v5326_v14  }
 0x1c9   : > { %8876 = vst [vmem:[#allocation83_spill] sm:$0xff] %v5809_v39 }
 0x1ce   : > { %v5796_v29 = vpop.permute.xlu1 %1073  ;;  %1380 = vperm.xlu2 %4827, %v5287_v4   ;;  %v5799_v37 = vpop.permute.xlu2 %1158 }
 0x1cf   : > { %8872 = vst [vmem:[#allocation79_spill] sm:$0xff] %v5796_v29  ;;  %1376 = vperm.xlu1 %4829, %v5275_v1  }
 0x1d0   : > { %8873 = vst [vmem:[#allocation80_spill] sm:$0xff] %v5799_v37  ;;  %4833 = vset.pattern.permute.xlu0 %v5148_v38  ;;  %v5818_v35 = vpop.permute.xlu0 %1247 }
 0x1d1   : > { %1586 = vperm.xlu0 %4833, %v5281_v3   ;;  %8879 = vst [vmem:[#allocation86_spill] sm:$0xff] %v5818_v35 }
 0x1d6   : > { %1392 = vperm.xlu2 %4827, %v5299_v7   ;;  %v5804_v53 = vpop.permute.xlu2 %1170 }
 0x1d7   : > { %8874 = vst [vmem:[#allocation81_spill] sm:$0xff] %v5804_v53  ;;  %1388 = vperm.xlu1 %4829, %v5302_v8   ;;  %v5807_v59 = vpop.permute.xlu1 %1134 }
 0x1d8   : > { %8875 = vst [vmem:[#allocation82_spill] sm:$0xff] %v5807_v59  ;;  %v5827_v39 = vpop.permute.xlu0 %1267 }
 0x1d9   : > { %1606 = vperm.xlu0 %4833, %v5287_v4   ;;  %8882 = vst [vmem:[#allocation89_spill] sm:$0xff] %v5827_v39 }
 0x1de   : > { %1404 = vperm.xlu2 %4827, %v5311_v10   ;;  %v5813_v37 = vpop.permute.xlu2 %1182 }
 0x1df   : > { %8877 = vst [vmem:[#allocation84_spill] sm:$0xff] %v5813_v37  ;;  %1400 = vperm.xlu1 %4829, %v5314_v11   ;;  %v5816_v29 = vpop.permute.xlu1 %1146 }
 0x1e0   : > { %8878 = vst [vmem:[#allocation85_spill] sm:$0xff] %v5816_v29 }
 0x1e1   : > { %1618 = vperm.xlu0 %4833, %v5299_v7  }
 0x1e6   : > { %1416 = vperm.xlu2 %4827, %v5323_v13   ;;  %v5822_v53 = vpop.permute.xlu2 %1194 }
 0x1e7   : > { %8880 = vst [vmem:[#allocation87_spill] sm:$0xff] %v5822_v53  ;;  %1412 = vperm.xlu1 %4829, %v5326_v14   ;;  %v5825_v59 = vpop.permute.xlu1 %1154  ;;  %v5837_v53 = vpop.permute.xlu0 %1279 }
 0x1e8   : > { %8881 = vst [vmem:[#allocation88_spill] sm:$0xff] %v5825_v59 }
 0x1e9   : > { %1630 = vperm.xlu0 %4833, %v5311_v10   ;;  %8885 = vst [vmem:[#allocation92_spill] sm:$0xff] %v5837_v53 }
 0x1ee   : > { %4831 = vset.pattern.permute.xlu2 %v5147_v41 }
 0x1ef   : > { %4830 = vset.pattern.permute.xlu1 %v5147_v41  ;;  %v5830_v37 = vpop.permute.xlu1 %1166  ;;  %1477 = vperm.xlu2 %4831, %v5293_v6   ;;  %v5833_v29 = vpop.permute.xlu2 %1255 }
 0x1f0   : > { %8883 = vst [vmem:[#allocation90_spill] sm:$0xff] %v5830_v37  ;;  %1473 = vperm.xlu1 %4830, %v5281_v3   ;;  %v5845_v41 = vpop.permute.xlu0 %1291  ;;  %v8769_v3 = vmov 12  }
 0x1f1   : > { %8884 = vst [vmem:[#allocation91_spill] sm:$0xff] %v5833_v29  ;;  %1642 = vperm.xlu0 %4833, %v5323_v13  }
 0x1f2   : > { %8888 = vst [vmem:[#allocation95_spill] sm:$0xff] %v5845_v41  ;;  %v6056_v41 = vld [vmem:[%s5272_s18 + $0x60] sm:$0xff] }
 0x1f7   : > { %v5839_v35 = vpop.permute.xlu1 %1178  ;;  %1489 = vperm.xlu2 %4831, %v5275_v1   ;;  %v5842_v39 = vpop.permute.xlu2 %1263 }
 0x1f8   : > { %8886 = vst [vmem:[#allocation93_spill] sm:$0xff] %v5839_v35  ;;  %1485 = vperm.xlu1 %4830, %v5290_v5  }
 0x1f9   : > { %8887 = vst [vmem:[#allocation94_spill] sm:$0xff] %v5842_v39  ;;  %4837 = vset.pattern.permute.xlu0 %v8769_v3 }
 0x1fa   : > { %1703 = vperm.xlu0 %4837, %v5293_v6  }
 0x1ff   : > { %v5847_v37 = vpop.permute.xlu1 %1190  ;;  %1497 = vperm.xlu2 %4831, %v5305_v9   ;;  %v5850_v29 = vpop.permute.xlu2 %1275 }
 0x200   : > { %8889 = vst [vmem:[#allocation96_spill] sm:$0xff] %v5847_v37  ;;  %1493 = vperm.xlu1 %4830, %v5287_v4   ;;  %v5861_v37 = vpop.permute.xlu0 %1303 }
 0x201   : > { %8890 = vst [vmem:[#allocation97_spill] sm:$0xff] %v5850_v29 }
 0x202   : > { %8893 = vst [vmem:[#allocation100_spill] sm:$0xff] %v5861_v37  ;;  %1723 = vperm.xlu0 %4837, %v5305_v9   ;;  %v6044_v37 = vld [vmem:[%s5272_s18 + $0x48] sm:$0xff] }
 0x207   : > { %1509 = vperm.xlu2 %4831, %v5317_v12   ;;  %v5856_v1 = vpop.permute.xlu2 %1287 }
 0x208   : > { %8891 = vst [vmem:[#allocation98_spill] sm:$0xff] %v5856_v1  ;;  %1505 = vperm.xlu1 %4830, %v5299_v7   ;;  %v5859_v5 = vpop.permute.xlu1 %1251  ;;  %v5870_v29 = vpop.permute.xlu0 %1364 }
 0x209   : > { %8892 = vst [vmem:[#allocation99_spill] sm:$0xff] %v5859_v5 }
 0x20a   : > { %8896 = vst [vmem:[#allocation103_spill] sm:$0xff] %v5870_v29  ;;  %1735 = vperm.xlu0 %4837, %v5317_v12  }
 0x20f   : > { %1521 = vperm.xlu2 %4831, %v8846_v23   ;;  %v5865_v4 = vpop.permute.xlu2 %1299 }
 0x210   : > { %8894 = vst [vmem:[#allocation101_spill] sm:$0xff] %v5865_v4  ;;  %1517 = vperm.xlu1 %4830, %v5311_v10   ;;  %v5868_v3 = vpop.permute.xlu1 %1259  ;;  %v5879_v5 = vpop.permute.xlu0 %1384  ;;  %v5894_v4 = vld [vmem:[%s5272_s18 + $0x20] sm:$0xff] }
 0x211   : > { %8895 = vst [vmem:[#allocation102_spill] sm:$0xff] %v5868_v3 }
 0x212   : > { %8899 = vst [vmem:[#allocation106_spill] sm:$0xff] %v5879_v5  ;;  %1747 = vperm.xlu0 %4837, %v8846_v23  }
 0x217   : > { %1533 = vperm.xlu2 %4831, %v8847_v49  }
 0x218   : > { %1529 = vperm.xlu1 %4830, %v5323_v13   ;;  %v5875_v7 = vpop.permute.xlu1 %1271  ;;  %v5877_v1 = vpop.permute.xlu2 %1360 }
 0x219   : > { %8897 = vst [vmem:[#allocation104_spill] sm:$0xff] %v5875_v7  ;;  %v5889_v13 = vpop.permute.xlu0 %1396 }
 0x21a   : > { %8898 = vst [vmem:[#allocation105_spill] sm:$0xff] %v5877_v1  ;;  %1759 = vperm.xlu0 %4837, %v8847_v49  }
 0x21b   : > { %8902 = vst [vmem:[#allocation109_spill] sm:$0xff] %v5889_v13 }
 0x21f   : > { %4835 = vset.pattern.permute.xlu2 %v5148_v38 }
 0x220   : > { %4834 = vset.pattern.permute.xlu1 %v5148_v38  ;;  %v5882_v10 = vpop.permute.xlu1 %1283  ;;  %1594 = vperm.xlu2 %4835, %v8852_v32   ;;  %v5885_v3 = vpop.permute.xlu2 %1372 }
 0x221   : > { %8900 = vst [vmem:[#allocation107_spill] sm:$0xff] %v5882_v10  ;;  %1590 = vperm.xlu1 %4834, %v5293_v6   ;;  %v5900_v10 = vld [vmem:[%s5272_s18 + $0x18] sm:$0xff]  ;;  %v5903_v32 = vpop.permute.xlu0 %1408 }
 0x222   : > { %8901 = vst [vmem:[#allocation108_spill] sm:$0xff] %v5885_v3  ;;  %v5150_v3 = vmov 13  }
 0x223   : > { %8905 = vst [vmem:[#allocation112_spill] sm:$0xff] %v5903_v32  ;;  %4841 = vset.pattern.permute.xlu0 %v5150_v3 }
 0x228   : > { %v5891_v1 = vpop.permute.xlu1 %1295  ;;  %1602 = vperm.xlu2 %4835, %v5894_v4   ;;  %v5897_v38 = vpop.permute.xlu2 %1380 }
 0x229   : > { %8903 = vst [vmem:[#allocation110_spill] sm:$0xff] %v5891_v1  ;;  %1598 = vperm.xlu1 %4834, %v5900_v10   ;;  %v5912_v1 = vld [vmem:[%s5272_s18 + $0x10] sm:$0xff] }
 0x22a   : > { %8904 = vst [vmem:[#allocation111_spill] sm:$0xff] %v5897_v38  ;;  %1820 = vperm.xlu0 %4841, %v5912_v1  }
 0x230   : > { %v5905_v6 = vpop.permute.xlu1 %1307  ;;  %1614 = vperm.xlu2 %4835, %v5302_v8   ;;  %v5908_v13 = vpop.permute.xlu2 %1392 }
 0x231   : > { %8906 = vst [vmem:[#allocation113_spill] sm:$0xff] %v5905_v6  ;;  %1610 = vperm.xlu1 %4834, %v5305_v9   ;;  %v5921_v8 = vpop.permute.xlu0 %1420 }
 0x232   : > { %8907 = vst [vmem:[#allocation114_spill] sm:$0xff] %v5908_v13  ;;  %v5924_v13 = vld [vmem:[%s5272_s18 + $0x38] sm:$0xff] }
 0x233   : > { %8910 = vst [vmem:[#allocation117_spill] sm:$0xff] %v5921_v8  ;;  %1840 = vperm.xlu0 %4841, %v5924_v13  }
 0x238   : > { %1626 = vperm.xlu2 %4835, %v5314_v11   ;;  %v5916_v38 = vpop.permute.xlu2 %1404 }
 0x239   : > { %8908 = vst [vmem:[#allocation115_spill] sm:$0xff] %v5916_v38  ;;  %1622 = vperm.xlu1 %4834, %v5317_v12   ;;  %v5919_v6 = vpop.permute.xlu1 %1368  ;;  %v5933_v38 = vpop.permute.xlu0 %1481  ;;  %v5936_v12 = vld [vmem:[%s5272_s18 + $0x50] sm:$0xff] }
 0x23a   : > { %8909 = vst [vmem:[#allocation116_spill] sm:$0xff] %v5919_v6  ;;  %v8914_v6 = vmov 12  }
 0x23b   : > { %8913 = vst [vmem:[#allocation120_spill] sm:$0xff] %v5933_v38  ;;  %1852 = vperm.xlu0 %4841, %v5936_v12  }
 0x240   : > { %1638 = vperm.xlu2 %4835, %v5326_v14   ;;  %v5928_v9 = vpop.permute.xlu2 %1416  ;;  %v5944_v14 = vld [vmem:[%s5272_s18] sm:$0xff] }
 0x241   : > { %8911 = vst [vmem:[#allocation118_spill] sm:$0xff] %v5928_v9  ;;  %1634 = vperm.xlu1 %4834, %v8846_v23   ;;  %v5931_v11 = vpop.permute.xlu1 %1376  ;;  %v5952_v9 = vld [vmem:[%s5272_s18 + $0x68] sm:$0xff] }
 0x242   : > { %8912 = vst [vmem:[#allocation119_spill] sm:$0xff] %v5931_v11  ;;  %v5949_v11 = vpop.permute.xlu0 %1501 }
 0x243   : > { %8917 = vst [vmem:[#allocation123_spill] sm:$0xff] %v5949_v11  ;;  %1864 = vperm.xlu0 %4841, %v5952_v9   ;;  %v5967_v11 = vld [vmem:[%s5272_s18 + $0x28] sm:$0xff] }
 0x248   : > { %4836 = vset.pattern.permute.xlu2 %v8914_v6 }
 0x249   : > { %1646 = vperm.xlu1 %4834, %v8847_v49   ;;  %v5941_v8 = vpop.permute.xlu1 %1388  ;;  %1699 = vperm.xlu2 %4836, %v5944_v14   ;;  %v5947_v23 = vpop.permute.xlu2 %1477 }
 0x24a   : > { %8915 = vst [vmem:[#allocation121_spill] sm:$0xff] %v5941_v8  ;;  %v5962_v8 = vpop.permute.xlu0 %1513 }
 0x24b   : > { %8916 = vst [vmem:[#allocation122_spill] sm:$0xff] %v5947_v23 }
 0x24c   : > { %8920 = vst [vmem:[#allocation126_spill] sm:$0xff] %v5962_v8  ;;  %v5978_v8 = vld [vmem:[%s5272_s18 + $0x40] sm:$0xff] }
 0x251   : > { %4838 = vset.pattern.permute.xlu1 %v8914_v6  ;;  %v5956_v38 = vpop.permute.xlu1 %1400  ;;  %1711 = vperm.xlu2 %4836, %v5900_v10   ;;  %v5959_v49 = vpop.permute.xlu2 %1489  ;;  %v8771_v6 = vmov 14  }
 0x252   : > { %8918 = vst [vmem:[#allocation124_spill] sm:$0xff] %v5956_v38  ;;  %1707 = vperm.xlu1 %4838, %v5912_v1   ;;  %4842 = vset.pattern.permute.xlu0 %v8771_v6 }
 0x253   : > { %8919 = vst [vmem:[#allocation125_spill] sm:$0xff] %v5959_v49  ;;  %1925 = vperm.xlu0 %4842, %v5944_v14   ;;  %v5975_v49 = vpop.permute.xlu0 %1525 }
 0x254   : > { %8923 = vst [vmem:[#allocation129_spill] sm:$0xff] %v5975_v49 }
 0x259   : > { %v5964_v23 = vpop.permute.xlu1 %1412  ;;  %1719 = vperm.xlu2 %4836, %v5967_v11   ;;  %v5970_v32 = vpop.permute.xlu2 %1497 }
 0x25a   : > { %8921 = vst [vmem:[#allocation127_spill] sm:$0xff] %v5964_v23  ;;  %1715 = vperm.xlu1 %4838, %v5894_v4  }
 0x25b   : > { %8922 = vst [vmem:[#allocation128_spill] sm:$0xff] %v5970_v32  ;;  %1945 = vperm.xlu0 %4842, %v5967_v11   ;;  %v5988_v32 = vld [vmem:[%s5272_s18 + $0x58] sm:$0xff]  ;;  %v5993_v49 = vpop.permute.xlu0 %1586 }
 0x25c   : > { %8926 = vst [vmem:[#allocation132_spill] sm:$0xff] %v5988_v32 }
 0x25d   : > { %8928 = vst [vmem:[#allocation134_spill] sm:$0xff] %v5993_v49 }
 0x261   : > { %1731 = vperm.xlu2 %4836, %v5978_v8   ;;  %v5981_v23 = vpop.permute.xlu2 %1509 }
 0x262   : > { %8924 = vst [vmem:[#allocation130_spill] sm:$0xff] %v5981_v23  ;;  %1727 = vperm.xlu1 %4838, %v5924_v13   ;;  %v5984_v38 = vpop.permute.xlu1 %1473  ;;  %v6000_v23 = vld [vmem:[%s5272_s18 + $0x70] sm:$0xff] }
 0x263   : > { %8925 = vst [vmem:[#allocation131_spill] sm:$0xff] %v5984_v38  ;;  %1957 = vperm.xlu0 %4842, %v5978_v8   ;;  %v6008_v29 = vpop.permute.xlu0 %1606 }
 0x264   : > { %8932 = vst [vmem:[#allocation138_spill] sm:$0xff] %v6008_v29 }
 0x269   : > { %1743 = vperm.xlu2 %4836, %v5988_v32   ;;  %v5991_v6 = vpop.permute.xlu2 %1521 }
 0x26a   : > { %8927 = vst [vmem:[#allocation133_spill] sm:$0xff] %v5991_v6  ;;  %1739 = vperm.xlu1 %4838, %v5936_v12   ;;  %v5996_v7 = vpop.permute.xlu1 %1485  ;;  %v6014_v6 = vld [vmem:[%s5272_s18 + $0x8] sm:$0xff] }
 0x26b   : > { %8929 = vst [vmem:[#allocation135_spill] sm:$0xff] %v5996_v7  ;;  %1969 = vperm.xlu0 %4842, %v5988_v32  }
 0x271   : > { %1755 = vperm.xlu2 %4836, %v6000_v23   ;;  %v6003_v38 = vpop.permute.xlu2 %1533 }
 0x272   : > { %8930 = vst [vmem:[#allocation136_spill] sm:$0xff] %v6003_v38  ;;  %1751 = vperm.xlu1 %4838, %v5952_v9   ;;  %v6006_v5 = vpop.permute.xlu1 %1493  ;;  %v6020_v38 = vpop.permute.xlu0 %1618 }
 0x273   : > { %8931 = vst [vmem:[#allocation137_spill] sm:$0xff] %v6006_v5  ;;  %1981 = vperm.xlu0 %4842, %v6000_v23  }
 0x274   : > { %8935 = vst [vmem:[#allocation141_spill] sm:$0xff] %v6020_v38 }
 0x279   : > { %4840 = vset.pattern.permute.xlu2 %v5150_v3 }
 0x27a   : > { %4839 = vset.pattern.permute.xlu1 %v5150_v3  ;;  %v6011_v7 = vpop.permute.xlu1 %1505  ;;  %1816 = vperm.xlu2 %4840, %v6014_v6   ;;  %v6017_v49 = vpop.permute.xlu2 %1594 }
 0x27b   : > { %8933 = vst [vmem:[#allocation139_spill] sm:$0xff] %v6011_v7  ;;  %1812 = vperm.xlu1 %4839, %v5944_v14   ;;  %v6029_v7 = vpop.permute.xlu0 %1630 }
 0x27c   : > { %8934 = vst [vmem:[#allocation140_spill] sm:$0xff] %v6017_v49  ;;  %v6034_v49 = vld [vmem:[%s5272_s18 + $0x30] sm:$0xff] }
 0x27d   : > { %8938 = vst [vmem:[#allocation144_spill] sm:$0xff] %v6029_v7 }
 0x282   : > { %v6023_v5 = vpop.permute.xlu1 %1517  ;;  %1828 = vperm.xlu2 %4840, %v5894_v4   ;;  %v6026_v3 = vpop.permute.xlu2 %1602 }
 0x283   : > { %8936 = vst [vmem:[#allocation142_spill] sm:$0xff] %v6023_v5  ;;  %1824 = vperm.xlu1 %4839, %v5900_v10   ;;  %v5152_v5 = vmov 15  }
 0x284   : > { %8937 = vst [vmem:[#allocation143_spill] sm:$0xff] %v6026_v3  ;;  %4846 = vset.pattern.permute.xlu0 %v5152_v5  ;;  %v6041_v3 = vpop.permute.xlu0 %1642 }
 0x285   : > { %2042 = vperm.xlu0 %4846, %v6014_v6   ;;  %8941 = vst [vmem:[#allocation147_spill] sm:$0xff] %v6041_v3 }
 0x28a   : > { %v6031_v29 = vpop.permute.xlu1 %1529  ;;  %1836 = vperm.xlu2 %4840, %v6034_v49   ;;  %v6037_v38 = vpop.permute.xlu2 %1614 }
 0x28b   : > { %8939 = vst [vmem:[#allocation145_spill] sm:$0xff] %v6031_v29  ;;  %1832 = vperm.xlu1 %4839, %v5967_v11  }
 0x28c   : > { %8940 = vst [vmem:[#allocation146_spill] sm:$0xff] %v6037_v38  ;;  %v6053_v38 = vpop.permute.xlu0 %1703 }
 0x28d   : > { %2062 = vperm.xlu0 %4846, %v6034_v49   ;;  %8944 = vst [vmem:[#allocation150_spill] sm:$0xff] %v6053_v38 }
 0x292   : > { %1848 = vperm.xlu2 %4840, %v6044_v37   ;;  %v6047_v29 = vpop.permute.xlu2 %1626 }
 0x293   : > { %8942 = vst [vmem:[#allocation148_spill] sm:$0xff] %v6047_v29  ;;  %1844 = vperm.xlu1 %4839, %v5978_v8   ;;  %v6050_v7 = vpop.permute.xlu1 %1590  ;;  %v6066_v29 = vld [vmem:[%s5272_s18 + $0x78] sm:$0xff] }
 0x294   : > { %8943 = vst [vmem:[#allocation149_spill] sm:$0xff] %v6050_v7  ;;  %v6069_v7 = vpop.permute.xlu0 %1723 }
 0x295   : > { %2074 = vperm.xlu0 %4846, %v6044_v37   ;;  %8947 = vst [vmem:[#allocation153_spill] sm:$0xff] %v6066_v29 }
 0x296   : > { %8948 = vst [vmem:[#allocation154_spill] sm:$0xff] %v6069_v7 }
 0x29a   : > { %1860 = vperm.xlu2 %4840, %v6056_v41   ;;  %v6059_v39 = vpop.permute.xlu2 %1638 }
 0x29b   : > { %8945 = vst [vmem:[#allocation151_spill] sm:$0xff] %v6059_v39  ;;  %1856 = vperm.xlu1 %4839, %v5988_v32   ;;  %v6062_v3 = vpop.permute.xlu1 %1598  ;;  %v8951_v39 = vmov 14  }
 0x29c   : > { %8946 = vst [vmem:[#allocation152_spill] sm:$0xff] %v6062_v3  ;;  %v6085_v7 = vpop.permute.xlu0 %1735 }
 0x29d   : > { %2086 = vperm.xlu0 %4846, %v6056_v41   ;;  %8954 = vst [vmem:[#allocation159_spill] sm:$0xff] %v6085_v7  ;;  %v5153_v7 = vmov 16  }
 0x2a2   : > { %1872 = vperm.xlu2 %4840, %v6066_v29  }
 0x2a3   : > { %1868 = vperm.xlu1 %4839, %v6000_v23   ;;  %v6072_v38 = vpop.permute.xlu1 %1610  ;;  %v6074_v53 = vpop.permute.xlu2 %1699 }
 0x2a4   : > { %8949 = vst [vmem:[#allocation155_spill] sm:$0xff] %v6072_v38 }
 0x2a5   : > { %8950 = vst [vmem:[#allocation156_spill] sm:$0xff] %v6074_v53  ;;  %2098 = vperm.xlu0 %4846, %v6066_v29  }
 0x2aa   : > { %4844 = vset.pattern.permute.xlu2 %v8951_v39 }
 0x2ab   : > { %4843 = vset.pattern.permute.xlu1 %v8951_v39  ;;  %v6079_v3 = vpop.permute.xlu1 %1622  ;;  %1933 = vperm.xlu2 %4844, %v5912_v1   ;;  %v6082_v35 = vpop.permute.xlu2 %1711 }
 0x2ac   : > { %8952 = vst [vmem:[#allocation157_spill] sm:$0xff] %v6079_v3  ;;  %1929 = vperm.xlu1 %4843, %v6014_v6   ;;  %v6094_v39 = vpop.permute.xlu0 %1747 }
 0x2ad   : > { %8953 = vst [vmem:[#allocation158_spill] sm:$0xff] %v6082_v35  ;;  %4850 = vset.pattern.permute.xlu0 %v5153_v7 }
 0x2ae   : > { %8957 = vst [vmem:[#allocation162_spill] sm:$0xff] %v6094_v39  ;;  %2159 = vperm.xlu0 %4850, %v5912_v1  }
 0x2b3   : > { %v6088_v38 = vpop.permute.xlu1 %1634  ;;  %1941 = vperm.xlu2 %4844, %v5894_v4   ;;  %v6091_v53 = vpop.permute.xlu2 %1719 }
 0x2b4   : > { %8955 = vst [vmem:[#allocation160_spill] sm:$0xff] %v6088_v38  ;;  %1937 = vperm.xlu1 %4843, %v5900_v10   ;;  %v6103_v38 = vpop.permute.xlu0 %1759 }
 0x2b5   : > { %8956 = vst [vmem:[#allocation161_spill] sm:$0xff] %v6091_v53 }
 0x2b6   : > { %8960 = vst [vmem:[#allocation165_spill] sm:$0xff] %v6103_v38  ;;  %2179 = vperm.xlu0 %4850, %v5924_v13  }
 0x2bb   : > { %v6096_v3 = vpop.permute.xlu1 %1646  ;;  %1953 = vperm.xlu2 %4844, %v5924_v13   ;;  %v6099_v35 = vpop.permute.xlu2 %1731 }
 0x2bc   : > { %8958 = vst [vmem:[#allocation163_spill] sm:$0xff] %v6096_v3  ;;  %1949 = vperm.xlu1 %4843, %v6034_v49   ;;  %v6112_v3 = vpop.permute.xlu0 %1820 }
 0x2bd   : > { %8959 = vst [vmem:[#allocation164_spill] sm:$0xff] %v6099_v35 }
 0x2be   : > { %8963 = vst [vmem:[#allocation168_spill] sm:$0xff] %v6112_v3  ;;  %2191 = vperm.xlu0 %4850, %v5936_v12  }
 0x2c3   : > { %1965 = vperm.xlu2 %4844, %v5936_v12   ;;  %v6106_v53 = vpop.permute.xlu2 %1743 }
 0x2c4   : > { %8961 = vst [vmem:[#allocation166_spill] sm:$0xff] %v6106_v53  ;;  %1961 = vperm.xlu1 %4843, %v6044_v37   ;;  %v6109_v39 = vpop.permute.xlu1 %1707  ;;  %v6121_v53 = vpop.permute.xlu0 %1840 }
 0x2c5   : > { %8962 = vst [vmem:[#allocation167_spill] sm:$0xff] %v6109_v39 }
 0x2c6   : > { %8966 = vst [vmem:[#allocation171_spill] sm:$0xff] %v6121_v53  ;;  %2203 = vperm.xlu0 %4850, %v5952_v9  }
 0x2cb   : > { %1977 = vperm.xlu2 %4844, %v5952_v9   ;;  %v6115_v35 = vpop.permute.xlu2 %1755 }
 0x2cc   : > { %8964 = vst [vmem:[#allocation169_spill] sm:$0xff] %v6115_v35  ;;  %1973 = vperm.xlu1 %4843, %v6056_v41   ;;  %v6118_v59 = vpop.permute.xlu1 %1715  ;;  %v6136_v53 = vpop.permute.xlu0 %1852 }
 0x2cd   : > { %8965 = vst [vmem:[#allocation170_spill] sm:$0xff] %v6118_v59 }
 0x2ce   : > { %8971 = vst [vmem:[#allocation176_spill] sm:$0xff] %v6136_v53 }
 0x2d3   : > { %4845 = vset.pattern.permute.xlu2 %v5152_v5 }
 0x2d4   : > { %1985 = vperm.xlu1 %4843, %v6066_v29   ;;  %v6124_v39 = vpop.permute.xlu1 %1727  ;;  %2038 = vperm.xlu2 %4845, %v5944_v14   ;;  %v6127_v3 = vpop.permute.xlu2 %1816 }
 0x2d5   : > { %8967 = vst [vmem:[#allocation172_spill] sm:$0xff] %v6124_v39 }
 0x2d6   : > { %8968 = vst [vmem:[#allocation173_spill] sm:$0xff] %v6127_v3  ;;  %v6144_v3 = vpop.permute.xlu0 %1864 }
 0x2d7   : > { %8974 = vst [vmem:[#allocation179_spill] sm:$0xff] %v6144_v3 }
 0x2dc   : > { %4847 = vset.pattern.permute.xlu1 %v5152_v5  ;;  %v6130_v35 = vpop.permute.xlu1 %1739  ;;  %2050 = vperm.xlu2 %4845, %v5900_v10   ;;  %v6133_v59 = vpop.permute.xlu2 %1828  ;;  %v5154_v5 = vmov 17  }
 0x2dd   : > { %8969 = vst [vmem:[#allocation174_spill] sm:$0xff] %v6130_v35  ;;  %2046 = vperm.xlu1 %4847, %v5912_v1   ;;  %4851 = vset.pattern.permute.xlu0 %v5154_v5 }
 0x2de   : > { %8970 = vst [vmem:[#allocation175_spill] sm:$0xff] %v6133_v59  ;;  %2264 = vperm.xlu0 %4851, %v5944_v14  }
 0x2e4   : > { %v6138_v38 = vpop.permute.xlu1 %1751  ;;  %2058 = vperm.xlu2 %4845, %v5967_v11   ;;  %v6141_v39 = vpop.permute.xlu2 %1836 }
 0x2e5   : > { %8972 = vst [vmem:[#allocation177_spill] sm:$0xff] %v6138_v38  ;;  %2054 = vperm.xlu1 %4847, %v5894_v4   ;;  %v6154_v38 = vpop.permute.xlu0 %1925 }
 0x2e6   : > { %8973 = vst [vmem:[#allocation178_spill] sm:$0xff] %v6141_v39  ;;  %2284 = vperm.xlu0 %4851, %v5967_v11  }
 0x2e7   : > { %8977 = vst [vmem:[#allocation182_spill] sm:$0xff] %v6154_v38 }
 0x2ec   : > { %2070 = vperm.xlu2 %4845, %v5978_v8   ;;  %v6148_v59 = vpop.permute.xlu2 %1848 }
 0x2ed   : > { %8975 = vst [vmem:[#allocation180_spill] sm:$0xff] %v6148_v59  ;;  %2066 = vperm.xlu1 %4847, %v5924_v13   ;;  %v6151_v53 = vpop.permute.xlu1 %1812  ;;  %v6163_v35 = vpop.permute.xlu0 %1945 }
 0x2ee   : > { %8976 = vst [vmem:[#allocation181_spill] sm:$0xff] %v6151_v53  ;;  %2296 = vperm.xlu0 %4851, %v5978_v8  }
 0x2ef   : > { %8980 = vst [vmem:[#allocation185_spill] sm:$0xff] %v6163_v35  ;;  %v5155_v35 = vmov 18  }
 0x2f4   : > { %2082 = vperm.xlu2 %4845, %v5988_v32   ;;  %v6157_v39 = vpop.permute.xlu2 %1860 }
 0x2f5   : > { %8978 = vst [vmem:[#allocation183_spill] sm:$0xff] %v6157_v39  ;;  %2078 = vperm.xlu1 %4847, %v5936_v12   ;;  %v6160_v3 = vpop.permute.xlu1 %1824  ;;  %v6172_v39 = vpop.permute.xlu0 %1957 }
 0x2f6   : > { %8979 = vst [vmem:[#allocation184_spill] sm:$0xff] %v6160_v3  ;;  %2308 = vperm.xlu0 %4851, %v5988_v32  }
 0x2f7   : > { %8983 = vst [vmem:[#allocation188_spill] sm:$0xff] %v6172_v39 }
 0x2fc   : > { %2094 = vperm.xlu2 %4845, %v6000_v23   ;;  %v6166_v59 = vpop.permute.xlu2 %1872 }
 0x2fd   : > { %8981 = vst [vmem:[#allocation186_spill] sm:$0xff] %v6166_v59  ;;  %2090 = vperm.xlu1 %4847, %v5952_v9   ;;  %v6169_v53 = vpop.permute.xlu1 %1832  ;;  %v6187_v39 = vpop.permute.xlu0 %1969 }
 0x2fe   : > { %8982 = vst [vmem:[#allocation187_spill] sm:$0xff] %v6169_v53  ;;  %2320 = vperm.xlu0 %4851, %v6000_v23  }
 0x2ff   : > { %8988 = vst [vmem:[#allocation193_spill] sm:$0xff] %v6187_v39 }
 0x304   : > { %4849 = vset.pattern.permute.xlu2 %v5153_v7 }
 0x305   : > { %4848 = vset.pattern.permute.xlu1 %v5153_v7  ;;  %v6174_v38 = vpop.permute.xlu1 %1844  ;;  %2155 = vperm.xlu2 %4849, %v6014_v6   ;;  %v6177_v3 = vpop.permute.xlu2 %1933 }
 0x306   : > { %8984 = vst [vmem:[#allocation189_spill] sm:$0xff] %v6174_v38  ;;  %2151 = vperm.xlu1 %4848, %v5944_v14   ;;  %4855 = vset.pattern.permute.xlu0 %v5155_v35 }
 0x307   : > { %8985 = vst [vmem:[#allocation190_spill] sm:$0xff] %v6177_v3  ;;  %v6195_v3 = vpop.permute.xlu0 %1981  ;;  %2381 = vperm.xlu0 %4855, %v6014_v6  }
 0x308   : > { %8991 = vst [vmem:[#allocation196_spill] sm:$0xff] %v6195_v3 }
 0x30d   : > { %v6181_v59 = vpop.permute.xlu1 %1856  ;;  %2167 = vperm.xlu2 %4849, %v5894_v4   ;;  %v6184_v53 = vpop.permute.xlu2 %1941 }
 0x30e   : > { %8986 = vst [vmem:[#allocation191_spill] sm:$0xff] %v6181_v59  ;;  %2163 = vperm.xlu1 %4848, %v5900_v10  }
 0x30f   : > { %8987 = vst [vmem:[#allocation192_spill] sm:$0xff] %v6184_v53  ;;  %2401 = vperm.xlu0 %4855, %v6034_v49   ;;  %v6205_v39 = vpop.permute.xlu0 %2042 }
 0x310   : > { %8994 = vst [vmem:[#allocation199_spill] sm:$0xff] %v6205_v39 }
 0x315   : > { %v6189_v7 = vpop.permute.xlu1 %1868  ;;  %2175 = vperm.xlu2 %4849, %v6034_v49   ;;  %v6192_v38 = vpop.permute.xlu2 %1953 }
 0x316   : > { %8989 = vst [vmem:[#allocation194_spill] sm:$0xff] %v6189_v7  ;;  %2171 = vperm.xlu1 %4848, %v5967_v11  }
 0x317   : > { %8990 = vst [vmem:[#allocation195_spill] sm:$0xff] %v6192_v38  ;;  %2413 = vperm.xlu0 %4855, %v6044_v37   ;;  %v6214_v7 = vpop.permute.xlu0 %2062 }
 0x318   : > { %8997 = vst [vmem:[#allocation202_spill] sm:$0xff] %v6214_v7 }
 0x31d   : > { %2187 = vperm.xlu2 %4849, %v6044_v37   ;;  %v6199_v53 = vpop.permute.xlu2 %1965 }
 0x31e   : > { %8992 = vst [vmem:[#allocation197_spill] sm:$0xff] %v6199_v53  ;;  %2183 = vperm.xlu1 %4848, %v5978_v8   ;;  %v6202_v59 = vpop.permute.xlu1 %1929 }
 0x31f   : > { %8993 = vst [vmem:[#allocation198_spill] sm:$0xff] %v6202_v59  ;;  %2425 = vperm.xlu0 %4855, %v6056_v41  }
 0x325   : > { %2199 = vperm.xlu2 %4849, %v6056_v41   ;;  %v6208_v38 = vpop.permute.xlu2 %1977 }
 0x326   : > { %8995 = vst [vmem:[#allocation200_spill] sm:$0xff] %v6208_v38  ;;  %2195 = vperm.xlu1 %4848, %v5988_v32   ;;  %v6211_v3 = vpop.permute.xlu1 %1937  ;;  %v6223_v38 = vpop.permute.xlu0 %2074 }
 0x327   : > { %8996 = vst [vmem:[#allocation201_spill] sm:$0xff] %v6211_v3  ;;  %2437 = vperm.xlu0 %4855, %v6066_v29  }
 0x328   : > { %9000 = vst [vmem:[#allocation205_spill] sm:$0xff] %v6223_v38 }
 0x32d   : > { %2211 = vperm.xlu2 %4849, %v6066_v29  }
 0x32e   : > { %2207 = vperm.xlu1 %4848, %v6000_v23   ;;  %v6218_v53 = vpop.permute.xlu1 %1949  ;;  %v6220_v59 = vpop.permute.xlu2 %2038 }
 0x32f   : > { %8998 = vst [vmem:[#allocation203_spill] sm:$0xff] %v6218_v53  ;;  %v6238_v38 = vpop.permute.xlu0 %2086  ;;  %v5156_v53 = vmov 19  }
 0x330   : > { %8999 = vst [vmem:[#allocation204_spill] sm:$0xff] %v6220_v59  ;;  %4859 = vset.pattern.permute.xlu0 %v5156_v53 }
 0x331   : > { %9005 = vst [vmem:[#allocation210_spill] sm:$0xff] %v6238_v38  ;;  %2498 = vperm.xlu0 %4859, %v5912_v1  }
 0x335   : > { %4853 = vset.pattern.permute.xlu2 %v5154_v5 }
 0x336   : > { %4852 = vset.pattern.permute.xlu1 %v5154_v5  ;;  %v6225_v39 = vpop.permute.xlu1 %1961  ;;  %2272 = vperm.xlu2 %4853, %v5912_v1   ;;  %v6228_v3 = vpop.permute.xlu2 %2050 }
 0x337   : > { %9001 = vst [vmem:[#allocation206_spill] sm:$0xff] %v6225_v39  ;;  %2268 = vperm.xlu1 %4852, %v6014_v6  }
 0x338   : > { %9002 = vst [vmem:[#allocation207_spill] sm:$0xff] %v6228_v3  ;;  %v6246_v3 = vpop.permute.xlu0 %2098 }
 0x339   : > { %9008 = vst [vmem:[#allocation213_spill] sm:$0xff] %v6246_v3  ;;  %2518 = vperm.xlu0 %4859, %v5924_v13  }
 0x33e   : > { %v6232_v7 = vpop.permute.xlu1 %1973  ;;  %2280 = vperm.xlu2 %4853, %v5894_v4   ;;  %v6235_v59 = vpop.permute.xlu2 %2058 }
 0x33f   : > { %9003 = vst [vmem:[#allocation208_spill] sm:$0xff] %v6232_v7  ;;  %2276 = vperm.xlu1 %4852, %v5900_v10  }
 0x340   : > { %9004 = vst [vmem:[#allocation209_spill] sm:$0xff] %v6235_v59 }
 0x341   : > { %2530 = vperm.xlu0 %4859, %v5936_v12  }
 0x346   : > { %v6240_v5 = vpop.permute.xlu1 %1985  ;;  %2292 = vperm.xlu2 %4853, %v5924_v13   ;;  %v6243_v39 = vpop.permute.xlu2 %2070 }
 0x347   : > { %9006 = vst [vmem:[#allocation211_spill] sm:$0xff] %v6240_v5  ;;  %2288 = vperm.xlu1 %4852, %v6034_v49   ;;  %v6256_v5 = vpop.permute.xlu0 %2159 }
 0x348   : > { %9007 = vst [vmem:[#allocation212_spill] sm:$0xff] %v6243_v39 }
 0x349   : > { %9011 = vst [vmem:[#allocation216_spill] sm:$0xff] %v6256_v5  ;;  %2542 = vperm.xlu0 %4859, %v5952_v9  }
 0x34e   : > { %2304 = vperm.xlu2 %4853, %v5936_v12   ;;  %v6250_v59 = vpop.permute.xlu2 %2082 }
 0x34f   : > { %9009 = vst [vmem:[#allocation214_spill] sm:$0xff] %v6250_v59  ;;  %2300 = vperm.xlu1 %4852, %v6044_v37   ;;  %v6253_v7 = vpop.permute.xlu1 %2046  ;;  %v6265_v38 = vpop.permute.xlu0 %2179 }
 0x350   : > { %9010 = vst [vmem:[#allocation215_spill] sm:$0xff] %v6253_v7 }
 0x351   : > { %9014 = vst [vmem:[#allocation219_spill] sm:$0xff] %v6265_v38 }
 0x356   : > { %2316 = vperm.xlu2 %4853, %v5952_v9   ;;  %v6259_v39 = vpop.permute.xlu2 %2094 }
 0x357   : > { %9012 = vst [vmem:[#allocation217_spill] sm:$0xff] %v6259_v39  ;;  %2312 = vperm.xlu1 %4852, %v6056_v41   ;;  %v6262_v3 = vpop.permute.xlu1 %2054  ;;  %v6274_v5 = vpop.permute.xlu0 %2191 }
 0x358   : > { %9013 = vst [vmem:[#allocation218_spill] sm:$0xff] %v6262_v3 }
 0x359   : > { %9017 = vst [vmem:[#allocation222_spill] sm:$0xff] %v6274_v5  ;;  %v5157_v5 = vmov 20  }
 0x35a   : > { %4860 = vset.pattern.permute.xlu0 %v5157_v5 }
 0x35b   : > { %2603 = vperm.xlu0 %4860, %v5944_v14  }
 0x35e   : > { %4854 = vset.pattern.permute.xlu2 %v5155_v35 }
 0x35f   : > { %2324 = vperm.xlu1 %4852, %v6066_v29   ;;  %v6268_v59 = vpop.permute.xlu1 %2066  ;;  %2377 = vperm.xlu2 %4854, %v5944_v14   ;;  %v6271_v7 = vpop.permute.xlu2 %2155 }
 0x360   : > { %9015 = vst [vmem:[#allocation220_spill] sm:$0xff] %v6268_v59 }
 0x361   : > { %9016 = vst [vmem:[#allocation221_spill] sm:$0xff] %v6271_v7  ;;  %v6288_v7 = vpop.permute.xlu0 %2203 }
 0x362   : > { %9022 = vst [vmem:[#allocation227_spill] sm:$0xff] %v6288_v7 }
 0x363   : > { %2623 = vperm.xlu0 %4860, %v5967_v11  }
 0x367   : > { %4856 = vset.pattern.permute.xlu1 %v5155_v35  ;;  %v6276_v39 = vpop.permute.xlu1 %2078  ;;  %2389 = vperm.xlu2 %4854, %v5900_v10   ;;  %v6279_v3 = vpop.permute.xlu2 %2167 }
 0x368   : > { %9018 = vst [vmem:[#allocation223_spill] sm:$0xff] %v6276_v39  ;;  %2385 = vperm.xlu1 %4856, %v5912_v1  }
 0x369   : > { %9019 = vst [vmem:[#allocation224_spill] sm:$0xff] %v6279_v3 }
 0x36b   : > { %2635 = vperm.xlu0 %4860, %v5978_v8  }
 0x36f   : > { %v6282_v38 = vpop.permute.xlu1 %2090  ;;  %2397 = vperm.xlu2 %4854, %v5967_v11   ;;  %v6285_v59 = vpop.permute.xlu2 %2175 }
 0x370   : > { %9020 = vst [vmem:[#allocation225_spill] sm:$0xff] %v6282_v38  ;;  %2393 = vperm.xlu1 %4856, %v5894_v4   ;;  %v6297_v38 = vpop.permute.xlu0 %2264 }
 0x371   : > { %9021 = vst [vmem:[#allocation226_spill] sm:$0xff] %v6285_v59 }
 0x372   : > { %9025 = vst [vmem:[#allocation230_spill] sm:$0xff] %v6297_v38 }
 0x373   : > { %2647 = vperm.xlu0 %4860, %v5988_v32  }
 0x377   : > { %2409 = vperm.xlu2 %4854, %v5978_v8   ;;  %v6292_v35 = vpop.permute.xlu2 %2187 }
 0x378   : > { %9023 = vst [vmem:[#allocation228_spill] sm:$0xff] %v6292_v35  ;;  %2405 = vperm.xlu1 %4856, %v5924_v13   ;;  %v6295_v3 = vpop.permute.xlu1 %2151  ;;  %v6306_v59 = vpop.permute.xlu0 %2284 }
 0x379   : > { %9024 = vst [vmem:[#allocation229_spill] sm:$0xff] %v6295_v3 }
 0x37a   : > { %9028 = vst [vmem:[#allocation233_spill] sm:$0xff] %v6306_v59 }
 0x37b   : > { %2659 = vperm.xlu0 %4860, %v6000_v23  }
 0x37f   : > { %2421 = vperm.xlu2 %4854, %v5988_v32   ;;  %v6301_v39 = vpop.permute.xlu2 %2199 }
 0x380   : > { %9026 = vst [vmem:[#allocation231_spill] sm:$0xff] %v6301_v39  ;;  %2417 = vperm.xlu1 %4856, %v5936_v12   ;;  %v6304_v7 = vpop.permute.xlu1 %2163  ;;  %v6316_v38 = vpop.permute.xlu0 %2296 }
 0x381   : > { %9027 = vst [vmem:[#allocation232_spill] sm:$0xff] %v6304_v7 }
 0x382   : > { %9031 = vst [vmem:[#allocation236_spill] sm:$0xff] %v6316_v38 }
 0x387   : > { %2433 = vperm.xlu2 %4854, %v6000_v23   ;;  %v6310_v35 = vpop.permute.xlu2 %2211 }
 0x388   : > { %9029 = vst [vmem:[#allocation234_spill] sm:$0xff] %v6310_v35  ;;  %2429 = vperm.xlu1 %4856, %v5952_v9   ;;  %v6313_v3 = vpop.permute.xlu1 %2171  ;;  %v6325_v59 = vpop.permute.xlu0 %2308 }
 0x389   : > { %9030 = vst [vmem:[#allocation235_spill] sm:$0xff] %v6313_v3 }
 0x38a   : > { %9034 = vst [vmem:[#allocation239_spill] sm:$0xff] %v6325_v59 }
 0x38f   : > { %4858 = vset.pattern.permute.xlu2 %v5156_v53 }
 0x390   : > { %4857 = vset.pattern.permute.xlu1 %v5156_v53  ;;  %v6318_v39 = vpop.permute.xlu1 %2183  ;;  %2494 = vperm.xlu2 %4858, %v6014_v6   ;;  %v6321_v7 = vpop.permute.xlu2 %2272 }
 0x391   : > { %9032 = vst [vmem:[#allocation237_spill] sm:$0xff] %v6318_v39  ;;  %2490 = vperm.xlu1 %4857, %v5944_v14   ;;  %v6339_v38 = vpop.permute.xlu0 %2320 }
 0x392   : > { %9033 = vst [vmem:[#allocation238_spill] sm:$0xff] %v6321_v7  ;;  %v5158_v7 = vmov 21  }
 0x393   : > { %9039 = vst [vmem:[#allocation244_spill] sm:$0xff] %v6339_v38  ;;  %4864 = vset.pattern.permute.xlu0 %v5158_v7 }
 0x394   : > { %2720 = vperm.xlu0 %4864, %v6014_v6  }
 0x398   : > { %v6327_v35 = vpop.permute.xlu1 %2195  ;;  %2506 = vperm.xlu2 %4858, %v5894_v4   ;;  %v6330_v3 = vpop.permute.xlu2 %2280 }
 0x399   : > { %9035 = vst [vmem:[#allocation240_spill] sm:$0xff] %v6327_v35  ;;  %2502 = vperm.xlu1 %4857, %v5900_v10   ;;  %v6348_v59 = vpop.permute.xlu0 %2381 }
 0x39a   : > { %9036 = vst [vmem:[#allocation241_spill] sm:$0xff] %v6330_v3 }
 0x39b   : > { %9042 = vst [vmem:[#allocation247_spill] sm:$0xff] %v6348_v59 }
 0x39c   : > { %2740 = vperm.xlu0 %4864, %v6034_v49  }
 0x3a0   : > { %v6333_v53 = vpop.permute.xlu1 %2207  ;;  %2514 = vperm.xlu2 %4858, %v6034_v49   ;;  %v6336_v39 = vpop.permute.xlu2 %2292 }
 0x3a1   : > { %9037 = vst [vmem:[#allocation242_spill] sm:$0xff] %v6333_v53  ;;  %2510 = vperm.xlu1 %4857, %v5967_v11   ;;  %v6357_v53 = vpop.permute.xlu0 %2401 }
 0x3a2   : > { %9038 = vst [vmem:[#allocation243_spill] sm:$0xff] %v6336_v39 }
 0x3a3   : > { %9045 = vst [vmem:[#allocation250_spill] sm:$0xff] %v6357_v53 }
 0x3a4   : > { %2752 = vperm.xlu0 %4864, %v6044_v37  }
 0x3a8   : > { %2526 = vperm.xlu2 %4858, %v6044_v37   ;;  %v6343_v35 = vpop.permute.xlu2 %2304 }
 0x3a9   : > { %9040 = vst [vmem:[#allocation245_spill] sm:$0xff] %v6343_v35  ;;  %2522 = vperm.xlu1 %4857, %v5978_v8   ;;  %v6346_v3 = vpop.permute.xlu1 %2268 }
 0x3aa   : > { %9041 = vst [vmem:[#allocation246_spill] sm:$0xff] %v6346_v3  ;;  %v6367_v3 = vpop.permute.xlu0 %2413 }
 0x3ab   : > { %9048 = vst [vmem:[#allocation253_spill] sm:$0xff] %v6367_v3 }
 0x3ac   : > { %2764 = vperm.xlu0 %4864, %v6056_v41  }
 0x3b0   : > { %2538 = vperm.xlu2 %4858, %v6056_v41   ;;  %v6352_v39 = vpop.permute.xlu2 %2316 }
 0x3b1   : > { %9043 = vst [vmem:[#allocation248_spill] sm:$0xff] %v6352_v39  ;;  %2534 = vperm.xlu1 %4857, %v5988_v32   ;;  %v6355_v38 = vpop.permute.xlu1 %2276 }
 0x3b2   : > { %9044 = vst [vmem:[#allocation249_spill] sm:$0xff] %v6355_v38  ;;  %v6376_v53 = vpop.permute.xlu0 %2425 }
 0x3b3   : > { %9051 = vst [vmem:[#allocation256_spill] sm:$0xff] %v6376_v53 }
 0x3b4   : > { %2776 = vperm.xlu0 %4864, %v6066_v29  }
 0x3b8   : > { %2550 = vperm.xlu2 %4858, %v6066_v29  }
 0x3b9   : > { %2546 = vperm.xlu1 %4857, %v6000_v23   ;;  %v6362_v35 = vpop.permute.xlu1 %2288  ;;  %v6364_v59 = vpop.permute.xlu2 %2377 }
 0x3ba   : > { %9046 = vst [vmem:[#allocation251_spill] sm:$0xff] %v6362_v35 }
 0x3bb   : > { %9047 = vst [vmem:[#allocation252_spill] sm:$0xff] %v6364_v59 }
 0x3c0   : > { %4862 = vset.pattern.permute.xlu2 %v5157_v5 }
 0x3c1   : > { %4861 = vset.pattern.permute.xlu1 %v5157_v5  ;;  %v6369_v39 = vpop.permute.xlu1 %2300  ;;  %2611 = vperm.xlu2 %4862, %v5912_v1   ;;  %v6372_v38 = vpop.permute.xlu2 %2389 }
 0x3c2   : > { %9049 = vst [vmem:[#allocation254_spill] sm:$0xff] %v6369_v39  ;;  %2607 = vperm.xlu1 %4861, %v6014_v6   ;;  %v8773_v39 = vmov 22  }
 0x3c3   : > { %9050 = vst [vmem:[#allocation255_spill] sm:$0xff] %v6372_v38  ;;  %v6390_v38 = vpop.permute.xlu0 %2437  ;;  %4868 = vset.pattern.permute.xlu0 %v8773_v39 }
 0x3c4   : > { %9056 = vst [vmem:[#allocation261_spill] sm:$0xff] %v6390_v38  ;;  %2837 = vperm.xlu0 %4868, %v5912_v1  }
 0x3c9   : > { %v6378_v35 = vpop.permute.xlu1 %2312  ;;  %2619 = vperm.xlu2 %4862, %v5894_v4   ;;  %v6381_v59 = vpop.permute.xlu2 %2397 }
 0x3ca   : > { %9052 = vst [vmem:[#allocation257_spill] sm:$0xff] %v6378_v35  ;;  %2615 = vperm.xlu1 %4861, %v5900_v10  }
 0x3cb   : > { %9053 = vst [vmem:[#allocation258_spill] sm:$0xff] %v6381_v59  ;;  %v6400_v53 = vpop.permute.xlu0 %2498 }
 0x3cc   : > { %9059 = vst [vmem:[#allocation264_spill] sm:$0xff] %v6400_v53  ;;  %2857 = vperm.xlu0 %4868, %v5924_v13  }
 0x3d1   : > { %v6384_v5 = vpop.permute.xlu1 %2324  ;;  %2631 = vperm.xlu2 %4862, %v5924_v13   ;;  %v6387_v3 = vpop.permute.xlu2 %2409 }
 0x3d2   : > { %9054 = vst [vmem:[#allocation259_spill] sm:$0xff] %v6384_v5  ;;  %2627 = vperm.xlu1 %4861, %v6034_v49  }
 0x3d3   : > { %9055 = vst [vmem:[#allocation260_spill] sm:$0xff] %v6387_v3  ;;  %v6409_v38 = vpop.permute.xlu0 %2518 }
 0x3d4   : > { %9062 = vst [vmem:[#allocation267_spill] sm:$0xff] %v6409_v38  ;;  %2869 = vperm.xlu0 %4868, %v5936_v12  }
 0x3d9   : > { %2643 = vperm.xlu2 %4862, %v5936_v12   ;;  %v6395_v59 = vpop.permute.xlu2 %2421 }
 0x3da   : > { %9057 = vst [vmem:[#allocation262_spill] sm:$0xff] %v6395_v59  ;;  %2639 = vperm.xlu1 %4861, %v6044_v37   ;;  %v6398_v5 = vpop.permute.xlu1 %2385 }
 0x3db   : > { %9058 = vst [vmem:[#allocation263_spill] sm:$0xff] %v6398_v5  ;;  %v6419_v5 = vpop.permute.xlu0 %2530 }
 0x3dc   : > { %2881 = vperm.xlu0 %4868, %v5952_v9   ;;  %9065 = vst [vmem:[#allocation270_spill] sm:$0xff] %v6419_v5  ;;  %v8775_v5 = vmov 23  }
 0x3e1   : > { %2655 = vperm.xlu2 %4862, %v5952_v9   ;;  %v6404_v3 = vpop.permute.xlu2 %2433 }
 0x3e2   : > { %9060 = vst [vmem:[#allocation265_spill] sm:$0xff] %v6404_v3  ;;  %2651 = vperm.xlu1 %4861, %v6056_v41   ;;  %v6407_v39 = vpop.permute.xlu1 %2393 }
 0x3e3   : > { %9061 = vst [vmem:[#allocation266_spill] sm:$0xff] %v6407_v39  ;;  %v6427_v38 = vpop.permute.xlu0 %2542 }
 0x3e4   : > { %9068 = vst [vmem:[#allocation273_spill] sm:$0xff] %v6427_v38  ;;  %4869 = vset.pattern.permute.xlu0 %v8775_v5 }
 0x3e5   : > { %2942 = vperm.xlu0 %4869, %v5944_v14  }
 0x3e9   : > { %4863 = vset.pattern.permute.xlu2 %v5158_v7 }
 0x3ea   : > { %2663 = vperm.xlu1 %4861, %v6066_v29   ;;  %v6413_v59 = vpop.permute.xlu1 %2405  ;;  %2716 = vperm.xlu2 %4863, %v5944_v14   ;;  %v6416_v53 = vpop.permute.xlu2 %2494  ;;  %v9087_v29 = vld [vmem:[#allocation20_spill] sm:$0xff] }
 0x3eb   : > { %9063 = vst [vmem:[#allocation268_spill] sm:$0xff] %v6413_v59 }
 0x3ec   : > { %9064 = vst [vmem:[#allocation269_spill] sm:$0xff] %v6416_v53 }
 0x3ed   : > { %2962 = vperm.xlu0 %4869, %v5967_v11  }
 0x3f2   : > { %4865 = vset.pattern.permute.xlu1 %v5158_v7  ;;  %v6421_v35 = vpop.permute.xlu1 %2417  ;;  %2728 = vperm.xlu2 %4863, %v5900_v10   ;;  %v6424_v39 = vpop.permute.xlu2 %2506 }
 0x3f3   : > { %9066 = vst [vmem:[#allocation271_spill] sm:$0xff] %v6421_v35  ;;  %2724 = vperm.xlu1 %4865, %v5912_v1   ;;  %v9080_v35 = vld [vmem:[#allocation14_spill] sm:$0xff] }
 0x3f4   : > { %9067 = vst [vmem:[#allocation272_spill] sm:$0xff] %v6424_v39  ;;  %v6443_v39 = vpop.permute.xlu0 %2603 }
 0x3f5   : > { %9073 = vst [vmem:[#allocation278_spill] sm:$0xff] %v6443_v39  ;;  %2974 = vperm.xlu0 %4869, %v5978_v8  }
 0x3fa   : > { %v6429_v59 = vpop.permute.xlu1 %2429  ;;  %2736 = vperm.xlu2 %4863, %v5967_v11   ;;  %v6432_v53 = vpop.permute.xlu2 %2514 }
 0x3fb   : > { %9069 = vst [vmem:[#allocation274_spill] sm:$0xff] %v6429_v59  ;;  %2732 = vperm.xlu1 %4865, %v5894_v4  }
 0x3fc   : > { %9070 = vst [vmem:[#allocation275_spill] sm:$0xff] %v6432_v53  ;;  %v6452_v59 = vpop.permute.xlu0 %2623  ;;  %v9083_v53 = vld [vmem:[#allocation19_spill] sm:$0xff] }
 0x3fd   : > { %9076 = vst [vmem:[#allocation281_spill] sm:$0xff] %v6452_v59  ;;  %v9082_v59 = vld [vmem:[#allocation16_spill] sm:$0xff]  ;;  %2986 = vperm.xlu0 %4869, %v5988_v32  }
 0x402   : > { %2748 = vperm.xlu2 %4863, %v5978_v8   ;;  %v6438_v7 = vpop.permute.xlu2 %2526 }
 0x403   : > { %9071 = vst [vmem:[#allocation276_spill] sm:$0xff] %v6438_v7  ;;  %2744 = vperm.xlu1 %4865, %v5924_v13   ;;  %v6441_v1 = vpop.permute.xlu1 %2490  ;;  %v409_v7 = vsub.f32 %v9082_v59, %v5563_v40 }
 0x404   : > { %9072 = vst [vmem:[#allocation277_spill] sm:$0xff] %v6441_v1  ;;  %v6461_v1 = vpop.permute.xlu0 %2635 }
 0x405   : > { %9079 = vst [vmem:[#allocation284_spill] sm:$0xff] %v6461_v1  ;;  %v425_v24 = vand.u32 2147483647, %v409_v7  ;;  %2998 = vperm.xlu0 %4869, %v6000_v23  }
 0x40a   : > { %2760 = vperm.xlu2 %4863, %v5988_v32   ;;  %v6447_v38 = vpop.permute.xlu2 %2538 }
 0x40b   : > { %9074 = vst [vmem:[#allocation279_spill] sm:$0xff] %v6447_v38  ;;  %2756 = vperm.xlu1 %4865, %v5936_v12   ;;  %v6450_v5 = vpop.permute.xlu1 %2502  ;;  %v411_v38 = vsub.f32 %v9080_v35, %v5563_v40  ;;  %v9081_v12 = vld [vmem:[#allocation15_spill] sm:$0xff]  ;;  %v410_v35 = vsub.f32 %v9086_v57, %v5563_v40 }
 0x40c   : > { %9075 = vst [vmem:[#allocation280_spill] sm:$0xff] %v6450_v5  ;;  %v412_v5 = vsub.f32 %v9081_v12, %v5563_v40  ;;  %v414_v12 = vsub.f32 %v9087_v29, %v5563_v40  ;;  %v413_v29 = vsub.f32 %v9092_v21, %v5563_v40  ;;  %v6513_v63 = vpop.permute.xlu0 %2647 }
 0x40d   : > { %v427_v59 = vand.u32 2147483647, %v411_v38  ;;  %v526_v38 = vsub.f32 %v9093_v33, %v5565_v36  ;;  %v9098_v33 = vld [vmem:[#allocation28_spill] sm:$0xff]  ;;  %9103 = vst [vmem:[#allocation16_spill] sm:$0xff] %v6513_v63 }
 0x40e   : > { %v428_v42 = vand.u32 2147483647, %v412_v5  ;;  %v9094_v5 = vld [vmem:[#allocation25_spill] sm:$0xff]  ;;  %v430_v21 = vand.u32 2147483647, %v414_v12  ;;  %v525_v43 = vsub.f32 %v9098_v33, %v5565_v36 }
 0x40f   : > { %v520_v7 = vsub.f32 %v9094_v5, %v5565_v36  ;;  %v9099_v5 = vld [vmem:[#allocation30_spill] sm:$0xff]  ;;  %v429_v54 = vand.u32 2147483647, %v413_v29  ;;  %v538_v33 = vand.u32 2147483647, %v522_v16 }
 0x410   : > { %v541_v17 = vand.u32 2147483647, %v525_v43 }
 0x412   : > { %2772 = vperm.xlu2 %4863, %v6000_v23   ;;  %v6456_v13 = vpop.permute.xlu2 %2550  ;;  %v9106_v23 = vld [vmem:[#allocation36_spill] sm:$0xff] }
 0x413   : > { %9077 = vst [vmem:[#allocation282_spill] sm:$0xff] %v6456_v13  ;;  %2768 = vperm.xlu1 %4865, %v5952_v9   ;;  %v6459_v39 = vpop.permute.xlu1 %2510  ;;  %v408_v13 = vsub.f32 %v9083_v53, %v5563_v40  ;;  %v9084_v9 = vld [vmem:[#allocation21_spill] sm:$0xff]  ;;  %v524_v53 = vsub.f32 %v9089_v25, %v5565_v36  ;;  %v636_v29 = vsub.f32 %v9106_v23, %v5571_v31 }
 0x414   : > { %9078 = vst [vmem:[#allocation283_spill] sm:$0xff] %v6459_v39  ;;  %v521_v3 = vsub.f32 %v9084_v9, %v5565_v36  ;;  %v9085_v39 = vld [vmem:[#allocation17_spill] sm:$0xff] }
 0x415   : > { %v407_v1 = vsub.f32 %v9085_v39, %v5563_v40  ;;  %v424_v57 = vand.u32 2147483647, %v408_v13  ;;  %v9097_v13 = vld [vmem:[#allocation29_spill] sm:$0xff]  ;;  %v426_v40 = vand.u32 2147483647, %v410_v35 }
 0x416   : > { %v537_v25 = vand.u32 2147483647, %v521_v3  ;;  %v540_v44 = vand.u32 2147483647, %v524_v53  ;;  %v9100_v3 = vld [vmem:[#allocation31_spill] sm:$0xff]  ;;  %v9102_v35 = vld [vmem:[#allocation33_spill] sm:$0xff] }
 0x417   : > { %v423_v48 = vand.u32 2147483647, %v407_v1  ;;  %v637_v55 = vsub.f32 %v9100_v3, %v5571_v31  ;;  %v536_v1 = vand.u32 2147483647, %v520_v7  ;;  %v633_v12 = vsub.f32 %v9102_v35, %v5571_v31  ;;  %v9104_v3 = vld [vmem:[#allocation34_spill] sm:$0xff] }
 0x418   : > { %v634_v34 = vsub.f32 %v9104_v3, %v5571_v31 }
 0x419   : > { %v653_v27 = vand.u32 2147483647, %v637_v55  ;;  %v9110_v55 = vld [vmem:[#allocation38_spill] sm:$0xff] }
 0x41a   : > { %4867 = vset.pattern.permute.xlu2 %v9088_v62 }
 0x41b   : > { %4866 = vset.pattern.permute.xlu1 %v9088_v62  ;;  %v6484_v9 = vpop.permute.xlu1 %2522  ;;  %2833 = vperm.xlu2 %4867, %v6014_v6   ;;  %v6487_v39 = vpop.permute.xlu2 %2611  ;;  %v9095_v62 = vld [vmem:[#allocation26_spill] sm:$0xff] }
 0x41c   : > { %9090 = vst [vmem:[#allocation14_spill] sm:$0xff] %v6484_v9  ;;  %2829 = vperm.xlu1 %4866, %v5944_v14   ;;  %v523_v9 = vsub.f32 %v9095_v62, %v5565_v36  ;;  %v635_v14 = vsub.f32 %v9099_v5, %v5571_v31  ;;  %v9101_v62 = vld [vmem:[#allocation32_spill] sm:$0xff] }
 0x41d   : > { %9091 = vst [vmem:[#allocation15_spill] sm:$0xff] %v6487_v39  ;;  %v527_v39 = vsub.f32 %v9097_v13, %v5565_v36  ;;  %v640_v58 = vsub.f32 %v9101_v62, %v5571_v31  ;;  %v542_v13 = vand.u32 2147483647, %v526_v38  ;;  %v553_v36 = vadd.f32 %v537_v25, %v424_v57  ;;  %v9105_v62 = vld [vmem:[#allocation35_spill] sm:$0xff]  ;;  %v9109_v57 = vld [vmem:[#allocation37_spill] sm:$0xff] }
 0x41e   : > { %v539_v53 = vand.u32 2147483647, %v523_v9  ;;  %v638_v32 = vsub.f32 %v9105_v62, %v5571_v31  ;;  %v556_v38 = vadd.f32 %v540_v44, %v427_v59  ;;  %v651_v7 = vand.u32 2147483647, %v635_v14 }
 0x41f   : > { %v543_v5 = vand.u32 2147483647, %v527_v39  ;;  %v656_v35 = vand.u32 2147483647, %v640_v58  ;;  %v558_v43 = vadd.f32 %v542_v13, %v429_v54  ;;  %v552_v9 = vadd.f32 %v536_v1, %v423_v48  ;;  %v9111_v48 = vld [vmem:[#allocation39_spill] sm:$0xff] }
 0x420   : > { %v649_v39 = vand.u32 2147483647, %v633_v12  ;;  %v639_v25 = vsub.f32 %v9109_v57, %v5571_v31  ;;  %v555_v3 = vadd.f32 %v539_v53, %v426_v40  ;;  %v554_v62 = vadd.f32 %v538_v33, %v425_v24  ;;  %v9113_v24 = vld [vmem:[#allocation41_spill] sm:$0xff] }
 0x421   : > { %v559_v44 = vadd.f32 %v543_v5, %v430_v21  ;;  %v746_v58 = vsub.f32 %v9110_v55, %v5581_v26  ;;  %v557_v59 = vadd.f32 %v541_v17, %v428_v42  ;;  %v650_v14 = vand.u32 2147483647, %v634_v34  ;;  %v9114_v17 = vld [vmem:[#allocation42_spill] sm:$0xff]  ;;  %v9115_v42 = vld [vmem:[#allocation43_spill] sm:$0xff] }
 0x422   : > { %v654_v23 = vand.u32 2147483647, %v638_v32  ;;  %v667_v63 = vadd.f32 %v651_v7, %v554_v62  ;;  %v749_v13 = vsub.f32 %v9111_v48, %v5581_v26  ;;  %v665_v1 = vadd.f32 %v649_v39, %v552_v9  ;;  %v9118_v39 = vld [vmem:[#allocation46_spill] sm:$0xff] }
 0x423   : > { %v6521_v46 = vpop.permute.xlu1 %2534  ;;  %2845 = vperm.xlu2 %4867, %v5894_v4   ;;  %v6524_v16 = vpop.permute.xlu2 %2619  ;;  %v652_v4 = vand.u32 2147483647, %v636_v29  ;;  %v672_v54 = vadd.f32 %v656_v35, %v559_v44  ;;  %v655_v31 = vand.u32 2147483647, %v639_v25  ;;  %v747_v21 = vsub.f32 %v9113_v24, %v5581_v26  ;;  %v9119_v25 = vld [vmem:[#allocation47_spill] sm:$0xff]  ;;  %v9120_v44 = vld [vmem:[#allocation48_spill] sm:$0xff] }
 0x424   : > { %9107 = vst [vmem:[#allocation19_spill] sm:$0xff] %v6521_v46  ;;  %2841 = vperm.xlu1 %4866, %v5900_v10   ;;  %v9112_v10 = vld [vmem:[#allocation40_spill] sm:$0xff]  ;;  %v762_v12 = vand.u32 2147483647, %v746_v58  ;;  %v752_v34 = vsub.f32 %v9114_v17, %v5581_v26  ;;  %v748_v32 = vsub.f32 %v9115_v42, %v5581_v26  ;;  %v666_v33 = vadd.f32 %v650_v14, %v553_v36  ;;  %v6545_v35 = vpop.permute.xlu0 %2659  ;;  %v9122_v14 = vld [vmem:[#allocation49_spill] sm:$0xff]  ;;  %v9123_v17 = vld [vmem:[#allocation50_spill] sm:$0xff] }
 0x425   : > { %9108 = vst [vmem:[#allocation21_spill] sm:$0xff] %v6524_v16  ;;  %v669_v16 = vadd.f32 %v653_v27, %v556_v38  ;;  %v751_v40 = vsub.f32 %v9112_v10, %v5581_v26  ;;  %v9116_v27 = vld [vmem:[#allocation44_spill] sm:$0xff]  ;;  %v670_v5 = vadd.f32 %v654_v23, %v557_v59  ;;  %v668_v29 = vadd.f32 %v652_v4, %v555_v3  ;;  %v9117_v38 = vld [vmem:[#allocation45_spill] sm:$0xff] }
 0x426   : > { %v750_v53 = vsub.f32 %v9116_v27, %v5581_v26  ;;  %v753_v7 = vsub.f32 %v9117_v38, %v5581_v26  ;;  %v765_v9 = vand.u32 2147483647, %v749_v13  ;;  %v860_v57 = vsub.f32 %v9118_v39, %v5596_v15  ;;  %v6564_v27 = vld [vmem:[%s5552_s27] sm:$0xff]  ;;  %v9181_v46 = vld [vmem:[#allocation93_spill] sm:$0xff] }
 0x427   : > { %v863_v62 = vsub.f32 %v9119_v25, %v5596_v15  ;;  %v861_v55 = vsub.f32 %v9120_v44, %v5596_v15  ;;  %v671_v26 = vadd.f32 %v655_v31, %v558_v43  ;;  %v767_v3 = vand.u32 2147483647, %v751_v40 }
 0x428   : > { %v763_v59 = vand.u32 2147483647, %v747_v21  ;;  %v865_v23 = vsub.f32 %v9122_v14, %v5596_v15  ;;  %v778_v4 = vadd.f32 %v762_v12, %v665_v1  ;;  %v768_v48 = vand.u32 2147483647, %v752_v34 }
 0x429   : > { %v764_v13 = vand.u32 2147483647, %v748_v32  ;;  %v766_v10 = vand.u32 2147483647, %v750_v53  ;;  %v769_v24 = vand.u32 2147483647, %v753_v7  ;;  %v866_v42 = vsub.f32 %v9123_v17, %v5596_v15 }
 0x42a   : > { %v6567_v38 = vperm.slane %v6564_v27, 5  ;;  %v781_v43 = vadd.f32 %v765_v9, %v668_v29  ;;  %v876_v31 = vand.u32 2147483647, %v860_v57  ;;  %v879_v40 = vand.u32 2147483647, %v863_v62 }
 0x42b   : > { %v6553_v58 = vpop.permute.xlu1 %2546  ;;  %2853 = vperm.xlu2 %4867, %v6034_v49   ;;  %v6556_v36 = vpop.permute.xlu2 %2631  ;;  %v877_v21 = vand.u32 2147483647, %v861_v55  ;;  %v8779_v39 = vmov 24   ;;  %v881_v1 = vand.u32 2147483647, %v865_v23  ;;  %v859_v12 = vsub.f32 %v5602_v60, %v5596_v15 }
 0x42c   : > { %9121 = vst [vmem:[#allocation17_spill] sm:$0xff] %v6556_v36  ;;  %2849 = vperm.xlu1 %4866, %v5967_v11   ;;  %4873 = vset.pattern.permute.xlu0 %v8779_v39  ;;  %v783_v11 = vadd.f32 %v767_v3, %v670_v5  ;;  %v862_v34 = vsub.f32 %v5626_v30, %v5596_v15  ;;  %v882_v25 = vand.u32 2147483647, %v866_v42  ;;  %v8781_v36 = vmov 25  }
 0x42d   : > { %3059 = vperm.xlu0 %4873, %v6014_v6   ;;  %v779_v32 = vadd.f32 %v763_v59, %v666_v33  ;;  %v780_v53 = vadd.f32 %v764_v13, %v667_v63  ;;  %v782_v7 = vadd.f32 %v766_v10, %v669_v16  ;;  %v864_v29 = vsub.f32 %v5643_v19, %v5596_v15 }
 0x42e   : > { %v784_v9 = vadd.f32 %v768_v48, %v671_v26  ;;  %v785_v57 = vadd.f32 %v769_v24, %v672_v54  ;;  %v972_v5 = vsub.f32 %v5650_v50, %v6567_v38  ;;  %v974_v30 = vsub.f32 %v5663_v20, %v6567_v38  ;;  %v6597_v26 = vpop.permute.xlu0 %2720 }
 0x42f   : > { %v892_v62 = vadd.f32 %v876_v31, %v779_v32  ;;  %v895_v44 = vadd.f32 %v879_v40, %v782_v7  ;;  %v893_v60 = vadd.f32 %v877_v21, %v780_v53  ;;  %v875_v16 = vand.u32 2147483647, %v859_v12  ;;  %v9128_v32 = vld [vmem:[#allocation132_spill] sm:$0xff] }
 0x430   : > { %v6584_v63 = vadd.f32 %v881_v1, %v784_v9  ;;  %v878_v15 = vand.u32 2147483647, %v862_v34  ;;  %v977_v19 = vsub.f32 %v5671_v51, %v6567_v38  ;;  %v880_v54 = vand.u32 2147483647, %v864_v29  ;;  %v9126_v1 = vld [vmem:[#allocation12_spill] sm:$0xff]  ;;  %v9127_v34 = vld [vmem:[#allocation13_spill] sm:$0xff] }
 0x431   : > { %v976_v33 = vsub.f32 %v5681_v61, %v6567_v38  ;;  %v980_v20 = vsub.f32 %v5689_v47, %v6567_v38  ;;  %v979_v55 = vsub.f32 %v5697_v45, %v6567_v38  ;;  %v898_v3 = vadd.f32 %v882_v25, %v785_v57  ;;  %v9131_v57 = vld [vmem:[#allocation60_spill] sm:$0xff] }
 0x432   : > { %v988_v59 = vand.u32 2147483647, %v972_v5  ;;  %v983_v51 = vsub.f32 %v5701_v28, %v6567_v38  ;;  %v990_v14 = vand.u32 2147483647, %v974_v30  ;;  %v973_v61 = vsub.f32 %v5710_v56, %v6567_v38  ;;  %v9133_v5 = vld [vmem:[#allocation57_spill] sm:$0xff]  ;;  %v9134_v30 = vld [vmem:[#allocation52_spill] sm:$0xff] }
 0x433   : > { %2865 = vperm.xlu2 %4867, %v6044_v37   ;;  %v6582_v6 = vpop.permute.xlu2 %2643  ;;  %v986_v47 = vsub.f32 %v5712_v2, %v6567_v38  ;;  %v985_v45 = vsub.f32 %v5716_v0, %v6567_v38  ;;  %v891_v23 = vadd.f32 %v875_v16, %v778_v4  ;;  %v894_v48 = vadd.f32 %v878_v15, %v781_v43 }
 0x434   : > { %9124 = vst [vmem:[#allocation18_spill] sm:$0xff] %v6582_v6  ;;  %2861 = vperm.xlu1 %4866, %v5978_v8   ;;  %v6589_v50 = vpop.permute.xlu1 %2607  ;;  %v982_v8 = vsub.f32 %v5707_v52, %v6567_v38  ;;  %v993_v13 = vand.u32 2147483647, %v977_v19  ;;  %v6610_v10 = vperm.slane %v6564_v27, 6  ;;  %v896_v28 = vadd.f32 %v880_v54, %v783_v11  ;;  %v9135_v19 = vld [vmem:[#allocation62_spill] sm:$0xff] }
 0x435   : > { %3079 = vperm.xlu0 %4873, %v6034_v49   ;;  %v992_v52 = vand.u32 2147483647, %v976_v33  ;;  %v996_v24 = vand.u32 2147483647, %v980_v20  ;;  %v995_v17 = vand.u32 2147483647, %v979_v55  ;;  %v1004_v42 = vadd.f32 %v988_v59, %v891_v23 }
 0x436   : > { %v999_v56 = vand.u32 2147483647, %v983_v51  ;;  %v998_v31 = vand.u32 2147483647, %v982_v8  ;;  %v975_v2 = vsub.f32 %v5719_v22, %v6567_v38  ;;  %v6615_v40 = vadd.f32 %v990_v14, %v893_v60  ;;  %v9136_v33 = vld [vmem:[#allocation58_spill] sm:$0xff]  ;;  %v9138_v59 = vld [vmem:[#allocation64_spill] sm:$0xff] }
 0x437   : > { %v989_v0 = vand.u32 2147483647, %v973_v61  ;;  %v1002_v4 = vand.u32 2147483647, %v986_v47  ;;  %v1001_v43 = vand.u32 2147483647, %v985_v45  ;;  %v6620_v49 = vadd.f32 %v993_v13, %v896_v28 }
 0x438   : > { %v1086_v11 = vsub.f32 %v5722_v18, %v6610_v10  ;;  %v978_v12 = vsub.f32 %v9126_v1, %v6567_v38  ;;  %v1085_v22 = vsub.f32 %v9127_v34, %v6610_v10  ;;  %v6631_v7 = vadd.f32 %v992_v52, %v895_v44  ;;  %v6638_v18 = vpop.permute.xlu0 %2740  ;;  %v9137_v55 = vld [vmem:[#allocation54_spill] sm:$0xff]  ;;  %v9139_v47 = vld [vmem:[#allocation59_spill] sm:$0xff]  ;;  %v9141_v28 = vld [vmem:[#allocation61_spill] sm:$0xff] }
 0x439   : > { %v6634_v9 = vadd.f32 %v995_v17, %v898_v3  ;;  %v981_v25 = vsub.f32 %v9131_v57, %v6567_v38  ;;  %9132 = vst [vmem:[#allocation22_spill] sm:$0xff] %v6638_v18  ;;  %v6641_v60 = vadd.f32 %v999_v56, %v9133_v5  ;;  %v6644_v16 = vadd.f32 %v998_v31, %v9134_v30  ;;  %v9143_v31 = vld [vmem:[#allocation66_spill] sm:$0xff]  ;;  %v9146_v1 = vld [vmem:[#allocation68_spill] sm:$0xff] }
 0x43a   : > { %v991_v15 = vand.u32 2147483647, %v975_v2  ;;  %v984_v44 = vsub.f32 %v9135_v19, %v6567_v38  ;;  %v1005_v54 = vadd.f32 %v989_v0, %v892_v62  ;;  %v6649_v20 = vadd.f32 %v1002_v4, %v9136_v33  ;;  %v9140_v62 = vld [vmem:[#allocation11_spill] sm:$0xff]  ;;  %v9144_v0 = vld [vmem:[#allocation65_spill] sm:$0xff] }
 0x43b   : > { %2877 = vperm.xlu2 %4867, %v6056_v41   ;;  %v6618_v21 = vpop.permute.xlu2 %2655  ;;  %v9130_v41 = vld [vmem:[#allocation56_spill] sm:$0xff]  ;;  %v6652_v3 = vadd.f32 %v1001_v43, %v9137_v55  ;;  %v987_v51 = vsub.f32 %v9138_v59, %v6567_v38  ;;  %v1102_v8 = vand.u32 2147483647, %v1086_v11  ;;  %v994_v14 = vand.u32 2147483647, %v978_v12  ;;  %v9145_v43 = vld [vmem:[#allocation69_spill] sm:$0xff] }
 0x43c   : > { %9125 = vst [vmem:[#allocation20_spill] sm:$0xff] %v6618_v21  ;;  %2873 = vperm.xlu1 %4866, %v9128_v32   ;;  %v6629_v53 = vpop.permute.xlu1 %2615  ;;  %v1012_v29 = vadd.f32 %v996_v24, %v9130_v41  ;;  %v1101_v61 = vand.u32 2147483647, %v1085_v22  ;;  %v1091_v45 = vsub.f32 %v9139_v47, %v6610_v10  ;;  %v997_v23 = vand.u32 2147483647, %v981_v25  ;;  %v9142_v24 = vld [vmem:[#allocation63_spill] sm:$0xff] }
 0x43d   : > { %9129 = vst [vmem:[#allocation23_spill] sm:$0xff] %v6629_v53  ;;  %3091 = vperm.xlu0 %4873, %v6044_v37   ;;  %v1088_v13 = vsub.f32 %v9140_v62, %v6610_v10  ;;  %v1094_v52 = vsub.f32 %v9141_v28, %v6610_v10  ;;  %v1090_v17 = vsub.f32 %v9142_v24, %v6610_v10  ;;  %v1000_v56 = vand.u32 2147483647, %v984_v44  ;;  %v9147_v22 = vld [vmem:[#allocation153_spill] sm:$0xff]  ;;  %v9151_v59 = vld [vmem:[#allocation67_spill] sm:$0xff] }
 0x43e   : > { %v1007_v38 = vadd.f32 %v991_v15, %v894_v48  ;;  %v1097_v2 = vsub.f32 %v9143_v31, %v6610_v10  ;;  %v1093_v4 = vsub.f32 %v9144_v0, %v6610_v10  ;;  %v1003_v37 = vand.u32 2147483647, %v987_v51  ;;  %v6683_v25 = vld [vmem:[%s5272_s18 + $0x70] sm:$0xff]  ;;  %v9149_v15 = vld [vmem:[#allocation51_spill] sm:$0xff] }
 0x43f   : > { %v1100_v11 = vsub.f32 %v9145_v43, %v6610_v10  ;;  %v1087_v12 = vsub.f32 %v9146_v1, %v6610_v10  ;;  %v6674_v34 = vperm.slane %v6564_v27, 7  ;;  %v6677_v48 = vadd.f32 %v1102_v8, %v1005_v54  ;;  %v9150_v33 = vld [vmem:[#allocation53_spill] sm:$0xff]  ;;  %v9152_v8 = vld [vmem:[#allocation55_spill] sm:$0xff]  ;;  %v9158_v43 = vld [vmem:[#allocation76_spill] sm:$0xff] }
 0x440   : > { %v1010_v32 = vadd.f32 %v994_v14, %v6584_v63  ;;  %v6680_v41 = vadd.f32 %v1101_v61, %v1004_v42  ;;  %v1107_v57 = vand.u32 2147483647, %v1091_v45  ;;  %v1013_v27 = vadd.f32 %v997_v23, %v9149_v15  ;;  %v9153_v45 = vld [vmem:[#allocation72_spill] sm:$0xff]  ;;  %v6697_v28 = vpop.permute.xlu0 %2752  ;;  %v9156_v24 = vld [vmem:[#allocation71_spill] sm:$0xff] }
 0x441   : > { %v1104_v19 = vand.u32 2147483647, %v1088_v13  ;;  %v1110_v44 = vand.u32 2147483647, %v1094_v52  ;;  %v1106_v54 = vand.u32 2147483647, %v1090_v17  ;;  %v1016_v55 = vadd.f32 %v1000_v56, %v9150_v33 }
 0x442   : > { %v1113_v63 = vand.u32 2147483647, %v1097_v2  ;;  %v1109_v42 = vand.u32 2147483647, %v1093_v4  ;;  %v1096_v51 = vsub.f32 %v9151_v59, %v6610_v10  ;;  %v1019_v14 = vadd.f32 %v1003_v37, %v9152_v8  ;;  %9154 = vst [vmem:[#allocation25_spill] sm:$0xff] %v6697_v28  ;;  %v9155_v13 = vld [vmem:[#allocation70_spill] sm:$0xff] }
 0x443   : > { %2889 = vperm.xlu2 %4867, %v9147_v22   ;;  %v1116_v61 = vand.u32 2147483647, %v1100_v11  ;;  %v1103_v47 = vand.u32 2147483647, %v1087_v12  ;;  %v1200_v62 = vsub.f32 %v9153_v45, %v6674_v34  ;;  %v6699_v23 = vadd.f32 %v1107_v57, %v1010_v32  ;;  %v9157_v56 = vld [vmem:[#allocation73_spill] sm:$0xff]  ;;  %v6708_v2 = vld [vmem:[%s5272_s18 + $0x60] sm:$0xff] }
 0x444   : > { %2885 = vperm.xlu1 %4866, %v6683_v25   ;;  %v6686_v5 = vpop.permute.xlu1 %2627  ;;  %v6688_v30 = vpop.permute.xlu2 %2716  ;;  %v1099_v52 = vsub.f32 %v9155_v13, %v6610_v10  ;;  %v1089_v17 = vsub.f32 %v9156_v24, %v6610_v10  ;;  %v1092_v31 = vsub.f32 %v9157_v56, %v6610_v10  ;;  %v6711_v0 = vadd.f32 %v1104_v19, %v1007_v38  ;;  %v9159_v32 = vld [vmem:[#allocation79_spill] sm:$0xff]  ;;  %v9165_v8 = vld [vmem:[#allocation77_spill] sm:$0xff]  ;;  %v9167_v45 = vld [vmem:[#allocation80_spill] sm:$0xff] }
 0x445   : > { %9148 = vst [vmem:[#allocation24_spill] sm:$0xff] %v6688_v30  ;;  %3103 = vperm.xlu0 %4873, %v6708_v2   ;;  %v6713_v4 = vadd.f32 %v1110_v44, %v1013_v27  ;;  %v6716_v37 = vadd.f32 %v1106_v54, %v6620_v49  ;;  %v1095_v11 = vsub.f32 %v9158_v43, %v6610_v10  ;;  %v1112_v22 = vand.u32 2147483647, %v1096_v51  ;;  %v9160_v49 = vld [vmem:[#allocation74_spill] sm:$0xff]  ;;  %v6732_v44 = vld [vmem:[%s5552_s27 + $0x8] sm:$0xff] }
 0x446   : > { %v6720_v1 = vadd.f32 %v1113_v63, %v1016_v55  ;;  %v6722_v12 = vadd.f32 %v1109_v42, %v1012_v29  ;;  %v1098_v57 = vsub.f32 %v9159_v32, %v6610_v10  ;;  %v6726_v15 = vadd.f32 %v1116_v61, %v1019_v14  ;;  %v9162_v63 = vld [vmem:[#allocation75_spill] sm:$0xff]  ;;  %v9166_v61 = vld [vmem:[#allocation78_spill] sm:$0xff]  ;;  %v6753_v13 = vld [vmem:[%s5272_s18 + $0x8] sm:$0xff] }
 0x447   : > { %v1119_v38 = vadd.f32 %v1103_v47, %v6615_v40  ;;  %v1216_v27 = vand.u32 2147483647, %v1200_v62  ;;  %v1199_v19 = vsub.f32 %v9160_v49, %v6674_v34  ;;  %v9161_v54 = vmov 23   ;;  %v6741_v40 = vld [vmem:[%s5272_s18 + $0x10] sm:$0xff] }
 0x448   : > { %v1115_v33 = vand.u32 2147483647, %v1099_v52  ;;  %v1105_v29 = vand.u32 2147483647, %v1089_v17  ;;  %v1108_v55 = vand.u32 2147483647, %v1092_v31  ;;  %v1205_v42 = vsub.f32 %v9162_v63, %v6674_v34 }
 0x449   : > { %v1111_v51 = vand.u32 2147483647, %v1095_v11  ;;  %v1202_v14 = vsub.f32 %v9165_v8, %v6674_v34  ;;  %v1208_v47 = vsub.f32 %v9166_v61, %v6674_v34  ;;  %v1204_v62 = vsub.f32 %v9167_v45, %v6674_v34  ;;  %v9168_v17 = vld [vmem:[#allocation83_spill] sm:$0xff]  ;;  %v9169_v32 = vld [vmem:[#allocation81_spill] sm:$0xff]  ;;  %v6776_v61 = vld [vmem:[%s5272_s18 + $0x78] sm:$0xff] }
 0x44a   : > { %v6757_v52 = vadd.f32 %v1112_v22, %v6641_v60  ;;  %v1114_v24 = vand.u32 2147483647, %v1098_v57  ;;  %v1211_v56 = vsub.f32 %v9168_v17, %v6674_v34  ;;  %v6762_v31 = vperm.slane %v6732_v44, 0  ;;  %v6780_v17 = vpop.permute.xlu0 %2764 }
 0x44b   : > { %4871 = vset.pattern.permute.xlu2 %v9161_v54  ;;  %v6764_v43 = vadd.f32 %v1216_v27, %v1119_v38  ;;  %v1215_v11 = vand.u32 2147483647, %v1199_v19  ;;  %v1207_v49 = vsub.f32 %v9169_v32, %v6674_v34  ;;  %v6771_v8 = vadd.f32 %v1115_v33, %v6649_v20  ;;  %9171 = vst [vmem:[#allocation29_spill] sm:$0xff] %v6780_v17 }
 0x44c   : > { %4870 = vset.pattern.permute.xlu1 %v9161_v54  ;;  %v6738_v10 = vpop.permute.xlu1 %2639  ;;  %2950 = vperm.xlu2 %4871, %v6741_v40   ;;  %v6744_v59 = vpop.permute.xlu2 %2728  ;;  %v9170_v54 = vld [vmem:[#allocation82_spill] sm:$0xff]  ;;  %v1121_v60 = vadd.f32 %v1105_v29, %v6631_v7  ;;  %v1124_v22 = vadd.f32 %v1108_v55, %v6634_v9  ;;  %v1221_v57 = vand.u32 2147483647, %v1205_v42  ;;  %v1127_v38 = vadd.f32 %v1111_v51, %v6644_v16  ;;  %v9173_v9 = vld [vmem:[#allocation88_spill] sm:$0xff] }
 0x44d   : > { %9163 = vst [vmem:[#allocation26_spill] sm:$0xff] %v6738_v10  ;;  %2946 = vperm.xlu1 %4870, %v6753_v13   ;;  %v1198_v63 = vsub.f32 %v9170_v54, %v6674_v34  ;;  %3115 = vperm.xlu0 %4873, %v6776_v61   ;;  %v1218_v27 = vand.u32 2147483647, %v1202_v14  ;;  %v1224_v19 = vand.u32 2147483647, %v1208_v47  ;;  %v1130_v20 = vadd.f32 %v1114_v24, %v6652_v3  ;;  %v9172_v7 = vld [vmem:[#allocation86_spill] sm:$0xff] }
 0x44e   : > { %9164 = vst [vmem:[#allocation27_spill] sm:$0xff] %v6744_v59  ;;  %v1220_v45 = vand.u32 2147483647, %v1204_v62  ;;  %v1227_v33 = vand.u32 2147483647, %v1211_v56  ;;  %v1311_v29 = vsub.f32 %v9172_v7, %v6762_v31  ;;  %v1203_v55 = vsub.f32 %v9173_v9, %v6674_v34  ;;  %v9174_v14 = vld [vmem:[#allocation84_spill] sm:$0xff] }
 0x44f   : > { %v6788_v42 = vadd.f32 %v1215_v11, %v6677_v48  ;;  %v1223_v16 = vand.u32 2147483647, %v1207_v49  ;;  %v1214_v51 = vand.u32 2147483647, %v1198_v63  ;;  %v1210_v47 = vsub.f32 %v9174_v14, %v6674_v34  ;;  %v9175_v3 = vld [vmem:[#allocation85_spill] sm:$0xff]  ;;  %v9177_v54 = vld [vmem:[#allocation90_spill] sm:$0xff] }
 0x450   : > { %v6792_v62 = vadd.f32 %v1221_v57, %v1124_v22  ;;  %v1201_v24 = vsub.f32 %v9175_v3, %v6674_v34  ;;  %v9176_v56 = vld [vmem:[#allocation89_spill] sm:$0xff]  ;;  %v1206_v7 = vsub.f32 %v9177_v54, %v6674_v34  ;;  %v6803_v48 = vld [vmem:[%s5272_s18 + $0x20] sm:$0xff]  ;;  %v1234_v49 = vadd.f32 %v1218_v27, %v1121_v60  ;;  %v6816_v3 = vld [vmem:[%s5272_s18 + $0x18] sm:$0xff] }
 0x451   : > { %v1316_v32 = vsub.f32 %v9176_v56, %v6762_v31  ;;  %v6808_v63 = vadd.f32 %v1224_v19, %v1127_v38  ;;  %v6811_v22 = vadd.f32 %v1220_v45, %v6699_v23  ;;  %v9180_v57 = vld [vmem:[#allocation87_spill] sm:$0xff]  ;;  %v6819_v56 = vadd.f32 %v1227_v33, %v1130_v20  ;;  %v9182_v27 = vld [vmem:[#allocation92_spill] sm:$0xff] }
 0x452   : > { %v1213_v14 = vsub.f32 %v9180_v57, %v6674_v34  ;;  %v1327_v54 = vand.u32 2147483647, %v1311_v29  ;;  %v1219_v39 = vand.u32 2147483647, %v1203_v55  ;;  %v6824_v60 = vadd.f32 %v1223_v16, %v6713_v4  ;;  %v9183_v20 = vld [vmem:[#allocation91_spill] sm:$0xff]  ;;  %v9184_v55 = vld [vmem:[#allocation94_spill] sm:$0xff]  ;;  %v6850_v30 = vpop.permute.xlu0 %2776 }
 0x453   : > { %v1230_v23 = vadd.f32 %v1214_v51, %v6680_v41  ;;  %v1226_v38 = vand.u32 2147483647, %v1210_v47  ;;  %v1319_v19 = vsub.f32 %v9182_v27, %v6762_v31  ;;  %v1217_v45 = vand.u32 2147483647, %v1201_v24  ;;  %v9186_v47 = vld [vmem:[#allocation96_spill] sm:$0xff]  ;;  %9189 = vst [vmem:[#allocation31_spill] sm:$0xff] %v6850_v30 }
 0x454   : > { %v6800_v9 = vpop.permute.xlu1 %2651  ;;  %2958 = vperm.xlu2 %4871, %v6803_v48   ;;  %v6806_v11 = vpop.permute.xlu2 %2736  ;;  %v1332_v57 = vand.u32 2147483647, %v1316_v32  ;;  %v1222_v59 = vand.u32 2147483647, %v1206_v7  ;;  %v1313_v33 = vsub.f32 %v9183_v20, %v6762_v31  ;;  %v1229_v29 = vand.u32 2147483647, %v1213_v14 }
 0x455   : > { %9178 = vst [vmem:[#allocation28_spill] sm:$0xff] %v6800_v9  ;;  %2954 = vperm.xlu1 %4870, %v6816_v3   ;;  %v1315_v53 = vsub.f32 %v9184_v55, %v6762_v31  ;;  %v6836_v41 = vperm.slane %v6732_v44, 1  ;;  %v1235_v16 = vadd.f32 %v1219_v39, %v6716_v37  ;;  %v1212_v24 = vsub.f32 %v9186_v47, %v6674_v34  ;;  %v9187_v32 = vld [vmem:[#allocation97_spill] sm:$0xff]  ;;  %v9188_v55 = vld [vmem:[#allocation100_spill] sm:$0xff] }
 0x456   : > { %9179 = vst [vmem:[#allocation30_spill] sm:$0xff] %v6806_v11  ;;  %v1209_v11 = vsub.f32 %v9181_v46, %v6674_v34  ;;  %v9185_v46 = vld [vmem:[#allocation95_spill] sm:$0xff]  ;;  %v1318_v7 = vsub.f32 %v9187_v32, %v6762_v31  ;;  %v6843_v14 = vadd.f32 %v1327_v54, %v1230_v23  ;;  %v6846_v27 = vadd.f32 %v1226_v38, %v6720_v1  ;;  %v6861_v1 = vld [vmem:[%s5272_s18 + $0x38] sm:$0xff]  ;;  %v9210_v9 = vld [vmem:[#allocation113_spill] sm:$0xff] }
 0x457   : > { %v1322_v4 = vsub.f32 %v9185_v46, %v6762_v31  ;;  %v1335_v20 = vand.u32 2147483647, %v1319_v19  ;;  %v1325_v46 = vsub.f32 %v9188_v55, %v6762_v31  ;;  %v6853_v39 = vadd.f32 %v1217_v45, %v6711_v0  ;;  %v9193_v45 = vld [vmem:[#allocation103_spill] sm:$0xff]  ;;  %4877 = vset.pattern.permute.xlu0 %v8781_v36 }
 0x458   : > { %v1225_v51 = vand.u32 2147483647, %v1209_v11  ;;  %v1238_v34 = vadd.f32 %v1222_v59, %v6722_v12  ;;  %v1329_v37 = vand.u32 2147483647, %v1313_v33  ;;  %v9190_v11 = vld [vmem:[#allocation99_spill] sm:$0xff]  ;;  %v6867_v19 = vadd.f32 %v1229_v29, %v6726_v15  ;;  %v6872_v59 = vld [vmem:[%s5272_s18 + $0x30] sm:$0xff]  ;;  %3176 = vperm.xlu0 %4877, %v6741_v40  }
 0x459   : > { %v1312_v54 = vsub.f32 %v9190_v11, %v6762_v31  ;;  %v1331_v47 = vand.u32 2147483647, %v1315_v53  ;;  %v1338_v0 = vand.u32 2147483647, %v1322_v4  ;;  %v1425_v12 = vsub.f32 %v9193_v45, %v6836_v41  ;;  %v9195_v53 = vld [vmem:[#allocation106_spill] sm:$0xff] }
 0x45a   : > { %v6875_v33 = vadd.f32 %v1332_v57, %v1235_v16  ;;  %v1241_v32 = vadd.f32 %v1225_v51, %v6757_v52  ;;  %v1228_v55 = vand.u32 2147483647, %v1212_v24  ;;  %v1334_v11 = vand.u32 2147483647, %v1318_v7  ;;  %v9196_v57 = vld [vmem:[#allocation104_spill] sm:$0xff]  ;;  %v9197_v24 = vld [vmem:[#allocation101_spill] sm:$0xff] }
 0x45b   : > { %v1341_v21 = vand.u32 2147483647, %v1325_v46  ;;  %v1430_v29 = vsub.f32 %v9195_v53, %v6836_v41  ;;  %v6883_v4 = vadd.f32 %v1329_v37, %v6764_v43  ;;  %v6885_v45 = vadd.f32 %v1335_v20, %v1238_v34  ;;  %v9198_v46 = vld [vmem:[#allocation107_spill] sm:$0xff] }
 0x45c   : > { %v6858_v23 = vpop.permute.xlu1 %2663  ;;  %2970 = vperm.xlu2 %4871, %v6861_v1   ;;  %v6864_v38 = vpop.permute.xlu2 %2748  ;;  %v1328_v6 = vand.u32 2147483647, %v1312_v54  ;;  %v1317_v16 = vsub.f32 %v9196_v57, %v6762_v31  ;;  %v6890_v52 = vadd.f32 %v1331_v47, %v1234_v49  ;;  %v1441_v51 = vand.u32 2147483647, %v1425_v12  ;;  %v9199_v49 = vld [vmem:[#allocation102_spill] sm:$0xff]  ;;  %v9200_v47 = vld [vmem:[#allocation105_spill] sm:$0xff] }
 0x45d   : > { %9191 = vst [vmem:[#allocation32_spill] sm:$0xff] %v6858_v23  ;;  %2966 = vperm.xlu1 %4870, %v6872_v59   ;;  %v1324_v7 = vsub.f32 %v9197_v24, %v6762_v31  ;;  %v1320_v43 = vsub.f32 %v9198_v46, %v6762_v31  ;;  %v6897_v20 = vadd.f32 %v1338_v0, %v1241_v32  ;;  %v1446_v53 = vand.u32 2147483647, %v1430_v29  ;;  %v9201_v57 = vld [vmem:[#allocation110_spill] sm:$0xff]  ;;  %v6915_v46 = vld [vmem:[%s5272_s18 + $0x50] sm:$0xff] }
 0x45e   : > { %9192 = vst [vmem:[#allocation33_spill] sm:$0xff] %v6864_v38  ;;  %v9194_v38 = vld [vmem:[#allocation98_spill] sm:$0xff]  ;;  %v1244_v34 = vadd.f32 %v1228_v55, %v6771_v8  ;;  %v6901_v37 = vadd.f32 %v1334_v11, %v6792_v62  ;;  %v1314_v54 = vsub.f32 %v9199_v49, %v6762_v31  ;;  %v1424_v12 = vsub.f32 %v9200_v47, %v6836_v41  ;;  %v9202_v8 = vld [vmem:[#allocation108_spill] sm:$0xff]  ;;  %v9203_v62 = vld [vmem:[#allocation109_spill] sm:$0xff] }
 0x45f   : > { %v1321_v15 = vsub.f32 %v9194_v38, %v6762_v31  ;;  %v1323_v24 = vsub.f32 %v9201_v57, %v6762_v31  ;;  %v1344_v0 = vadd.f32 %v1328_v6, %v6788_v42  ;;  %v1333_v32 = vand.u32 2147483647, %v1317_v16  ;;  %v9205_v47 = vld [vmem:[#allocation112_spill] sm:$0xff] }
 0x460   : > { %v1427_v55 = vsub.f32 %v9202_v8, %v6836_v41  ;;  %v1433_v11 = vsub.f32 %v9203_v62, %v6836_v41  ;;  %v1340_v49 = vand.u32 2147483647, %v1324_v7  ;;  %v1336_v29 = vand.u32 2147483647, %v1320_v43  ;;  %v6926_v42 = vld [vmem:[%s5272_s18 + $0x48] sm:$0xff]  ;;  %v6931_v8 = vpop.permute.xlu0 %2837  ;;  %v9208_v7 = vld [vmem:[#allocation111_spill] sm:$0xff]  ;;  %3196 = vperm.xlu0 %4877, %v6861_v1  }
 0x461   : > { %v1337_v38 = vand.u32 2147483647, %v1321_v15  ;;  %v1436_v57 = vsub.f32 %v9205_v47, %v6836_v41  ;;  %v6923_v6 = vperm.slane %v6732_v44, 2  ;;  %9207 = vst [vmem:[#allocation36_spill] sm:$0xff] %v6931_v8  ;;  %v6933_v62 = vadd.f32 %v1341_v21, %v1244_v34 }
 0x462   : > { %v1330_v36 = vand.u32 2147483647, %v1314_v54  ;;  %v1429_v43 = vsub.f32 %v9208_v7, %v6836_v41  ;;  %v1440_v23 = vand.u32 2147483647, %v1424_v12  ;;  %v1339_v17 = vand.u32 2147483647, %v1323_v24 }
 0x463   : > { %v6940_v30 = vadd.f32 %v1337_v38, %v6808_v63  ;;  %v1326_v28 = vsub.f32 %v9210_v9, %v6762_v31  ;;  %v1349_v21 = vadd.f32 %v1333_v32, %v6811_v22  ;;  %v1443_v34 = vand.u32 2147483647, %v1427_v55  ;;  %v9211_v63 = vld [vmem:[#allocation120_spill] sm:$0xff] }
 0x464   : > { %2982 = vperm.xlu2 %4871, %v6915_v46   ;;  %v6918_v15 = vpop.permute.xlu2 %2760  ;;  %v1449_v54 = vand.u32 2147483647, %v1433_v11  ;;  %v6948_v8 = vadd.f32 %v1340_v49, %v6819_v56  ;;  %v1352_v7 = vadd.f32 %v1336_v29, %v6824_v60  ;;  %v1539_v38 = vsub.f32 %v9211_v63, %v6923_v6  ;;  %v9212_v22 = vld [vmem:[#allocation116_spill] sm:$0xff]  ;;  %v9215_v49 = vld [vmem:[#allocation121_spill] sm:$0xff] }
 0x465   : > { %9204 = vst [vmem:[#allocation34_spill] sm:$0xff] %v6918_v15  ;;  %2978 = vperm.xlu1 %4870, %v6926_v42   ;;  %v6929_v16 = vpop.permute.xlu1 %2724  ;;  %v9209_v15 = vld [vmem:[#allocation117_spill] sm:$0xff]  ;;  %v1346_v31 = vadd.f32 %v1330_v36, %v6853_v39  ;;  %v1445_v9 = vand.u32 2147483647, %v1429_v43  ;;  %v1426_v12 = vsub.f32 %v9212_v22, %v6836_v41  ;;  %v6958_v24 = vadd.f32 %v1440_v23, %v6843_v14  ;;  %v9214_v36 = vld [vmem:[#allocation115_spill] sm:$0xff] }
 0x466   : > { %9206 = vst [vmem:[#allocation35_spill] sm:$0xff] %v6929_v16  ;;  %v1439_v47 = vsub.f32 %v9209_v15, %v6836_v41  ;;  %v6944_v16 = vadd.f32 %v1441_v51, %v1344_v0  ;;  %v1452_v15 = vand.u32 2147483647, %v1436_v57  ;;  %v1355_v56 = vadd.f32 %v1339_v17, %v6846_v27  ;;  %v9213_v0 = vld [vmem:[#allocation114_spill] sm:$0xff]  ;;  %v6972_v57 = vld [vmem:[%s5272_s18 + $0x68] sm:$0xff]  ;;  %v9216_v27 = vld [vmem:[#allocation123_spill] sm:$0xff] }
 0x467   : > { %v1342_v60 = vand.u32 2147483647, %v1326_v28  ;;  %v1432_v32 = vsub.f32 %v9213_v0, %v6836_v41  ;;  %v6963_v55 = vadd.f32 %v1446_v53, %v1349_v21  ;;  %v6965_v11 = vadd.f32 %v1443_v34, %v1346_v31  ;;  %v9217_v53 = vld [vmem:[#allocation124_spill] sm:$0xff] }
 0x468   : > { %v1455_v51 = vand.u32 2147483647, %v1439_v47  ;;  %v1435_v39 = vsub.f32 %v9214_v36, %v6836_v41  ;;  %v1431_v29 = vsub.f32 %v9215_v49, %v6836_v41  ;;  %v6977_v28 = vadd.f32 %v1449_v54, %v1352_v7  ;;  %v6986_v21 = vpop.permute.xlu0 %2857  ;;  %v9220_v54 = vld [vmem:[#allocation118_spill] sm:$0xff]  ;;  %3208 = vperm.xlu0 %4877, %v6915_v46  }
 0x469   : > { %v1555_v17 = vand.u32 2147483647, %v1539_v38  ;;  %v1544_v23 = vsub.f32 %v9216_v27, %v6923_v6  ;;  %v1434_v43 = vsub.f32 %v9217_v53, %v6836_v41  ;;  %9219 = vst [vmem:[#allocation38_spill] sm:$0xff] %v6986_v21  ;;  %v6989_v34 = vadd.f32 %v1445_v9, %v6875_v33  ;;  %v9221_v38 = vld [vmem:[#allocation119_spill] sm:$0xff]  ;;  %v9222_v33 = vld [vmem:[#allocation122_spill] sm:$0xff] }
 0x46a   : > { %v1442_v63 = vand.u32 2147483647, %v1426_v12  ;;  %v1438_v7 = vsub.f32 %v9220_v54, %v6836_v41  ;;  %v1428_v31 = vsub.f32 %v9221_v38, %v6836_v41  ;;  %v6995_v22 = vadd.f32 %v1452_v15, %v1355_v56  ;;  %v9223_v12 = vld [vmem:[#allocation126_spill] sm:$0xff]  ;;  %v9224_v38 = vld [vmem:[#allocation125_spill] sm:$0xff] }
 0x46b   : > { %v1358_v0 = vadd.f32 %v1342_v60, %v6867_v19  ;;  %v1448_v36 = vand.u32 2147483647, %v1432_v32  ;;  %v1451_v49 = vand.u32 2147483647, %v1435_v39  ;;  %v1447_v27 = vand.u32 2147483647, %v1431_v29 }
 0x46c   : > { %2994 = vperm.xlu2 %4871, %v6972_v57   ;;  %v6975_v14 = vpop.permute.xlu2 %2772  ;;  %v1538_v9 = vsub.f32 %v9222_v33, %v6923_v6  ;;  %v1547_v53 = vsub.f32 %v9223_v12, %v6923_v6  ;;  %v1560_v54 = vand.u32 2147483647, %v1544_v23  ;;  %v1541_v15 = vsub.f32 %v9224_v38, %v6923_v6  ;;  %v9225_v56 = vld [vmem:[#allocation129_spill] sm:$0xff]  ;;  %v9226_v29 = vld [vmem:[#allocation127_spill] sm:$0xff] }
 0x46d   : > { %2990 = vperm.xlu1 %4870, %v6708_v2   ;;  %v6984_v47 = vpop.permute.xlu1 %2732  ;;  %v6999_v2 = vperm.slane %v6732_v44, 3  ;;  %v1550_v19 = vsub.f32 %v9225_v56, %v6923_v6  ;;  %v1458_v60 = vadd.f32 %v1442_v63, %v6883_v4  ;;  %v1454_v32 = vand.u32 2147483647, %v1438_v7  ;;  %v9228_v56 = vld [vmem:[#allocation134_spill] sm:$0xff] }
 0x46e   : > { %9218 = vst [vmem:[#allocation37_spill] sm:$0xff] %v6984_v47  ;;  %v1450_v47 = vand.u32 2147483647, %v1434_v43  ;;  %v1444_v39 = vand.u32 2147483647, %v1428_v31  ;;  %v1437_v33 = vsub.f32 %v9226_v29, %v6836_v41  ;;  %v7014_v12 = vadd.f32 %v1448_v36, %v6885_v45  ;;  %v9227_v43 = vld [vmem:[#allocation128_spill] sm:$0xff] }
 0x46f   : > { %v7016_v23 = vadd.f32 %v1455_v51, %v1358_v0  ;;  %v1543_v38 = vsub.f32 %v9227_v43, %v6923_v6  ;;  %v1650_v21 = vsub.f32 %v9228_v56, %v6999_v2  ;;  %v7023_v10 = vadd.f32 %v1451_v49, %v6897_v20  ;;  %v9230_v0 = vld [vmem:[#allocation131_spill] sm:$0xff] }
 0x470   : > { %v1463_v4 = vadd.f32 %v1447_v27, %v6901_v37  ;;  %v1554_v63 = vand.u32 2147483647, %v1538_v9  ;;  %v1563_v7 = vand.u32 2147483647, %v1547_v53  ;;  %v9229_v41 = vmov 24   ;;  %v7034_v43 = vld [vmem:[%s5272_s18] sm:$0xff]  ;;  %v7049_v56 = vpop.permute.xlu0 %2869  ;;  %3220 = vperm.xlu0 %4877, %v6972_v57  }
 0x471   : > { %v1466_v45 = vadd.f32 %v1450_v47, %v6940_v30  ;;  %v1557_v31 = vand.u32 2147483647, %v1541_v15  ;;  %v1566_v51 = vand.u32 2147483647, %v1550_v19  ;;  %v1537_v36 = vsub.f32 %v9230_v0, %v6923_v6  ;;  %v9232_v9 = vld [vmem:[#allocation130_spill] sm:$0xff]  ;;  %9234 = vst [vmem:[#allocation40_spill] sm:$0xff] %v7049_v56 }
 0x472   : > { %v7039_v37 = vadd.f32 %v1555_v17, %v1458_v60  ;;  %v7042_v49 = vadd.f32 %v1454_v32, %v6933_v62  ;;  %v1460_v30 = vadd.f32 %v1444_v39, %v6890_v52  ;;  %v1453_v47 = vand.u32 2147483647, %v1437_v33  ;;  %v9233_v15 = vld [vmem:[#allocation138_spill] sm:$0xff]  ;;  %v9235_v62 = vld [vmem:[#allocation137_spill] sm:$0xff] }
 0x473   : > { %v1559_v27 = vand.u32 2147483647, %v1543_v38  ;;  %v1666_v53 = vand.u32 2147483647, %v1650_v21  ;;  %v1655_v19 = vsub.f32 %v9233_v15, %v6999_v2  ;;  %v7052_v0 = vadd.f32 %v1554_v63, %v6944_v16  ;;  %v9236_v52 = vld [vmem:[#allocation141_spill] sm:$0xff]  ;;  %v9237_v38 = vld [vmem:[#allocation139_spill] sm:$0xff] }
 0x474   : > { %4872 = vset.pattern.permute.xlu2 %v9229_v41  ;;  %v7054_v17 = vadd.f32 %v1560_v54, %v1463_v4  ;;  %v1542_v60 = vsub.f32 %v9235_v62, %v6923_v6  ;;  %v1658_v32 = vsub.f32 %v9236_v52, %v6999_v2  ;;  %v1573_v39 = vadd.f32 %v1557_v31, %v1460_v30  ;;  %v9238_v54 = vld [vmem:[#allocation133_spill] sm:$0xff]  ;;  %v9239_v63 = vld [vmem:[#allocation135_spill] sm:$0xff]  ;;  %v9240_v62 = vld [vmem:[#allocation142_spill] sm:$0xff] }
 0x475   : > { %3002 = vperm.xlu1 %4870, %v6776_v61   ;;  %v7031_v29 = vpop.permute.xlu1 %2744  ;;  %3055 = vperm.xlu2 %4872, %v7034_v43   ;;  %v7037_v20 = vpop.permute.xlu2 %2833  ;;  %v1546_v61 = vsub.f32 %v9232_v9, %v6923_v6  ;;  %v7060_v33 = vadd.f32 %v1563_v7, %v1466_v45  ;;  %v1553_v21 = vand.u32 2147483647, %v1537_v36  ;;  %v1545_v9 = vsub.f32 %v9237_v38, %v6923_v6  ;;  %v9241_v31 = vld [vmem:[#allocation136_spill] sm:$0xff] }
 0x476   : > { %9231 = vst [vmem:[#allocation39_spill] sm:$0xff] %v7031_v29  ;;  %v1469_v16 = vadd.f32 %v1453_v47, %v6948_v8  ;;  %v1549_v4 = vsub.f32 %v9238_v54, %v6923_v6  ;;  %v1540_v15 = vsub.f32 %v9239_v63, %v6923_v6  ;;  %v1548_v52 = vsub.f32 %v9240_v62, %v6923_v6  ;;  %v9242_v8 = vld [vmem:[#allocation140_spill] sm:$0xff]  ;;  %v9243_v62 = vld [vmem:[#allocation143_spill] sm:$0xff] }
 0x477   : > { %v7073_v7 = vadd.f32 %v1559_v27, %v6963_v55  ;;  %v1562_v45 = vand.u32 2147483647, %v1546_v61  ;;  %v1552_v36 = vsub.f32 %v9241_v31, %v6923_v6  ;;  %v1671_v30 = vand.u32 2147483647, %v1655_v19  ;;  %v9244_v27 = vld [vmem:[#allocation144_spill] sm:$0xff] }
 0x478   : > { %v1558_v38 = vand.u32 2147483647, %v1542_v60  ;;  %v1652_v47 = vsub.f32 %v9242_v8, %v6999_v2  ;;  %v1674_v56 = vand.u32 2147483647, %v1658_v32  ;;  %v7080_v54 = vperm.slane %v6732_v44, 4 }
 0x479   : > { %v1569_v63 = vadd.f32 %v1553_v21, %v6958_v24  ;;  %v1561_v29 = vand.u32 2147483647, %v1545_v9  ;;  %v1654_v55 = vsub.f32 %v9243_v62, %v6999_v2  ;;  %v1661_v61 = vsub.f32 %v9244_v27, %v6999_v2  ;;  %v9247_v62 = vld [vmem:[#allocation145_spill] sm:$0xff]  ;;  %v9248_v27 = vld [vmem:[#allocation147_spill] sm:$0xff] }
 0x47a   : > { %v7093_v32 = vadd.f32 %v1566_v51, %v1469_v16  ;;  %v1565_v31 = vand.u32 2147483647, %v1549_v4  ;;  %v1556_v8 = vand.u32 2147483647, %v1540_v15  ;;  %v1564_v24 = vand.u32 2147483647, %v1548_v52 }
 0x47b   : > { %v7097_v21 = vadd.f32 %v1562_v45, %v6977_v28  ;;  %v1568_v9 = vand.u32 2147483647, %v1552_v36  ;;  %v1574_v18 = vadd.f32 %v1558_v38, %v6989_v34  ;;  %v9249_v51 = vld [vmem:[#allocation146_spill] sm:$0xff]  ;;  %v1577_v28 = vadd.f32 %v1561_v29, %v7014_v12  ;;  %v7111_v36 = vpop.permute.xlu0 %2881 }
 0x47c   : > { %v1657_v16 = vsub.f32 %v9249_v51, %v6999_v2  ;;  %v9250_v4 = vld [vmem:[#allocation150_spill] sm:$0xff]  ;;  %v1670_v52 = vand.u32 2147483647, %v1654_v55  ;;  %v1677_v45 = vand.u32 2147483647, %v1661_v61  ;;  %9251 = vst [vmem:[#allocation43_spill] sm:$0xff] %v7111_v36  ;;  %v7117_v34 = vadd.f32 %v1556_v8, %v6965_v11 }
 0x47d   : > { %4874 = vset.pattern.permute.xlu1 %v9229_v41  ;;  %v7088_v19 = vpop.permute.xlu1 %2756  ;;  %3067 = vperm.xlu2 %4872, %v6816_v3   ;;  %v7091_v60 = vpop.permute.xlu2 %2845  ;;  %v1551_v41 = vsub.f32 %v9247_v62, %v6923_v6  ;;  %v1764_v15 = vsub.f32 %v9250_v4, %v7080_v54  ;;  %v7114_v6 = vadd.f32 %v1565_v31, %v6995_v22  ;;  %v9260_v4 = vld [vmem:[#allocation152_spill] sm:$0xff] }
 0x47e   : > { %9245 = vst [vmem:[#allocation41_spill] sm:$0xff] %v7088_v19  ;;  %3063 = vperm.xlu1 %4874, %v6741_v40   ;;  %v1664_v19 = vsub.f32 %v9248_v27, %v6999_v2  ;;  %v7108_v40 = vadd.f32 %v1666_v53, %v1569_v63  ;;  %v1580_v38 = vadd.f32 %v1564_v24, %v7023_v10  ;;  %v9253_v63 = vld [vmem:[#allocation154_spill] sm:$0xff]  ;;  %v1673_v11 = vand.u32 2147483647, %v1657_v16  ;;  %v9254_v24 = vld [vmem:[#allocation148_spill] sm:$0xff] }
 0x47f   : > { %9246 = vst [vmem:[#allocation42_spill] sm:$0xff] %v7091_v60  ;;  %v1668_v60 = vand.u32 2147483647, %v1652_v47  ;;  %v9252_v47 = vld [vmem:[#allocation149_spill] sm:$0xff]  ;;  %v7123_v53 = vadd.f32 %v1568_v9, %v7016_v23  ;;  %v1567_v12 = vand.u32 2147483647, %v1551_v41  ;;  %v1769_v55 = vsub.f32 %v9253_v63, %v7080_v54 }
 0x480   : > { %v1651_v62 = vsub.f32 %v9252_v47, %v6999_v2  ;;  %v1680_v29 = vand.u32 2147483647, %v1664_v19  ;;  %v7127_v61 = vadd.f32 %v1671_v30, %v1574_v18  ;;  %v1780_v31 = vand.u32 2147483647, %v1764_v15  ;;  %v9255_v9 = vld [vmem:[#allocation155_spill] sm:$0xff]  ;;  %v7143_v27 = vld [vmem:[%s5272_s18 + $0x28] sm:$0xff] }
 0x481   : > { %v7130_v22 = vadd.f32 %v1668_v60, %v7039_v37  ;;  %v7132_v8 = vadd.f32 %v1674_v56, %v1577_v28  ;;  %v7134_v10 = vadd.f32 %v1670_v52, %v1573_v39  ;;  %v1660_v23 = vsub.f32 %v9254_v24, %v6999_v2  ;;  %v9258_v39 = vld [vmem:[#allocation151_spill] sm:$0xff]  ;;  %v9259_v60 = vld [vmem:[#allocation157_spill] sm:$0xff]  ;;  %v9263_v63 = vld [vmem:[#allocation160_spill] sm:$0xff] }
 0x482   : > { %v1656_v19 = vsub.f32 %v9255_v9, %v6999_v2  ;;  %v7148_v37 = vadd.f32 %v1677_v45, %v1580_v38  ;;  %v1667_v56 = vand.u32 2147483647, %v1651_v62  ;;  %v1663_v30 = vsub.f32 %v9258_v39, %v6999_v2  ;;  %v9261_v52 = vld [vmem:[#allocation159_spill] sm:$0xff]  ;;  %v9262_v38 = vld [vmem:[#allocation156_spill] sm:$0xff] }
 0x483   : > { %v1659_v51 = vsub.f32 %v9259_v60, %v6999_v2  ;;  %v1583_v16 = vadd.f32 %v1567_v12, %v7042_v49  ;;  %v1653_v15 = vsub.f32 %v9260_v4, %v6999_v2  ;;  %v1785_v28 = vand.u32 2147483647, %v1769_v55  ;;  %v9264_v49 = vld [vmem:[#allocation162_spill] sm:$0xff] }
 0x484   : > { %v1772_v47 = vsub.f32 %v9261_v52, %v7080_v54  ;;  %v7161_v45 = vadd.f32 %v1673_v11, %v7054_v17  ;;  %v1763_v62 = vsub.f32 %v9262_v38, %v7080_v54  ;;  %v1662_v24 = vsub.f32 %v9263_v63, %v6999_v2  ;;  %v9265_v52 = vld [vmem:[#allocation158_spill] sm:$0xff] }
 0x485   : > { %v7140_v41 = vpop.permute.xlu1 %2768  ;;  %3075 = vperm.xlu2 %4872, %v7143_v27   ;;  %v7146_v18 = vpop.permute.xlu2 %2853  ;;  %v1676_v9 = vand.u32 2147483647, %v1660_v23  ;;  %v1672_v39 = vand.u32 2147483647, %v1656_v19  ;;  %v1775_v12 = vsub.f32 %v9264_v49, %v7080_v54  ;;  %v7170_v60 = vperm.slane %v6732_v44, 5  ;;  %v9266_v49 = vld [vmem:[#allocation161_spill] sm:$0xff] }
 0x486   : > { %9256 = vst [vmem:[#allocation44_spill] sm:$0xff] %v7140_v41  ;;  %3071 = vperm.xlu1 %4874, %v6803_v48   ;;  %v8783_v55 = vmov 26   ;;  %v1683_v17 = vadd.f32 %v1667_v56, %v7052_v0  ;;  %v1679_v11 = vand.u32 2147483647, %v1663_v30  ;;  %v1675_v4 = vand.u32 2147483647, %v1659_v51  ;;  %v7181_v41 = vpop.permute.xlu0 %2942 }
 0x487   : > { %9257 = vst [vmem:[#allocation45_spill] sm:$0xff] %v7146_v18  ;;  %4878 = vset.pattern.permute.xlu0 %v8783_v55  ;;  %v1766_v38 = vsub.f32 %v9265_v52, %v7080_v54  ;;  %v7177_v23 = vadd.f32 %v1680_v29, %v1583_v16  ;;  %v1669_v19 = vand.u32 2147483647, %v1653_v15  ;;  %v1788_v63 = vand.u32 2147483647, %v1772_v47  ;;  %v9268_v0 = vld [vmem:[#allocation163_spill] sm:$0xff] }
 0x488   : > { %3281 = vperm.xlu0 %4878, %v7034_v43   ;;  %v1768_v36 = vsub.f32 %v9266_v49, %v7080_v54  ;;  %9267 = vst [vmem:[#allocation46_spill] sm:$0xff] %v7181_v41  ;;  %v1779_v55 = vand.u32 2147483647, %v1763_v62  ;;  %v1678_v18 = vand.u32 2147483647, %v1662_v24  ;;  %v1665_v56 = vsub.f32 %v9268_v0, %v6999_v2  ;;  %v9269_v30 = vld [vmem:[#allocation165_spill] sm:$0xff] }
 0x489   : > { %v1778_v51 = vsub.f32 %v9269_v30, %v7080_v54  ;;  %v7188_v52 = vadd.f32 %v1676_v9, %v7060_v33  ;;  %v1688_v29 = vadd.f32 %v1672_v39, %v7073_v7  ;;  %v1791_v16 = vand.u32 2147483647, %v1775_v12  ;;  %v9270_v15 = vld [vmem:[#allocation168_spill] sm:$0xff]  ;;  %v7194_v49 = vld [vmem:[%s5272_s18 + $0x40] sm:$0xff] }
 0x48a   : > { %v1878_v47 = vsub.f32 %v9270_v15, %v7170_v60  ;;  %v7199_v24 = vadd.f32 %v1780_v31, %v1683_v17  ;;  %v7202_v2 = vadd.f32 %v1679_v11, %v7093_v32  ;;  %v1691_v33 = vadd.f32 %v1675_v4, %v7097_v21  ;;  %v9273_v0 = vld [vmem:[#allocation164_spill] sm:$0xff]  ;;  %v9274_v15 = vld [vmem:[#allocation167_spill] sm:$0xff] }
 0x48b   : > { %v1782_v9 = vand.u32 2147483647, %v1766_v38  ;;  %v1685_v39 = vadd.f32 %v1669_v19, %v7117_v34  ;;  %v1784_v12 = vand.u32 2147483647, %v1768_v36  ;;  %v1771_v30 = vsub.f32 %v9273_v0, %v7080_v54  ;;  %v9275_v38 = vld [vmem:[#allocation172_spill] sm:$0xff]  ;;  %v9276_v36 = vld [vmem:[#allocation171_spill] sm:$0xff] }
 0x48c   : > { %v1765_v31 = vsub.f32 %v9274_v15, %v7080_v54  ;;  %v7214_v17 = vadd.f32 %v1779_v55, %v7108_v40  ;;  %v1694_v32 = vadd.f32 %v1678_v18, %v7114_v6  ;;  %v1681_v21 = vand.u32 2147483647, %v1665_v56  ;;  %v9277_v40 = vld [vmem:[#allocation166_spill] sm:$0xff] }
 0x48d   : > { %3087 = vperm.xlu2 %4872, %v7194_v49   ;;  %v7197_v62 = vpop.permute.xlu2 %2865  ;;  %v1794_v11 = vand.u32 2147483647, %v1778_v51  ;;  %v7217_v4 = vadd.f32 %v1785_v28, %v1688_v29  ;;  %v1770_v34 = vsub.f32 %v9275_v38, %v7080_v54  ;;  %v1883_v19 = vsub.f32 %v9276_v36, %v7170_v60  ;;  %v9278_v6 = vld [vmem:[#allocation174_spill] sm:$0xff]  ;;  %v9279_v29 = vld [vmem:[#allocation169_spill] sm:$0xff]  ;;  %v9282_v38 = vld [vmem:[#allocation176_spill] sm:$0xff] }
 0x48e   : > { %9271 = vst [vmem:[#allocation47_spill] sm:$0xff] %v7197_v62  ;;  %3083 = vperm.xlu1 %4874, %v6861_v1   ;;  %v7206_v7 = vpop.permute.xlu1 %2829  ;;  %v1894_v1 = vand.u32 2147483647, %v1878_v47  ;;  %v7223_v0 = vadd.f32 %v1782_v9, %v1685_v39  ;;  %v7225_v41 = vadd.f32 %v1788_v63, %v1691_v33  ;;  %v1774_v55 = vsub.f32 %v9277_v40, %v7080_v54  ;;  %v7237_v9 = vpop.permute.xlu0 %2962  ;;  %v9281_v39 = vld [vmem:[#allocation170_spill] sm:$0xff] }
 0x48f   : > { %9272 = vst [vmem:[#allocation48_spill] sm:$0xff] %v7206_v7  ;;  %v1773_v18 = vsub.f32 %v9278_v6, %v7080_v54  ;;  %v7233_v28 = vadd.f32 %v1784_v12, %v7127_v61  ;;  %v1787_v56 = vand.u32 2147483647, %v1771_v30  ;;  %v1781_v51 = vand.u32 2147483647, %v1765_v31  ;;  %v9283_v61 = vld [vmem:[#allocation173_spill] sm:$0xff] }
 0x490   : > { %3301 = vperm.xlu0 %4878, %v7143_v27   ;;  %v1777_v47 = vsub.f32 %v9279_v29, %v7080_v54  ;;  %9280 = vst [vmem:[#allocation49_spill] sm:$0xff] %v7237_v9  ;;  %v7239_v63 = vadd.f32 %v1791_v16, %v1694_v32  ;;  %v1697_v33 = vadd.f32 %v1681_v21, %v7123_v53  ;;  %v1786_v40 = vand.u32 2147483647, %v1770_v34  ;;  %v7252_v6 = vld [vmem:[%s5272_s18 + $0x58] sm:$0xff]  ;;  %v9285_v21 = vld [vmem:[#allocation175_spill] sm:$0xff]  ;;  %v9286_v34 = vld [vmem:[#allocation177_spill] sm:$0xff] }
 0x491   : > { %v1767_v15 = vsub.f32 %v9281_v39, %v7080_v54  ;;  %v1886_v36 = vsub.f32 %v9282_v38, %v7170_v60  ;;  %v1877_v12 = vsub.f32 %v9283_v61, %v7170_v60  ;;  %v1899_v30 = vand.u32 2147483647, %v1883_v19  ;;  %v9288_v7 = vld [vmem:[#allocation179_spill] sm:$0xff]  ;;  %v9289_v62 = vld [vmem:[#allocation178_spill] sm:$0xff] }
 0x492   : > { %v7249_v31 = vperm.slane %v6732_v44, 6  ;;  %v1790_v53 = vand.u32 2147483647, %v1774_v55  ;;  %v1789_v32 = vand.u32 2147483647, %v1773_v18  ;;  %v1880_v29 = vsub.f32 %v9285_v21, %v7170_v60 }
 0x493   : > { %v1776_v39 = vsub.f32 %v9286_v34, %v7080_v54  ;;  %v7265_v38 = vadd.f32 %v1787_v56, %v7132_v8  ;;  %v1797_v61 = vadd.f32 %v1781_v51, %v7130_v22  ;;  %v1793_v9 = vand.u32 2147483647, %v1777_v47  ;;  %v9291_v56 = vld [vmem:[#allocation182_spill] sm:$0xff] }
 0x494   : > { %v1889_v55 = vsub.f32 %v9288_v7, %v7170_v60  ;;  %v7270_v18 = vadd.f32 %v1794_v11, %v1697_v33  ;;  %v1902_v21 = vand.u32 2147483647, %v1886_v36  ;;  %v1882_v54 = vsub.f32 %v9289_v62, %v7170_v60 }
 0x495   : > { %3099 = vperm.xlu2 %4872, %v7252_v6   ;;  %v7255_v16 = vpop.permute.xlu2 %2877  ;;  %v1893_v34 = vand.u32 2147483647, %v1877_v12  ;;  %v1989_v22 = vsub.f32 %v9291_v56, %v7249_v31  ;;  %v7280_v51 = vadd.f32 %v1790_v53, %v7148_v37  ;;  %v1805_v7 = vadd.f32 %v1789_v32, %v7188_v52  ;;  %v9293_v37 = vld [vmem:[#allocation180_spill] sm:$0xff]  ;;  %v9294_v52 = vld [vmem:[#allocation185_spill] sm:$0xff] }
 0x496   : > { %9284 = vst [vmem:[#allocation50_spill] sm:$0xff] %v7255_v16  ;;  %3095 = vperm.xlu1 %4874, %v6915_v46   ;;  %v7262_v19 = vpop.permute.xlu1 %2841  ;;  %v1783_v16 = vand.u32 2147483647, %v1767_v15  ;;  %v1802_v46 = vadd.f32 %v1786_v40, %v7161_v45  ;;  %v1896_v11 = vand.u32 2147483647, %v1880_v29  ;;  %v7284_v33 = vadd.f32 %v1894_v1, %v1797_v61  ;;  %v9292_v15 = vld [vmem:[#allocation194_spill] sm:$0xff] }
 0x497   : > { %9287 = vst [vmem:[#allocation12_spill] sm:$0xff] %v7262_v19  ;;  %v9290_v19 = vld [vmem:[#allocation181_spill] sm:$0xff]  ;;  %v1792_v47 = vand.u32 2147483647, %v1776_v39  ;;  %v1809_v45 = vadd.f32 %v1793_v9, %v7177_v23  ;;  %v1905_v62 = vand.u32 2147483647, %v1889_v55  ;;  %v1890_v36 = vsub.f32 %v9292_v15, %v7170_v60 }
 0x498   : > { %v1876_v8 = vsub.f32 %v9290_v19, %v7170_v60  ;;  %3313 = vperm.xlu0 %4878, %v7194_v49   ;;  %v1799_v40 = vadd.f32 %v1783_v16, %v7134_v10  ;;  %v1898_v12 = vand.u32 2147483647, %v1882_v54  ;;  %v1885_v53 = vsub.f32 %v9293_v37, %v7170_v60  ;;  %v7302_v19 = vpop.permute.xlu0 %2974  ;;  %v9297_v55 = vld [vmem:[#allocation183_spill] sm:$0xff]  ;;  %v7312_v54 = vld [vmem:[%s5552_s27 + $0x10] sm:$0xff]  ;;  %v9300_v56 = vld [vmem:[#allocation196_spill] sm:$0xff] }
 0x499   : > { %v1994_v32 = vsub.f32 %v9294_v52, %v7249_v31  ;;  %v7295_v29 = vadd.f32 %v1893_v34, %v7199_v24  ;;  %v7297_v1 = vadd.f32 %v1899_v30, %v1802_v46  ;;  %v2005_v9 = vand.u32 2147483647, %v1989_v22  ;;  %9296 = vst [vmem:[#allocation132_spill] sm:$0xff] %v7302_v19  ;;  %v9299_v46 = vld [vmem:[#allocation188_spill] sm:$0xff] }
 0x49a   : > { %v1892_v23 = vand.u32 2147483647, %v1876_v8  ;;  %v7304_v10 = vadd.f32 %v1896_v11, %v1799_v40  ;;  %v7306_v16 = vadd.f32 %v1902_v21, %v1805_v7  ;;  %v1808_v61 = vadd.f32 %v1792_v47, %v7202_v2  ;;  %v9302_v40 = vld [vmem:[#allocation184_spill] sm:$0xff] }
 0x49b   : > { %v1888_v24 = vsub.f32 %v9297_v55, %v7170_v60  ;;  %v1997_v34 = vsub.f32 %v9299_v46, %v7249_v31  ;;  %v1906_v8 = vand.u32 2147483647, %v1890_v36  ;;  %v2003_v22 = vsub.f32 %v9300_v56, %v7249_v31 }
 0x49c   : > { %v7322_v21 = vperm.slane %v6732_v44, 7  ;;  %v7325_v2 = vadd.f32 %v1898_v12, %v7217_v4  ;;  %v1901_v7 = vand.u32 2147483647, %v1885_v53  ;;  %v7327_v11 = vand.u32 2147483647, %v1994_v32  ;;  %v9303_v44 = vld [vmem:[#allocation217_spill] sm:$0xff] }
 0x49d   : > { %3111 = vperm.xlu2 %4872, %v6683_v25   ;;  %v7300_v39 = vpop.permute.xlu2 %2889  ;;  %v1908_v15 = vadd.f32 %v1892_v23, %v7214_v17  ;;  %v1879_v36 = vsub.f32 %v9302_v40, %v7170_v60  ;;  %v7335_v37 = vperm.slane %v7312_v54, 0  ;;  %v7339_v55 = vadd.f32 %v1905_v62, %v1808_v61  ;;  %v9304_v12 = vld [vmem:[#allocation187_spill] sm:$0xff]  ;;  %v9305_v32 = vld [vmem:[#allocation189_spill] sm:$0xff]  ;;  %v9307_v62 = vld [vmem:[#allocation186_spill] sm:$0xff] }
 0x49e   : > { %9295 = vst [vmem:[#allocation13_spill] sm:$0xff] %v7300_v39  ;;  %3107 = vperm.xlu1 %4874, %v6972_v57   ;;  %v7315_v30 = vpop.permute.xlu1 %2849  ;;  %v9301_v57 = vld [vmem:[#allocation193_spill] sm:$0xff]  ;;  %v2116_v52 = vsub.f32 %v9303_v44, %v7322_v21  ;;  %v1904_v4 = vand.u32 2147483647, %v1888_v24  ;;  %v1881_v53 = vsub.f32 %v9304_v12, %v7170_v60  ;;  %v1884_v46 = vsub.f32 %v9305_v32, %v7170_v60  ;;  %v9308_v44 = vld [vmem:[#allocation198_spill] sm:$0xff] }
 0x49f   : > { %9298 = vst [vmem:[#allocation56_spill] sm:$0xff] %v7315_v30  ;;  %v2000_v47 = vsub.f32 %v9301_v57, %v7249_v31  ;;  %v2013_v17 = vand.u32 2147483647, %v1997_v34  ;;  %v1922_v23 = vadd.f32 %v1906_v8, %v1809_v45  ;;  %v2019_v56 = vand.u32 2147483647, %v2003_v22  ;;  %v9306_v57 = vld [vmem:[#allocation242_spill] sm:$0xff] }
 0x4a0   : > { %3325 = vperm.xlu0 %4878, %v7252_v6   ;;  %v2229_v40 = vsub.f32 %v9306_v57, %v7335_v37  ;;  %v7349_v19 = vadd.f32 %v1901_v7, %v7225_v41  ;;  %v1891_v61 = vsub.f32 %v9307_v62, %v7170_v60  ;;  %v1990_v12 = vsub.f32 %v9308_v44, %v7249_v31 }
 0x4a1   : > { %v7353_v24 = vand.u32 2147483647, %v2000_v47  ;;  %v7357_v32 = vadd.f32 %v2005_v9, %v1908_v15  ;;  %v1895_v30 = vand.u32 2147483647, %v1879_v36  ;;  %v2132_v34 = vand.u32 2147483647, %v2116_v52 }
 0x4a2   : > { %v7360_v45 = vperm.slane %v7312_v54, 1  ;;  %v9309_v8 = vmov 25   ;;  %v7364_v41 = vadd.f32 %v1904_v4, %v7239_v63  ;;  %v1897_v22 = vand.u32 2147483647, %v1881_v53  ;;  %v9310_v47 = vld [vmem:[#allocation190_spill] sm:$0xff]  ;;  %v9313_v52 = vld [vmem:[#allocation244_spill] sm:$0xff]  ;;  %v7380_v4 = vpop.permute.xlu0 %2986 }
 0x4a3   : > { %v1900_v7 = vand.u32 2147483647, %v1884_v46  ;;  %v1991_v57 = vsub.f32 %v9310_v47, %v7249_v31  ;;  %v2035_v15 = vadd.f32 %v2019_v56, %v1922_v23  ;;  %v2245_v36 = vand.u32 2147483647, %v2229_v40  ;;  %9314 = vst [vmem:[#allocation52_spill] sm:$0xff] %v7380_v4  ;;  %v9315_v46 = vld [vmem:[#allocation191_spill] sm:$0xff] }
 0x4a4   : > { %v2342_v44 = vsub.f32 %v9313_v52, %v7360_v45  ;;  %v7377_v63 = vperm.slane %v7312_v54, 2  ;;  %v1907_v53 = vand.u32 2147483647, %v1891_v61  ;;  %v2006_v47 = vand.u32 2147483647, %v1990_v12  ;;  %v9317_v23 = vld [vmem:[#allocation192_spill] sm:$0xff] }
 0x4a5   : > { %4876 = vset.pattern.permute.xlu2 %v9309_v8  ;;  %v1993_v56 = vsub.f32 %v9317_v23, %v7249_v31  ;;  %v2148_v40 = vadd.f32 %v2132_v34, %v2035_v15  ;;  %v7389_v52 = vperm.slane %v7312_v54, 3  ;;  %v1913_v4 = vadd.f32 %v1897_v22, %v7233_v28 }
 0x4a6   : > { %4875 = vset.pattern.permute.xlu1 %v9309_v8  ;;  %v7369_v62 = vpop.permute.xlu1 %2861  ;;  %3172 = vperm.xlu2 %4876, %v6753_v13   ;;  %v7372_v9 = vpop.permute.xlu2 %2950  ;;  %v1887_v8 = vsub.f32 %v9315_v46, %v7170_v60  ;;  %v9316_v13 = vld [vmem:[#allocation199_spill] sm:$0xff]  ;;  %v1916_v61 = vadd.f32 %v1900_v7, %v7265_v38  ;;  %v2007_v39 = vand.u32 2147483647, %v1991_v57  ;;  %v9319_v60 = vld [vmem:[#allocation221_spill] sm:$0xff]  ;;  %v7399_v46 = vadd.f32 %v1895_v30, %v7223_v0  ;;  %v9320_v38 = vld [vmem:[#allocation246_spill] sm:$0xff] }
 0x4a7   : > { %9311 = vst [vmem:[#allocation60_spill] sm:$0xff] %v7369_v62  ;;  %3168 = vperm.xlu1 %4875, %v7034_v43   ;;  %v2103_v62 = vsub.f32 %v9316_v13, %v7322_v21  ;;  %v2216_v12 = vsub.f32 %v9319_v60, %v7335_v37  ;;  %v2261_v34 = vadd.f32 %v2245_v36, %v2148_v40  ;;  %v2358_v15 = vand.u32 2147483647, %v2342_v44 }
 0x4a8   : > { %9312 = vst [vmem:[#allocation57_spill] sm:$0xff] %v7372_v9  ;;  %v9318_v9 = vld [vmem:[#allocation265_spill] sm:$0xff]  ;;  %3337 = vperm.xlu0 %4878, %v6683_v25   ;;  %v2568_v13 = vsub.f32 %v6553_v58, %v7389_v52  ;;  %v1903_v23 = vand.u32 2147483647, %v1887_v8  ;;  %v2329_v22 = vsub.f32 %v9320_v38, %v7360_v45  ;;  %v7407_v7 = vadd.f32 %v1907_v53, %v7270_v18 }
 0x4a9   : > { %v2455_v43 = vsub.f32 %v9318_v9, %v7377_v63  ;;  %v2022_v9 = vadd.f32 %v2006_v47, %v7295_v29  ;;  %v2119_v28 = vand.u32 2147483647, %v2103_v62  ;;  %v2009_v57 = vand.u32 2147483647, %v1993_v56  ;;  %v9324_v56 = vld [vmem:[#allocation202_spill] sm:$0xff] }
 0x4aa   : > { %v7410_v0 = vperm.slane %v7312_v54, 4  ;;  %v7413_v30 = vadd.f32 %v7327_v11, %v1913_v4  ;;  %v7416_v58 = vadd.f32 %v2007_v39, %v7284_v33  ;;  %v7418_v36 = vadd.f32 %v2013_v17, %v1916_v61  ;;  %v9323_v4 = vld [vmem:[#allocation247_spill] sm:$0xff]  ;;  %v2999_v61 = vpop.permute.xlu0 %2998 }
 0x4ab   : > { %v2471_v25 = vand.u32 2147483647, %v2455_v43  ;;  %v2232_v29 = vand.u32 2147483647, %v2216_v12  ;;  %v2374_v44 = vadd.f32 %v2358_v15, %v2261_v34  ;;  %v2584_v53 = vand.u32 2147483647, %v2568_v13 }
 0x4ac   : > { %v2681_v8 = vsub.f32 %v6545_v35, %v7410_v0  ;;  %v7428_v11 = vperm.slane %v7312_v54, 5  ;;  %v1919_v33 = vadd.f32 %v1903_v23, %v7280_v51  ;;  %v2135_v39 = vadd.f32 %v2119_v28, %v2022_v9  ;;  %v9326_v51 = vld [vmem:[#allocation197_spill] sm:$0xff] }
 0x4ad   : > { %v2345_v17 = vand.u32 2147483647, %v2329_v22  ;;  %v2442_v47 = vsub.f32 %v9323_v4, %v7377_v63  ;;  %v2108_v40 = vsub.f32 %v9324_v56, %v7322_v21  ;;  %v2487_v43 = vadd.f32 %v2471_v25, %v2374_v44  ;;  %v9327_v15 = vld [vmem:[#allocation269_spill] sm:$0xff] }
 0x4ae   : > { %v7420_v62 = vpop.permute.xlu1 %2873  ;;  %3184 = vperm.xlu2 %4876, %v6803_v48   ;;  %v7423_v18 = vpop.permute.xlu2 %2958  ;;  %v7435_v48 = vadd.f32 %v2009_v57, %v7304_v10  ;;  %v2794_v35 = vsub.f32 %v6975_v14, %v7428_v11  ;;  %v1999_v12 = vsub.f32 %v9326_v51, %v7249_v31  ;;  %v2248_v34 = vadd.f32 %v2232_v29, %v2135_v39  ;;  %v9328_v10 = vld [vmem:[#allocation203_spill] sm:$0xff]  ;;  %v9329_v56 = vld [vmem:[#allocation205_spill] sm:$0xff] }
 0x4af   : > { %9321 = vst [vmem:[#allocation62_spill] sm:$0xff] %v7420_v62  ;;  %3180 = vperm.xlu1 %4875, %v6816_v3   ;;  %v9325_v3 = vld [vmem:[#allocation195_spill] sm:$0xff]  ;;  %v2555_v13 = vsub.f32 %v9327_v15, %v7389_v52  ;;  %v1995_v23 = vsub.f32 %v9328_v10, %v7249_v31  ;;  %v2600_v9 = vadd.f32 %v2584_v53, %v2487_v43  ;;  %v2697_v28 = vand.u32 2147483647, %v2681_v8 }
 0x4b0   : > { %9322 = vst [vmem:[#allocation58_spill] sm:$0xff] %v7423_v18  ;;  %v1996_v60 = vsub.f32 %v9325_v3, %v7249_v31  ;;  %v7450_v38 = vperm.slane %v7312_v54, 7  ;;  %v7453_v14 = vadd.f32 %v7353_v24, %v1919_v33  ;;  %v2361_v22 = vadd.f32 %v2345_v17, %v2248_v34  ;;  %v9331_v3 = vld [vmem:[#allocation226_spill] sm:$0xff] }
 0x4b1   : > { %v2458_v57 = vand.u32 2147483647, %v2442_v47  ;;  %v2668_v25 = vsub.f32 %v6589_v50, %v7410_v0  ;;  %v2124_v29 = vand.u32 2147483647, %v2108_v40  ;;  %v7458_v44 = vperm.slane %v7312_v54, 6  ;;  %v9330_v47 = vld [vmem:[#allocation210_spill] sm:$0xff] }
 0x4b2   : > { %v2810_v39 = vand.u32 2147483647, %v2794_v35  ;;  %v3020_v53 = vsub.f32 %v2999_v61, %v7450_v38  ;;  %v2012_v8 = vand.u32 2147483647, %v1996_v60  ;;  %v2015_v4 = vand.u32 2147483647, %v1999_v12 }
 0x4b3   : > { %v2111_v43 = vsub.f32 %v9329_v56, %v7322_v21  ;;  %v2571_v24 = vand.u32 2147483647, %v2555_v13  ;;  %v2011_v50 = vand.u32 2147483647, %v1995_v23  ;;  %v2114_v40 = vsub.f32 %v9330_v47, %v7322_v21  ;;  %v7471_v61 = vld [vmem:[%s5552_s27 + $0x18] sm:$0xff]  ;;  %v9332_v23 = vld [vmem:[#allocation200_spill] sm:$0xff]  ;;  %v3060_v47 = vpop.permute.xlu0 %3059 }
 0x4b4   : > { %v2713_v54 = vadd.f32 %v2697_v28, %v2600_v9  ;;  %v2221_v60 = vsub.f32 %v9331_v3, %v7335_v37  ;;  %v2474_v51 = vadd.f32 %v2458_v57, %v2361_v22  ;;  %v2684_v12 = vand.u32 2147483647, %v2668_v25  ;;  %v9333_v22 = vld [vmem:[#allocation201_spill] sm:$0xff]  ;;  %v9334_v25 = vld [vmem:[#allocation206_spill] sm:$0xff] }
 0x4b5   : > { %v2781_v34 = vsub.f32 %v6597_v26, %v7428_v11  ;;  %v3036_v10 = vand.u32 2147483647, %v3020_v53  ;;  %v2002_v9 = vsub.f32 %v9332_v23, %v7249_v31  ;;  %v7482_v56 = vperm.slane %v7471_v61, 0 }
 0x4b6   : > { %v2886_v33 = vpop.permute.xlu1 %2885  ;;  %3192 = vperm.xlu2 %4876, %v6872_v59   ;;  %v7464_v17 = vpop.permute.xlu2 %2970  ;;  %v2826_v15 = vadd.f32 %v2810_v39, %v2713_v54  ;;  %v2587_v28 = vadd.f32 %v2571_v24, %v2474_v51  ;;  %v1992_v57 = vsub.f32 %v9333_v22, %v7249_v31  ;;  %v2027_v26 = vadd.f32 %v2011_v50, %v7325_v2  ;;  %v7491_v24 = vld [vmem:[%s5272_s18 + $0x8] sm:$0xff]  ;;  %v9335_v54 = vld [vmem:[#allocation251_spill] sm:$0xff] }
 0x4b7   : > { %v2907_v35 = vsub.f32 %v2886_v33, %v7458_v44  ;;  %3188 = vperm.xlu1 %4875, %v7143_v27   ;;  %v2894_v27 = vsub.f32 %v7037_v20, %v7458_v44  ;;  %v8785_v33 = vmov 27   ;;  %v1998_v39 = vsub.f32 %v9334_v25, %v7249_v31 }
 0x4b8   : > { %4882 = vset.pattern.permute.xlu0 %v8785_v33  ;;  %v7495_v20 = vadd.f32 %v2012_v8, %v7297_v1  ;;  %v2700_v3 = vadd.f32 %v2684_v12, %v2587_v28  ;;  %v2797_v51 = vand.u32 2147483647, %v2781_v34  ;;  %v7500_v23 = vadd.f32 %v2015_v4, %v7306_v16  ;;  %v9337_v16 = vld [vmem:[#allocation213_spill] sm:$0xff] }
 0x4b9   : > { %v2923_v13 = vand.u32 2147483647, %v2907_v35  ;;  %3398 = vperm.xlu0 %4882, %v7491_v24   ;;  %v2334_v35 = vsub.f32 %v9335_v54, %v7360_v45  ;;  %v2127_v2 = vand.u32 2147483647, %v2111_v43  ;;  %v2237_v50 = vand.u32 2147483647, %v2221_v60 }
 0x4ba   : > { %v2910_v25 = vand.u32 2147483647, %v2894_v27  ;;  %v3120_v8 = vsub.f32 %v3060_v47, %v7482_v56  ;;  %v2008_v54 = vand.u32 2147483647, %v1992_v57  ;;  %v2140_v12 = vadd.f32 %v2124_v29, %v2027_v26  ;;  %v9339_v27 = vld [vmem:[#allocation204_spill] sm:$0xff] }
 0x4bb   : > { %v2939_v53 = vadd.f32 %v2923_v13, %v2826_v15  ;;  %v2018_v15 = vand.u32 2147483647, %v2002_v9  ;;  %v7504_v13 = vand.u32 2147483647, %v2114_v40  ;;  %v2014_v34 = vand.u32 2147483647, %v1998_v39 }
 0x4bc   : > { %v2117_v4 = vsub.f32 %v9337_v16, %v7322_v21  ;;  %v2350_v60 = vand.u32 2147483647, %v2334_v35  ;;  %v9338_v40 = vld [vmem:[#allocation250_spill] sm:$0xff]  ;;  %v2813_v9 = vadd.f32 %v2797_v51, %v2700_v3  ;;  %v9340_v57 = vld [vmem:[#allocation208_spill] sm:$0xff]  ;;  %v2253_v26 = vadd.f32 %v2237_v50, %v2140_v12 }
 0x4bd   : > { %v7502_v22 = vadd.f32 %v3036_v10, %v2939_v53  ;;  %v2447_v10 = vsub.f32 %v9338_v40, %v7377_v63  ;;  %v2102_v53 = vsub.f32 %v9339_v27, %v7322_v21  ;;  %v2001_v29 = vsub.f32 %v9340_v57, %v7249_v31  ;;  %v9341_v39 = vld [vmem:[#allocation228_spill] sm:$0xff]  ;;  %v9343_v40 = vld [vmem:[#allocation254_spill] sm:$0xff] }
 0x4be   : > { %3204 = vperm.xlu2 %4876, %v6926_v42   ;;  %v7507_v1 = vpop.permute.xlu2 %2982  ;;  %v2224_v47 = vsub.f32 %v9341_v39, %v7335_v37  ;;  %v2926_v35 = vadd.f32 %v2910_v25, %v2813_v9  ;;  %v7525_v3 = vadd.f32 %v2018_v15, %v7339_v55  ;;  %v2024_v51 = vadd.f32 %v2008_v54, %v7399_v46  ;;  %v9344_v15 = vld [vmem:[#allocation207_spill] sm:$0xff]  ;;  %v9348_v39 = vld [vmem:[#allocation253_spill] sm:$0xff] }
 0x4bf   : > { %9336 = vst [vmem:[#allocation54_spill] sm:$0xff] %v7502_v22  ;;  %3200 = vperm.xlu1 %4875, %v7194_v49   ;;  %v2947_v43 = vpop.permute.xlu1 %2946  ;;  %v9342_v49 = vld [vmem:[#allocation275_spill] sm:$0xff]  ;;  %v3136_v22 = vand.u32 2147483647, %v3120_v8  ;;  %v2337_v50 = vsub.f32 %v9343_v40, %v7360_v45  ;;  %v2366_v12 = vadd.f32 %v2350_v60, %v2253_v26  ;;  %v2463_v27 = vand.u32 2147483647, %v2447_v10  ;;  %v7534_v8 = vpop.permute.xlu0 %3079 }
 0x4c0   : > { %v3007_v28 = vsub.f32 %v2947_v43, %v7450_v38  ;;  %v2560_v16 = vsub.f32 %v9342_v49, %v7389_v52  ;;  %v2030_v43 = vadd.f32 %v2014_v34, %v7349_v19  ;;  %v2673_v25 = vsub.f32 %v6686_v5, %v7410_v0  ;;  %v7545_v10 = vld [vmem:[%s5272_s18 + $0x60] sm:$0xff]  ;;  %v9350_v40 = vld [vmem:[#allocation22_spill] sm:$0xff] }
 0x4c1   : > { %3418 = vperm.xlu0 %4882, %v6872_v59   ;;  %v2118_v55 = vand.u32 2147483647, %v2102_v53  ;;  %v2105_v46 = vsub.f32 %v9344_v15, %v7322_v21  ;;  %v7538_v54 = vand.u32 2147483647, %v2117_v4  ;;  %v2240_v19 = vand.u32 2147483647, %v2224_v47 }
 0x4c2   : > { %v3023_v33 = vand.u32 2147483647, %v3007_v28  ;;  %v2017_v34 = vand.u32 2147483647, %v2001_v29  ;;  %v9345_v28 = vld [vmem:[#allocation209_spill] sm:$0xff]  ;;  %v9347_v53 = vld [vmem:[#allocation211_spill] sm:$0xff]  ;;  %v2450_v29 = vsub.f32 %v9348_v39, %v7377_v63 }
 0x4c3   : > { %v2107_v57 = vsub.f32 %v9345_v28, %v7322_v21  ;;  %v2576_v59 = vand.u32 2147483647, %v2560_v16  ;;  %v2004_v26 = vsub.f32 %v9347_v53, %v7249_v31  ;;  %v2353_v4 = vand.u32 2147483647, %v2337_v50  ;;  %v9351_v31 = vld [vmem:[#allocation231_spill] sm:$0xff]  ;;  %v9352_v15 = vld [vmem:[#allocation276_spill] sm:$0xff] }
 0x4c4   : > { %v3039_v9 = vadd.f32 %v3023_v33, %v2926_v35  ;;  %v2143_v33 = vadd.f32 %v2127_v2, %v2030_v43  ;;  %v2479_v16 = vadd.f32 %v2463_v27, %v2366_v12  ;;  %v2689_v35 = vand.u32 2147483647, %v2673_v25 }
 0x4c5   : > { %v2121_v2 = vand.u32 2147483647, %v2105_v46  ;;  %v2227_v50 = vsub.f32 %v9351_v31, %v7335_v37  ;;  %v2563_v28 = vsub.f32 %v9352_v15, %v7389_v52  ;;  %v2123_v53 = vand.u32 2147483647, %v2107_v57  ;;  %v9354_v46 = vld [vmem:[#allocation257_spill] sm:$0xff] }
 0x4c6   : > { %v7542_v60 = vadd.f32 %v3136_v22, %v3039_v9  ;;  %3216 = vperm.xlu2 %4876, %v7545_v10   ;;  %v7548_v5 = vpop.permute.xlu2 %2994  ;;  %v9349_v22 = vld [vmem:[#allocation216_spill] sm:$0xff]  ;;  %v2786_v9 = vsub.f32 %v9350_v40, %v7428_v11  ;;  %v2256_v43 = vadd.f32 %v2240_v19, %v2143_v33  ;;  %v2592_v39 = vadd.f32 %v2576_v59, %v2479_v16 }
 0x4c7   : > { %3212 = vperm.xlu1 %4875, %v7252_v6   ;;  %v7555_v47 = vpop.permute.xlu1 %2954  ;;  %v2217_v49 = vsub.f32 %v9349_v22, %v7335_v37  ;;  %v2033_v6 = vadd.f32 %v2017_v34, %v7364_v41  ;;  %v2020_v12 = vand.u32 2147483647, %v2004_v26  ;;  %v2466_v25 = vand.u32 2147483647, %v2450_v29  ;;  %v9355_v41 = vld [vmem:[#allocation26_spill] sm:$0xff]  ;;  %v3092_v16 = vpop.permute.xlu0 %3091 }
 0x4c8   : > { %9346 = vst [vmem:[#allocation64_spill] sm:$0xff] %v7542_v60  ;;  %v9353_v60 = vld [vmem:[#allocation45_spill] sm:$0xff]  ;;  %v2369_v27 = vadd.f32 %v2353_v4, %v2256_v43  ;;  %v2340_v19 = vsub.f32 %v9354_v46, %v7360_v45  ;;  %v7572_v33 = vadd.f32 %v2118_v55, %v7357_v32  ;;  %v2705_v40 = vadd.f32 %v2689_v35, %v2592_v39  ;;  %v7585_v32 = vld [vmem:[%s5272_s18 + $0x78] sm:$0xff]  ;;  %v9361_v46 = vld [vmem:[#allocation47_spill] sm:$0xff] }
 0x4c9   : > { %v2899_v22 = vsub.f32 %v9353_v60, %v7458_v44  ;;  %3430 = vperm.xlu0 %4882, %v6926_v42   ;;  %v2802_v31 = vand.u32 2147483647, %v2786_v9  ;;  %v2676_v34 = vsub.f32 %v9355_v41, %v7410_v0  ;;  %v7576_v57 = vadd.f32 %v2121_v2, %v2024_v51  ;;  %v9356_v9 = vld [vmem:[#allocation256_spill] sm:$0xff] }
 0x4ca   : > { %v7578_v59 = vand.u32 2147483647, %v2217_v49  ;;  %v2243_v60 = vand.u32 2147483647, %v2227_v50  ;;  %v2579_v26 = vand.u32 2147483647, %v2563_v28  ;;  %v7581_v4 = vadd.f32 %v2123_v53, %v7413_v30 }
 0x4cb   : > { %v2146_v42 = vadd.f32 %v7504_v13, %v2033_v6  ;;  %v2915_v29 = vand.u32 2147483647, %v2899_v22  ;;  %v3125_v55 = vsub.f32 %v7534_v8, %v7482_v56  ;;  %v2036_v51 = vadd.f32 %v2020_v12, %v7407_v7  ;;  %v7594_v30 = vld [vmem:[%s5272_s18 + $0x70] sm:$0xff]  ;;  %v9359_v53 = vld [vmem:[#allocation234_spill] sm:$0xff]  ;;  %v9360_v12 = vld [vmem:[#allocation279_spill] sm:$0xff] }
 0x4cc   : > { %v2482_v49 = vadd.f32 %v2466_v25, %v2369_v27  ;;  %v2356_v35 = vand.u32 2147483647, %v2340_v19  ;;  %v2453_v2 = vsub.f32 %v9356_v9, %v7377_v63  ;;  %9357 = vst [vmem:[#allocation59_spill] sm:$0xff] %v7594_v30  ;;  %v2818_v50 = vadd.f32 %v2802_v31, %v2705_v40  ;;  %v9358_v28 = vld [vmem:[#allocation25_spill] sm:$0xff]  ;;  %v9362_v31 = vld [vmem:[#allocation215_spill] sm:$0xff] }
 0x4cd   : > { %v2692_v15 = vand.u32 2147483647, %v2676_v34  ;;  %v2789_v8 = vsub.f32 %v9358_v28, %v7428_v11  ;;  %v2259_v7 = vadd.f32 %v2243_v60, %v2146_v42  ;;  %v2230_v39 = vsub.f32 %v9359_v53, %v7335_v37  ;;  %v9363_v60 = vld [vmem:[#allocation259_spill] sm:$0xff]  ;;  %v9365_v53 = vld [vmem:[#allocation212_spill] sm:$0xff] }
 0x4ce   : > { %3228 = vperm.xlu2 %4876, %v7585_v32   ;;  %v2595_v22 = vadd.f32 %v2579_v26, %v2482_v49  ;;  %v2566_v27 = vsub.f32 %v9360_v12, %v7389_v52  ;;  %v2931_v25 = vadd.f32 %v2915_v29, %v2818_v50  ;;  %v2902_v19 = vsub.f32 %v9361_v46, %v7458_v44 }
 0x4cf   : > { %3224 = vperm.xlu1 %4875, %v7594_v30   ;;  %v2967_v13 = vpop.permute.xlu1 %2966  ;;  %v7597_v43 = vpop.permute.xlu2 %3055  ;;  %v3141_v40 = vand.u32 2147483647, %v3125_v55  ;;  %v2104_v34 = vsub.f32 %v9362_v31, %v7322_v21  ;;  %v2372_v9 = vadd.f32 %v2356_v35, %v2259_v7  ;;  %v2469_v28 = vand.u32 2147483647, %v2453_v2 }
 0x4d0   : > { %v3012_v6 = vsub.f32 %v2967_v13, %v7450_v38  ;;  %v2343_v42 = vsub.f32 %v9363_v60, %v7360_v45  ;;  %v2708_v26 = vadd.f32 %v2692_v15, %v2595_v22  ;;  %v2805_v49 = vand.u32 2147483647, %v2789_v8  ;;  %v9364_v13 = vld [vmem:[#allocation28_spill] sm:$0xff]  ;;  %v9368_v60 = vld [vmem:[#allocation261_spill] sm:$0xff] }
 0x4d1   : > { %3442 = vperm.xlu0 %4882, %v7545_v10   ;;  %v2679_v29 = vsub.f32 %v9364_v13, %v7410_v0  ;;  %v2110_v55 = vsub.f32 %v9365_v53, %v7322_v21  ;;  %v2246_v35 = vand.u32 2147483647, %v2230_v39  ;;  %v2582_v2 = vand.u32 2147483647, %v2566_v27  ;;  %v7628_v39 = vld [vmem:[%s5272_s18 + $0x10] sm:$0xff] }
 0x4d2   : > { %v3028_v41 = vand.u32 2147483647, %v3012_v6  ;;  %v9366_v6 = vld [vmem:[#allocation219_spill] sm:$0xff]  ;;  %v2149_v7 = vadd.f32 %v7538_v54, %v2036_v51  ;;  %v2918_v46 = vand.u32 2147483647, %v2902_v19  ;;  %v9367_v15 = vmov 26  }
 0x4d3   : > { %v2222_v12 = vsub.f32 %v9366_v6, %v7335_v37  ;;  %v3128_v8 = vsub.f32 %v3092_v16, %v7482_v56  ;;  %v2120_v22 = vand.u32 2147483647, %v2104_v34  ;;  %v2456_v13 = vsub.f32 %v9368_v60, %v7377_v63  ;;  %v9370_v19 = vld [vmem:[#allocation29_spill] sm:$0xff]  ;;  %v3104_v34 = vpop.permute.xlu0 %3103  ;;  %v9372_v60 = vld [vmem:[#allocation50_spill] sm:$0xff] }
 0x4d4   : > { %v3044_v50 = vadd.f32 %v3028_v41, %v2931_v25  ;;  %v2485_v25 = vadd.f32 %v2469_v28, %v2372_v9  ;;  %v2359_v41 = vand.u32 2147483647, %v2343_v42  ;;  %v2821_v51 = vadd.f32 %v2805_v49, %v2708_v26 }
 0x4d5   : > { %v2695_v27 = vand.u32 2147483647, %v2679_v29  ;;  %v2792_v16 = vsub.f32 %v9370_v19, %v7428_v11  ;;  %v2126_v9 = vand.u32 2147483647, %v2110_v55  ;;  %v2262_v28 = vadd.f32 %v2246_v35, %v2149_v7  ;;  %v9373_v19 = vld [vmem:[#allocation238_spill] sm:$0xff] }
 0x4d6   : > { %v7620_v31 = vadd.f32 %v3141_v40, %v3044_v50  ;;  %4880 = vset.pattern.permute.xlu2 %v9367_v15  ;;  %v2598_v42 = vadd.f32 %v2582_v2, %v2485_v25  ;;  %v9371_v50 = vld [vmem:[#allocation282_spill] sm:$0xff]  ;;  %v2905_v18 = vsub.f32 %v9372_v60, %v7458_v44  ;;  %v3144_v49 = vand.u32 2147483647, %v3128_v8  ;;  %v9374_v2 = vld [vmem:[#allocation32_spill] sm:$0xff] }
 0x4d7   : > { %4879 = vset.pattern.permute.xlu1 %v9367_v15  ;;  %v2979_v53 = vpop.permute.xlu1 %2978  ;;  %3289 = vperm.xlu2 %4880, %v7628_v39   ;;  %v7631_v54 = vpop.permute.xlu2 %3067  ;;  %v2569_v6 = vsub.f32 %v9371_v50, %v7389_v52  ;;  %v2934_v15 = vadd.f32 %v2918_v46, %v2821_v51  ;;  %v2136_v29 = vadd.f32 %v2120_v22, %v7416_v58  ;;  %v2808_v35 = vand.u32 2147483647, %v2792_v16  ;;  %v9375_v58 = vld [vmem:[#allocation263_spill] sm:$0xff] }
 0x4d8   : > { %9369 = vst [vmem:[#allocation11_spill] sm:$0xff] %v7631_v54  ;;  %v3015_v40 = vsub.f32 %v2979_v53, %v7450_v38  ;;  %3285 = vperm.xlu1 %4879, %v7491_v24   ;;  %v2330_v53 = vsub.f32 %v9373_v19, %v7360_v45  ;;  %v2375_v62 = vadd.f32 %v2359_v41, %v2262_v28  ;;  %v2472_v24 = vand.u32 2147483647, %v2456_v13  ;;  %v9376_v41 = vld [vmem:[#allocation222_spill] sm:$0xff] }
 0x4d9   : > { %3454 = vperm.xlu0 %4882, %v7585_v32   ;;  %v2711_v55 = vadd.f32 %v2695_v27, %v2598_v42  ;;  %v2682_v7 = vsub.f32 %v9374_v2, %v7410_v0  ;;  %v7648_v25 = vadd.f32 %v2126_v9, %v7418_v36  ;;  %v7650_v8 = vand.u32 2147483647, %v2222_v12  ;;  %v9378_v28 = vld [vmem:[#allocation214_spill] sm:$0xff] }
 0x4da   : > { %v3031_v26 = vand.u32 2147483647, %v3015_v40  ;;  %v2443_v22 = vsub.f32 %v9375_v58, %v7377_v63  ;;  %v2585_v51 = vand.u32 2147483647, %v2569_v6  ;;  %v2225_v13 = vsub.f32 %v9376_v41, %v7335_v37  ;;  %v7672_v19 = vld [vmem:[%s5272_s18 + $0x18] sm:$0xff] }
 0x4db   : > { %v2921_v27 = vand.u32 2147483647, %v2905_v18  ;;  %v3131_v40 = vsub.f32 %v3104_v34, %v7482_v56  ;;  %v2113_v42 = vsub.f32 %v9378_v28, %v7322_v21  ;;  %v2249_v36 = vadd.f32 %v7578_v59, %v2136_v29  ;;  %v3116_v41 = vpop.permute.xlu0 %3115  ;;  %v9384_v28 = vld [vmem:[#allocation220_spill] sm:$0xff] }
 0x4dc   : > { %v3047_v46 = vadd.f32 %v3031_v26, %v2934_v15  ;;  %v2346_v12 = vand.u32 2147483647, %v2330_v53  ;;  %v2488_v9 = vadd.f32 %v2472_v24, %v2375_v62  ;;  %v7663_v15 = vld [vmem:[%s5272_s18 + $0x20] sm:$0xff]  ;;  %v2824_v60 = vadd.f32 %v2808_v35, %v2711_v55  ;;  %v9381_v62 = vld [vmem:[#allocation218_spill] sm:$0xff]  ;;  %v9382_v53 = vld [vmem:[#allocation264_spill] sm:$0xff] }
 0x4dd   : > { %v2698_v18 = vand.u32 2147483647, %v2682_v7  ;;  %v9380_v26 = vld [vmem:[#allocation31_spill] sm:$0xff]  ;;  %v2106_v59 = vsub.f32 %v9381_v62, %v7322_v21  ;;  %v2459_v29 = vand.u32 2147483647, %v2443_v22  ;;  %v2556_v24 = vsub.f32 %v9382_v53, %v7389_v52  ;;  %v9383_v55 = vld [vmem:[#allocation13_spill] sm:$0xff] }
 0x4de   : > { %v7656_v16 = vadd.f32 %v3144_v49, %v3047_v46  ;;  %v2795_v49 = vsub.f32 %v9380_v26, %v7428_v11  ;;  %v2601_v2 = vadd.f32 %v2585_v51, %v2488_v9  ;;  %v2937_v46 = vadd.f32 %v2921_v27, %v2824_v60  ;;  %v9385_v62 = vld [vmem:[#allocation15_spill] sm:$0xff] }
 0x4df   : > { %v2991_v50 = vpop.permute.xlu1 %2990  ;;  %3297 = vperm.xlu2 %4880, %v7663_v15   ;;  %v7666_v6 = vpop.permute.xlu2 %3075  ;;  %v2908_v35 = vsub.f32 %v9383_v55, %v7458_v44  ;;  %v3147_v58 = vand.u32 2147483647, %v3131_v40  ;;  %v7683_v26 = vand.u32 2147483647, %v2225_v13  ;;  %v2362_v30 = vadd.f32 %v2346_v12, %v2249_v36  ;;  %v9386_v9 = vld [vmem:[#allocation227_spill] sm:$0xff] }
 0x4e0   : > { %9377 = vst [vmem:[#allocation61_spill] sm:$0xff] %v7656_v16  ;;  %v3018_v34 = vsub.f32 %v2991_v50, %v7450_v38  ;;  %3293 = vperm.xlu1 %4879, %v7672_v19   ;;  %v2109_v50 = vsub.f32 %v9384_v28, %v7322_v21  ;;  %v2669_v22 = vsub.f32 %v9385_v62, %v7410_v0  ;;  %v2811_v51 = vand.u32 2147483647, %v2795_v49  ;;  %v9387_v53 = vld [vmem:[#allocation35_spill] sm:$0xff] }
 0x4e1   : > { %9379 = vst [vmem:[#allocation63_spill] sm:$0xff] %v7666_v6  ;;  %v2129_v6 = vand.u32 2147483647, %v2113_v42  ;;  %v2714_v16 = vadd.f32 %v2698_v18, %v2601_v2  ;;  %v2228_v60 = vsub.f32 %v9386_v9, %v7335_v37  ;;  %v2572_v40 = vand.u32 2147483647, %v2556_v24  ;;  %v9389_v18 = vld [vmem:[#allocation223_spill] sm:$0xff] }
 0x4e2   : > { %v3034_v7 = vand.u32 2147483647, %v3018_v34  ;;  %v2475_v34 = vadd.f32 %v2459_v29, %v2362_v30  ;;  %v2782_v55 = vsub.f32 %v9387_v53, %v7428_v11  ;;  %v2122_v28 = vand.u32 2147483647, %v2106_v59  ;;  %v9390_v2 = vld [vmem:[#allocation230_spill] sm:$0xff]  ;;  %v9392_v24 = vld [vmem:[#allocation224_spill] sm:$0xff] }
 0x4e3   : > { %v2924_v13 = vand.u32 2147483647, %v2908_v35  ;;  %v3134_v12 = vsub.f32 %v3116_v41, %v7482_v56  ;;  %v2125_v42 = vand.u32 2147483647, %v2109_v50  ;;  %v2112_v49 = vsub.f32 %v9389_v18, %v7322_v21  ;;  %v7699_v29 = vld [vmem:[%s5272_s18 + $0x38] sm:$0xff] }
 0x4e4   : > { %v3050_v27 = vadd.f32 %v3034_v7, %v2937_v46  ;;  %v2328_v46 = vsub.f32 %v9390_v2, %v7360_v45  ;;  %v2685_v7 = vand.u32 2147483647, %v2669_v22  ;;  %v2219_v35 = vsub.f32 %v9392_v24, %v7335_v37  ;;  %v9395_v22 = vld [vmem:[#allocation243_spill] sm:$0xff]  ;;  %v9396_v2 = vld [vmem:[#allocation36_spill] sm:$0xff] }
 0x4e5   : > { %v2827_v50 = vadd.f32 %v2811_v51, %v2714_v16  ;;  %v2335_v9 = vsub.f32 %v9395_v22, %v7360_v45  ;;  %v2588_v53 = vadd.f32 %v2572_v40, %v2475_v34  ;;  %v2798_v18 = vand.u32 2147483647, %v2782_v55  ;;  %v9397_v51 = vld [vmem:[#allocation57_spill] sm:$0xff] }
 0x4e6   : > { %v7691_v36 = vadd.f32 %v3147_v58, %v3050_v27  ;;  %v9393_v58 = vld [vmem:[#allocation225_spill] sm:$0xff]  ;;  %v3150_v54 = vand.u32 2147483647, %v3134_v12  ;;  %v7725_v34 = vadd.f32 %v2129_v6, %v7453_v14  ;;  %v2128_v40 = vand.u32 2147483647, %v2112_v49  ;;  %v3177_v12 = vpop.permute.xlu0 %3176 }
 0x4e7   : > { %v3003_v30 = vpop.permute.xlu1 %3002  ;;  %3309 = vperm.xlu2 %4880, %v7699_v29   ;;  %v7702_v59 = vpop.permute.xlu2 %3087  ;;  %v2115_v41 = vsub.f32 %v9393_v58, %v7322_v21  ;;  %v7710_v27 = vld [vmem:[%s5272_s18 + $0x30] sm:$0xff]  ;;  %v2141_v21 = vadd.f32 %v2125_v42, %v7495_v20  ;;  %v2701_v16 = vadd.f32 %v2685_v7, %v2588_v53  ;;  %v7721_v58 = vperm.slane %v7471_v61, 1  ;;  %v9398_v42 = vld [vmem:[#allocation268_spill] sm:$0xff] }
 0x4e8   : > { %9388 = vst [vmem:[#allocation66_spill] sm:$0xff] %v7691_v36  ;;  %v3021_v62 = vsub.f32 %v3003_v30, %v7450_v38  ;;  %3305 = vperm.xlu1 %4879, %v7710_v27   ;;  %v2940_v36 = vadd.f32 %v2924_v13, %v2827_v50  ;;  %v3008_v30 = vsub.f32 %v9397_v51, %v7450_v38  ;;  %v2235_v55 = vand.u32 2147483647, %v2219_v35  ;;  %v7737_v35 = vld [vmem:[%s5272_s18 + $0x50] sm:$0xff] }
 0x4e9   : > { %9391 = vst [vmem:[#allocation65_spill] sm:$0xff] %v7702_v59  ;;  %v2895_v59 = vsub.f32 %v9396_v2, %v7458_v44  ;;  %v2244_v20 = vand.u32 2147483647, %v2228_v60  ;;  %v2448_v7 = vsub.f32 %v9398_v42, %v7377_v63  ;;  %v2814_v50 = vadd.f32 %v2798_v18, %v2701_v16 }
 0x4ea   : > { %9394 = vst [vmem:[#allocation69_spill] sm:$0xff] %v7710_v27  ;;  %v3037_v24 = vand.u32 2147483647, %v3021_v62  ;;  %v8791_v27 = vmov 28   ;;  %v2138_v22 = vadd.f32 %v2122_v28, %v7435_v48  ;;  %v2131_v53 = vand.u32 2147483647, %v2115_v41 }
 0x4eb   : > { %4886 = vset.pattern.permute.xlu0 %v8791_v27  ;;  %v2911_v62 = vand.u32 2147483647, %v2895_v59  ;;  %v2351_v2 = vand.u32 2147483647, %v2335_v9  ;;  %v2254_v6 = vadd.f32 %v7650_v8, %v2141_v21  ;;  %v7734_v49 = vand.u32 2147483647, %v2328_v46 }
 0x4ec   : > { %v3053_v13 = vadd.f32 %v3037_v24, %v2940_v36  ;;  %3515 = vperm.xlu0 %4886, %v7628_v39   ;;  %v3024_v36 = vand.u32 2147483647, %v3008_v30  ;;  %v3234_v59 = vsub.f32 %v3177_v12, %v7721_v58  ;;  %v2144_v18 = vadd.f32 %v2128_v40, %v7500_v23  ;;  %v9402_v8 = vld [vmem:[#allocation233_spill] sm:$0xff]  ;;  %v7751_v41 = vld [vmem:[%s5272_s18 + $0x48] sm:$0xff]  ;;  %v9404_v21 = vld [vmem:[#allocation267_spill] sm:$0xff] }
 0x4ed   : > { %v7744_v48 = vadd.f32 %v2235_v55, %v2138_v22  ;;  %v2333_v46 = vsub.f32 %v9402_v8, %v7360_v45  ;;  %9403 = vst [vmem:[#allocation51_spill] sm:$0xff] %v7751_v41  ;;  %v2464_v24 = vand.u32 2147483647, %v2448_v7  ;;  %v2561_v16 = vsub.f32 %v9404_v21, %v7389_v52  ;;  %v9405_v40 = vld [vmem:[#allocation235_spill] sm:$0xff]  ;;  %v9406_v12 = vld [vmem:[#allocation245_spill] sm:$0xff] }
 0x4ee   : > { %v7731_v14 = vadd.f32 %v3150_v54, %v3053_v13  ;;  %v9401_v54 = vld [vmem:[#allocation229_spill] sm:$0xff]  ;;  %v2927_v51 = vadd.f32 %v2911_v62, %v2814_v50  ;;  %v2147_v30 = vadd.f32 %v2131_v53, %v7525_v3  ;;  %v2220_v55 = vsub.f32 %v9405_v40, %v7335_v37  ;;  %v9408_v50 = vld [vmem:[#allocation232_spill] sm:$0xff]  ;;  %v9410_v53 = vld [vmem:[#allocation271_spill] sm:$0xff] }
 0x4ef   : > { %3321 = vperm.xlu2 %4880, %v7737_v35   ;;  %v7740_v60 = vpop.permute.xlu2 %3099  ;;  %v2215_v28 = vsub.f32 %v9401_v54, %v7335_v37  ;;  %v2367_v13 = vadd.f32 %v2351_v2, %v2254_v6  ;;  %v2338_v42 = vsub.f32 %v9406_v12, %v7360_v45  ;;  %v9407_v22 = vld [vmem:[#allocation17_spill] sm:$0xff]  ;;  %v3250_v27 = vand.u32 2147483647, %v3234_v59  ;;  %v9411_v40 = vld [vmem:[#allocation39_spill] sm:$0xff] }
 0x4f0   : > { %9399 = vst [vmem:[#allocation68_spill] sm:$0xff] %v7731_v14  ;;  %3317 = vperm.xlu1 %4879, %v7751_v41   ;;  %v3064_v9 = vpop.permute.xlu1 %3063  ;;  %v2674_v54 = vsub.f32 %v9407_v22, %v7410_v0  ;;  %v3040_v8 = vadd.f32 %v3024_v36, %v2927_v51  ;;  %v2218_v62 = vsub.f32 %v9408_v50, %v7335_v37  ;;  %v2577_v21 = vand.u32 2147483647, %v2561_v16  ;;  %v9412_v50 = vld [vmem:[#allocation239_spill] sm:$0xff]  ;;  %v3197_v16 = vpop.permute.xlu0 %3196 }
 0x4f1   : > { %9400 = vst [vmem:[#allocation153_spill] sm:$0xff] %v7740_v60  ;;  %v3121_v23 = vsub.f32 %v3064_v9, %v7482_v56  ;;  %v2231_v41 = vand.u32 2147483647, %v2215_v28  ;;  %v9409_v9 = vld [vmem:[#allocation236_spill] sm:$0xff]  ;;  %v2451_v2 = vsub.f32 %v9410_v53, %v7377_v63  ;;  %v2480_v6 = vadd.f32 %v2464_v24, %v2367_v13 }
 0x4f2   : > { %v2336_v3 = vsub.f32 %v9409_v9, %v7360_v45  ;;  %v2787_v36 = vsub.f32 %v9411_v40, %v7428_v11  ;;  %v2257_v59 = vadd.f32 %v7683_v26, %v2144_v18  ;;  %v2236_v28 = vand.u32 2147483647, %v2220_v55  ;;  %v7779_v53 = vld [vmem:[%s5272_s18 + $0x68] sm:$0xff] }
 0x4f3   : > { %v3137_v7 = vand.u32 2147483647, %v3121_v23  ;;  %v2349_v23 = vand.u32 2147483647, %v2333_v46  ;;  %v2354_v12 = vand.u32 2147483647, %v2338_v42  ;;  %v2260_v22 = vadd.f32 %v2244_v20, %v2147_v30 }
 0x4f4   : > { %3535 = vperm.xlu0 %4886, %v7699_v29   ;;  %v2339_v9 = vsub.f32 %v9412_v50, %v7360_v45  ;;  %v2690_v60 = vand.u32 2147483647, %v2674_v54  ;;  %v2247_v13 = vadd.f32 %v2231_v41, %v7572_v33  ;;  %v7785_v26 = vand.u32 2147483647, %v2336_v3  ;;  %v9413_v20 = vld [vmem:[#allocation270_spill] sm:$0xff]  ;;  %v9415_v33 = vld [vmem:[#allocation248_spill] sm:$0xff] }
 0x4f5   : > { %v3153_v51 = vadd.f32 %v3137_v7, %v3040_v8  ;;  %v2467_v18 = vand.u32 2147483647, %v2451_v2  ;;  %v2564_v46 = vsub.f32 %v9413_v20, %v7389_v52  ;;  %v2593_v55 = vadd.f32 %v2577_v21, %v2480_v6  ;;  %v9414_v54 = vld [vmem:[#allocation38_spill] sm:$0xff]  ;;  %v9418_v21 = vld [vmem:[#allocation240_spill] sm:$0xff] }
 0x4f6   : > { %v2803_v42 = vand.u32 2147483647, %v2787_v36  ;;  %v2900_v8 = vsub.f32 %v9414_v54, %v7458_v44  ;;  %v2252_v7 = vadd.f32 %v2236_v28, %v7581_v4  ;;  %v2370_v40 = vadd.f32 %v2354_v12, %v2257_v59  ;;  %v9416_v3 = vld [vmem:[#allocation18_spill] sm:$0xff] }
 0x4f7   : > { %v7776_v14 = vadd.f32 %v3250_v27, %v3153_v51  ;;  %3333 = vperm.xlu2 %4880, %v7779_v53   ;;  %v7782_v24 = vpop.permute.xlu2 %3111  ;;  %v2234_v27 = vand.u32 2147483647, %v2218_v62  ;;  %v2341_v41 = vsub.f32 %v9415_v33, %v7360_v45  ;;  %v2677_v2 = vsub.f32 %v9416_v3, %v7410_v0  ;;  %v9417_v51 = vld [vmem:[#allocation237_spill] sm:$0xff]  ;;  %v9419_v28 = vld [vmem:[#allocation274_spill] sm:$0xff] }
 0x4f8   : > { %3329 = vperm.xlu1 %4879, %v7545_v10   ;;  %v7790_v30 = vpop.permute.xlu1 %3071  ;;  %v2223_v10 = vsub.f32 %v9417_v51, %v7335_v37  ;;  %v7801_v50 = vand.u32 2147483647, %v2339_v9  ;;  %v2706_v62 = vadd.f32 %v2690_v60, %v2593_v55  ;;  %v3013_v6 = vsub.f32 %v7464_v17, %v7450_v38  ;;  %v9420_v60 = vld [vmem:[#allocation41_spill] sm:$0xff] }
 0x4f9   : > { %v2226_v36 = vsub.f32 %v9418_v21, %v7335_v37  ;;  %v2483_v4 = vadd.f32 %v2467_v18, %v2370_v40  ;;  %v2580_v59 = vand.u32 2147483647, %v2564_v46  ;;  %v2454_v12 = vsub.f32 %v9419_v28, %v7377_v63  ;;  %v9421_v33 = vld [vmem:[#allocation241_spill] sm:$0xff] }
 0x4fa   : > { %v7811_v20 = vadd.f32 %v7734_v49, %v2247_v13  ;;  %v2819_v54 = vadd.f32 %v2803_v42, %v2706_v62  ;;  %v2916_v9 = vand.u32 2147483647, %v2900_v8  ;;  %v2790_v55 = vsub.f32 %v9420_v60, %v7428_v11  ;;  %v9423_v21 = vld [vmem:[#allocation273_spill] sm:$0xff] }
 0x4fb   : > { %v7816_v17 = vadd.f32 %v2234_v27, %v7576_v57  ;;  %v7818_v37 = vadd.f32 %v2349_v23, %v2252_v7  ;;  %v2357_v18 = vand.u32 2147483647, %v2341_v41  ;;  %v2693_v46 = vand.u32 2147483647, %v2677_v2  ;;  %v7828_v27 = vld [vmem:[%s5272_s18] sm:$0xff] }
 0x4fc   : > { %3547 = vperm.xlu0 %4886, %v7737_v35   ;;  %v2239_v40 = vand.u32 2147483647, %v2223_v10  ;;  %v2332_v3 = vsub.f32 %v9421_v33, %v7360_v45  ;;  %v3029_v51 = vand.u32 2147483647, %v3013_v6  ;;  %v9422_v49 = vmov 27   ;;  %v9425_v10 = vld [vmem:[#allocation40_spill] sm:$0xff] }
 0x4fd   : > { %v3239_v13 = vsub.f32 %v3197_v16, %v7721_v58  ;;  %v2242_v42 = vand.u32 2147483647, %v2226_v36  ;;  %v2596_v8 = vadd.f32 %v2580_v59, %v2483_v4  ;;  %v2470_v62 = vand.u32 2147483647, %v2454_v12  ;;  %v3209_v36 = vpop.permute.xlu0 %3208  ;;  %v9426_v59 = vld [vmem:[#allocation252_spill] sm:$0xff] }
 0x4fe   : > { %v2567_v57 = vsub.f32 %v9423_v21, %v7389_v52  ;;  %v2932_v41 = vadd.f32 %v2916_v9, %v2819_v54  ;;  %v2806_v2 = vand.u32 2147483647, %v2790_v55  ;;  %v2903_v16 = vsub.f32 %v9425_v10, %v7458_v44  ;;  %v9427_v12 = vld [vmem:[#allocation20_spill] sm:$0xff]  ;;  %v9428_v55 = vld [vmem:[#allocation249_spill] sm:$0xff] }
 0x4ff   : > { %4881 = vset.pattern.permute.xlu2 %v9422_v49  ;;  %v2373_v4 = vadd.f32 %v2357_v18, %v2260_v22  ;;  %v2441_v28 = vsub.f32 %v9426_v59, %v7377_v63  ;;  %v2680_v60 = vsub.f32 %v9427_v12, %v7410_v0  ;;  %v3016_v21 = vsub.f32 %v7507_v1, %v7450_v38  ;;  %v9429_v22 = vld [vmem:[#allocation277_spill] sm:$0xff]  ;;  %v9430_v59 = vld [vmem:[#allocation44_spill] sm:$0xff] }
 0x500   : > { %3341 = vperm.xlu1 %4879, %v7585_v32   ;;  %v3084_v23 = vpop.permute.xlu1 %3083  ;;  %3394 = vperm.xlu2 %4881, %v7828_v27   ;;  %v7831_v7 = vpop.permute.xlu2 %3172  ;;  %v2709_v32 = vadd.f32 %v2693_v46, %v2596_v8  ;;  %v3045_v33 = vadd.f32 %v3029_v51, %v2932_v41  ;;  %v3255_v9 = vand.u32 2147483647, %v3239_v13  ;;  %v2331_v10 = vsub.f32 %v9428_v55, %v7360_v45 }
 0x501   : > { %9424 = vst [vmem:[#allocation53_spill] sm:$0xff] %v7831_v7  ;;  %v3126_v6 = vsub.f32 %v3084_v23, %v7482_v56  ;;  %v2486_v7 = vadd.f32 %v2470_v62, %v2373_v4  ;;  %v2583_v23 = vand.u32 2147483647, %v2567_v57  ;;  %v2554_v18 = vsub.f32 %v9429_v22, %v7389_v52 }
 0x502   : > { %v2822_v46 = vadd.f32 %v2806_v2, %v2709_v32  ;;  %v2919_v8 = vand.u32 2147483647, %v2903_v16  ;;  %v2793_v51 = vsub.f32 %v9430_v59, %v7428_v11  ;;  %v2255_v1 = vadd.f32 %v2239_v40, %v7648_v25  ;;  %v9431_v16 = vld [vmem:[#allocation278_spill] sm:$0xff] }
 0x503   : > { %v3142_v54 = vand.u32 2147483647, %v3126_v6  ;;  %v2348_v6 = vand.u32 2147483647, %v2332_v3  ;;  %v2457_v13 = vand.u32 2147483647, %v2441_v28  ;;  %v2258_v45 = vadd.f32 %v2242_v42, %v7725_v34 }
 0x504   : > { %3559 = vperm.xlu0 %4886, %v7779_v53   ;;  %v2696_v12 = vand.u32 2147483647, %v2680_v60  ;;  %v3032_v62 = vand.u32 2147483647, %v3016_v21  ;;  %v3242_v4 = vsub.f32 %v3209_v36, %v7721_v58  ;;  %v2347_v55 = vand.u32 2147483647, %v2331_v10 }
 0x505   : > { %v3158_v41 = vadd.f32 %v3142_v54, %v3045_v33  ;;  %v2599_v22 = vadd.f32 %v2583_v23, %v2486_v7  ;;  %v2570_v2 = vand.u32 2147483647, %v2554_v18  ;;  %v2667_v32 = vsub.f32 %v9431_v16, %v7410_v0  ;;  %v9432_v3 = vld [vmem:[#allocation43_spill] sm:$0xff] }
 0x506   : > { %v2935_v40 = vadd.f32 %v2919_v8, %v2822_v46  ;;  %v2809_v34 = vand.u32 2147483647, %v2793_v51  ;;  %v2906_v42 = vsub.f32 %v9432_v3, %v7458_v44  ;;  %v2473_v7 = vadd.f32 %v2457_v13, %v7811_v20  ;;  %v9433_v28 = vld [vmem:[#allocation255_spill] sm:$0xff]  ;;  %v3221_v46 = vpop.permute.xlu0 %3220  ;;  %v9435_v8 = vld [vmem:[#allocation260_spill] sm:$0xff] }
 0x507   : > { %v7851_v57 = vadd.f32 %v3255_v9, %v3158_v41  ;;  %v2444_v60 = vsub.f32 %v9433_v28, %v7377_v63  ;;  %v2712_v54 = vadd.f32 %v2696_v12, %v2599_v22  ;;  %v3019_v10 = vsub.f32 %v7548_v5, %v7450_v38  ;;  %v9436_v20 = vld [vmem:[#allocation24_spill] sm:$0xff] }
 0x508   : > { %4883 = vset.pattern.permute.xlu1 %v9422_v49  ;;  %v3096_v33 = vpop.permute.xlu1 %3095  ;;  %3406 = vperm.xlu2 %4881, %v7672_v19   ;;  %v7858_v25 = vpop.permute.xlu2 %3184  ;;  %v9434_v49 = vld [vmem:[#allocation258_spill] sm:$0xff]  ;;  %v3048_v9 = vadd.f32 %v3032_v62, %v2935_v40  ;;  %v3258_v18 = vand.u32 2147483647, %v3242_v4  ;;  %v2449_v59 = vsub.f32 %v9435_v8, %v7377_v63  ;;  %v2683_v51 = vand.u32 2147483647, %v2667_v32  ;;  %v9437_v4 = vld [vmem:[#allocation48_spill] sm:$0xff] }
 0x509   : > { %v3129_v36 = vsub.f32 %v3096_v33, %v7482_v56  ;;  %3402 = vperm.xlu1 %4883, %v7628_v39   ;;  %v2446_v21 = vsub.f32 %v9434_v49, %v7377_v63  ;;  %v2586_v39 = vadd.f32 %v2570_v2, %v2473_v7  ;;  %v2780_v41 = vsub.f32 %v9436_v20, %v7428_v11 }
 0x50a   : > { %v2368_v13 = vadd.f32 %v7785_v26, %v2255_v1  ;;  %v2825_v16 = vadd.f32 %v2809_v34, %v2712_v54  ;;  %v2922_v12 = vand.u32 2147483647, %v2906_v42  ;;  %v7877_v22 = vadd.f32 %v2348_v6, %v7744_v48  ;;  %v7889_v6 = vld [vmem:[%s5272_s18 + $0x28] sm:$0xff]  ;;  %v9440_v54 = vld [vmem:[#allocation46_spill] sm:$0xff] }
 0x50b   : > { %v3145_v23 = vand.u32 2147483647, %v3129_v36  ;;  %v7880_v5 = vadd.f32 %v7801_v50, %v2258_v45  ;;  %v2893_v33 = vsub.f32 %v9437_v4, %v7458_v44  ;;  %v3245_v2 = vsub.f32 %v3221_v46, %v7721_v58  ;;  %v9438_v45 = vld [vmem:[#allocation280_spill] sm:$0xff] }
 0x50c   : > { %v2363_v32 = vadd.f32 %v2347_v55, %v7816_v17  ;;  %v2460_v40 = vand.u32 2147483647, %v2444_v60  ;;  %v3035_v3 = vand.u32 2147483647, %v3019_v10  ;;  %v2462_v1 = vand.u32 2147483647, %v2446_v21 }
 0x50d   : > { %v3161_v62 = vadd.f32 %v3145_v23, %v3048_v9  ;;  %v2465_v34 = vand.u32 2147483647, %v2449_v59  ;;  %v2699_v42 = vadd.f32 %v2683_v51, %v2586_v39  ;;  %v2796_v36 = vand.u32 2147483647, %v2780_v41  ;;  %v9439_v60 = vld [vmem:[#allocation23_spill] sm:$0xff] }
 0x50e   : > { %v2557_v7 = vsub.f32 %v9438_v45, %v7389_v52  ;;  %v2938_v28 = vadd.f32 %v2922_v12, %v2825_v16  ;;  %v2670_v49 = vsub.f32 %v9439_v60, %v7410_v0  ;;  %v2909_v21 = vand.u32 2147483647, %v2893_v33  ;;  %v9441_v16 = vld [vmem:[#allocation283_spill] sm:$0xff]  ;;  %v3282_v33 = vpop.permute.xlu0 %3281  ;;  %v9446_v60 = vld [vmem:[#allocation281_spill] sm:$0xff] }
 0x50f   : > { %v7886_v26 = vadd.f32 %v3258_v18, %v3161_v62  ;;  %v3006_v9 = vsub.f32 %v9440_v54, %v7450_v38  ;;  %v3261_v10 = vand.u32 2147483647, %v3245_v2  ;;  %v2476_v8 = vadd.f32 %v2460_v40, %v2363_v32 }
 0x510   : > { %v3108_v48 = vpop.permute.xlu1 %3107  ;;  %3414 = vperm.xlu2 %4881, %v7889_v6   ;;  %v3193_v50 = vpop.permute.xlu2 %3192  ;;  %v3051_v23 = vadd.f32 %v3035_v3, %v2938_v28  ;;  %v2812_v59 = vadd.f32 %v2796_v36, %v2699_v42  ;;  %v3119_v39 = vsub.f32 %v7597_v43, %v7482_v56  ;;  %v7904_v51 = vperm.slane %v7471_v61, 2  ;;  %v9442_v61 = vld [vmem:[#allocation27_spill] sm:$0xff]  ;;  %v9443_v36 = vld [vmem:[#allocation12_spill] sm:$0xff] }
 0x511   : > { %v3132_v17 = vsub.f32 %v3108_v48, %v7482_v56  ;;  %v3238_v55 = vsub.f32 %v3193_v50, %v7721_v58  ;;  %3410 = vperm.xlu1 %4883, %v7663_v15   ;;  %v5166_v20 = vmov 29   ;;  %v2573_v41 = vand.u32 2147483647, %v2557_v7  ;;  %v9445_v7 = vld [vmem:[#allocation266_spill] sm:$0xff] }
 0x512   : > { %4887 = vset.pattern.permute.xlu0 %v5166_v20  ;;  %v2559_v12 = vsub.f32 %v9441_v16, %v7389_v52  ;;  %v2478_v43 = vadd.f32 %v2462_v1, %v7818_v37  ;;  %v2783_v2 = vsub.f32 %v9442_v61, %v7428_v11  ;;  %v2925_v32 = vadd.f32 %v2909_v21, %v2812_v59  ;;  %v7927_v1 = vld [vmem:[%s5272_s18 + $0x40] sm:$0xff] }
 0x513   : > { %v3148_v18 = vand.u32 2147483647, %v3132_v17  ;;  %v3254_v46 = vand.u32 2147483647, %v3238_v55  ;;  %3620 = vperm.xlu0 %4887, %v7828_v27   ;;  %v3022_v40 = vand.u32 2147483647, %v3006_v9  ;;  %v7916_v3 = vadd.f32 %v2465_v34, %v2368_v13 }
 0x514   : > { %v2686_v42 = vand.u32 2147483647, %v2670_v49  ;;  %v2896_v48 = vsub.f32 %v9443_v36, %v7458_v44  ;;  %v2445_v28 = vsub.f32 %v9445_v7, %v7377_v63  ;;  %v3135_v37 = vand.u32 2147483647, %v3119_v39  ;;  %v9448_v16 = vld [vmem:[#allocation11_spill] sm:$0xff] }
 0x515   : > { %v3164_v62 = vadd.f32 %v3148_v18, %v3051_v23  ;;  %v7910_v4 = vadd.f32 %v3254_v46, %v7620_v31  ;;  %v9444_v31 = vld [vmem:[#allocation262_spill] sm:$0xff]  ;;  %v3345_v13 = vsub.f32 %v3282_v33, %v7904_v51  ;;  %v2589_v34 = vadd.f32 %v2573_v41, %v2476_v8 }
 0x516   : > { %v2452_v45 = vsub.f32 %v9444_v31, %v7377_v63  ;;  %v2575_v55 = vand.u32 2147483647, %v2559_v12  ;;  %v2672_v49 = vsub.f32 %v9446_v60, %v7410_v0  ;;  %v2799_v9 = vand.u32 2147483647, %v2783_v2  ;;  %v9447_v46 = vld [vmem:[#allocation30_spill] sm:$0xff]  ;;  %v9453_v60 = vld [vmem:[#allocation284_spill] sm:$0xff] }
 0x517   : > { %v7920_v50 = vadd.f32 %v3261_v10, %v3164_v62  ;;  %v3038_v63 = vadd.f32 %v3022_v40, %v2925_v32  ;;  %v3009_v10 = vsub.f32 %v7555_v47, %v7450_v38  ;;  %v2702_v18 = vadd.f32 %v2686_v42, %v2589_v34  ;;  %v9449_v32 = vld [vmem:[#allocation14_spill] sm:$0xff]  ;;  %v9450_v47 = vld [vmem:[#allocation61_spill] sm:$0xff]  ;;  %v9452_v34 = vld [vmem:[#allocation272_spill] sm:$0xff] }
 0x518   : > { %3426 = vperm.xlu2 %4881, %v7927_v1   ;;  %v3205_v17 = vpop.permute.xlu2 %3204  ;;  %v2785_v8 = vsub.f32 %v9447_v46, %v7428_v11  ;;  %v2912_v59 = vand.u32 2147483647, %v2896_v48  ;;  %v3122_v12 = vsub.f32 %v9448_v16, %v7482_v56  ;;  %v3361_v33 = vand.u32 2147483647, %v3345_v13  ;;  %v9451_v48 = vld [vmem:[#allocation56_spill] sm:$0xff] }
 0x519   : > { %v3241_v21 = vsub.f32 %v3205_v17, %v7721_v58  ;;  %3422 = vperm.xlu1 %4883, %v7699_v29   ;;  %v3169_v54 = vpop.permute.xlu1 %3168  ;;  %v3151_v41 = vadd.f32 %v3135_v37, %v3038_v63  ;;  %v2591_v61 = vadd.f32 %v2575_v55, %v2478_v43  ;;  %v2688_v2 = vand.u32 2147483647, %v2672_v49  ;;  %v7950_v17 = vpop.permute.xlu0 %3301 }
 0x51a   : > { %v3232_v23 = vsub.f32 %v3169_v54, %v7721_v58  ;;  %v2562_v40 = vsub.f32 %v9449_v32, %v7389_v52  ;;  %v2815_v42 = vadd.f32 %v2799_v9, %v2702_v18  ;;  %v2898_v31 = vsub.f32 %v9451_v48, %v7458_v44  ;;  %v7959_v9 = vld [vmem:[%s5272_s18 + $0x58] sm:$0xff]  ;;  %v9456_v32 = vld [vmem:[#allocation16_spill] sm:$0xff]  ;;  %v9458_v48 = vld [vmem:[#allocation63_spill] sm:$0xff] }
 0x51b   : > { %v3257_v39 = vand.u32 2147483647, %v3241_v21  ;;  %3640 = vperm.xlu0 %4887, %v7889_v6   ;;  %v3025_v7 = vand.u32 2147483647, %v3009_v10  ;;  %v2468_v13 = vand.u32 2147483647, %v2452_v45  ;;  %v2558_v55 = vsub.f32 %v9452_v34, %v7389_v52 }
 0x51c   : > { %v3248_v62 = vand.u32 2147483647, %v3232_v23  ;;  %v2461_v43 = vand.u32 2147483647, %v2445_v28  ;;  %v2675_v49 = vsub.f32 %v9453_v60, %v7410_v0  ;;  %v2801_v21 = vand.u32 2147483647, %v2785_v8 }
 0x51d   : > { %v7945_v36 = vadd.f32 %v3257_v39, %v9450_v47  ;;  %v2928_v54 = vadd.f32 %v2912_v59, %v2815_v42  ;;  %v3138_v63 = vand.u32 2147483647, %v3122_v12  ;;  %v2704_v18 = vadd.f32 %v2688_v2, %v2591_v61  ;;  %v9454_v45 = vld [vmem:[#allocation19_spill] sm:$0xff]  ;;  %v9455_v59 = vld [vmem:[#allocation49_spill] sm:$0xff] }
 0x51e   : > { %v3264_v37 = vadd.f32 %v3248_v62, %v3151_v41  ;;  %v2578_v46 = vand.u32 2147483647, %v2562_v40  ;;  %v2565_v28 = vsub.f32 %v9454_v45, %v7389_v52  ;;  %v2914_v8 = vand.u32 2147483647, %v2898_v31  ;;  %v9457_v2 = vld [vmem:[#allocation33_spill] sm:$0xff] }
 0x51f   : > { %v3011_v16 = vsub.f32 %v9455_v59, %v7450_v38  ;;  %v3041_v12 = vadd.f32 %v3025_v7, %v2928_v54  ;;  %v2678_v61 = vsub.f32 %v9456_v32, %v7410_v0  ;;  %v2788_v40 = vsub.f32 %v9457_v2, %v7428_v11  ;;  %v9459_v7 = vld [vmem:[#allocation21_spill] sm:$0xff]  ;;  %v9463_v2 = vld [vmem:[#allocation59_spill] sm:$0xff] }
 0x520   : > { %v7956_v23 = vadd.f32 %v3361_v33, %v3264_v37  ;;  %3438 = vperm.xlu2 %4881, %v7959_v9   ;;  %v3217_v10 = vpop.permute.xlu2 %3216  ;;  %v2691_v33 = vand.u32 2147483647, %v2675_v49  ;;  %v2817_v47 = vadd.f32 %v2801_v21, %v2704_v18  ;;  %v3124_v37 = vsub.f32 %v9458_v48, %v7482_v56  ;;  %v9460_v49 = vld [vmem:[#allocation60_spill] sm:$0xff] }
 0x521   : > { %v3244_v39 = vsub.f32 %v3217_v10, %v7721_v58  ;;  %3434 = vperm.xlu1 %4883, %v7737_v35   ;;  %v3181_v41 = vpop.permute.xlu1 %3180  ;;  %v3154_v42 = vadd.f32 %v3138_v63, %v3041_v12  ;;  %v2594_v34 = vadd.f32 %v2578_v46, %v7916_v3  ;;  %v2671_v60 = vsub.f32 %v9459_v7, %v7410_v0  ;;  %v9461_v10 = vld [vmem:[#allocation66_spill] sm:$0xff] }
 0x522   : > { %v3235_v62 = vsub.f32 %v3181_v41, %v7721_v58  ;;  %v2901_v54 = vsub.f32 %v9460_v49, %v7458_v44  ;;  %v2930_v21 = vadd.f32 %v2914_v8, %v2817_v47  ;;  %v3027_v63 = vand.u32 2147483647, %v3011_v16  ;;  %v9462_v12 = vld [vmem:[#allocation34_spill] sm:$0xff]  ;;  %v3314_v8 = vpop.permute.xlu0 %3313 }
 0x523   : > { %v3260_v52 = vand.u32 2147483647, %v3244_v39  ;;  %3652 = vperm.xlu0 %4887, %v7927_v1   ;;  %v2581_v39 = vand.u32 2147483647, %v2565_v28  ;;  %v2484_v41 = vadd.f32 %v2468_v13, %v7880_v5  ;;  %v2477_v3 = vadd.f32 %v2461_v43, %v7877_v22  ;;  %v9464_v5 = vld [vmem:[#allocation132_spill] sm:$0xff] }
 0x524   : > { %v3251_v31 = vand.u32 2147483647, %v3235_v62  ;;  %v2574_v46 = vand.u32 2147483647, %v2558_v55  ;;  %v2804_v59 = vand.u32 2147483647, %v2788_v40  ;;  %v2791_v62 = vsub.f32 %v9462_v12, %v7428_v11 }
 0x525   : > { %v7981_v45 = vadd.f32 %v3260_v52, %v9461_v10  ;;  %v2694_v0 = vand.u32 2147483647, %v2678_v61  ;;  %v3140_v32 = vand.u32 2147483647, %v3124_v37  ;;  %v3350_v28 = vsub.f32 %v7950_v17, %v7904_v51  ;;  %v9465_v37 = vld [vmem:[#allocation37_spill] sm:$0xff] }
 0x526   : > { %v7984_v18 = vadd.f32 %v3251_v31, %v3154_v42  ;;  %v2707_v16 = vadd.f32 %v2691_v33, %v2594_v34  ;;  %v2917_v47 = vand.u32 2147483647, %v2901_v54  ;;  %v3014_v13 = vsub.f32 %v9464_v5, %v7450_v38  ;;  %v9466_v33 = vld [vmem:[#allocation65_spill] sm:$0xff] }
 0x527   : > { %v2597_v55 = vadd.f32 %v2581_v39, %v2484_v41  ;;  %v2687_v61 = vand.u32 2147483647, %v2671_v60  ;;  %v3043_v40 = vadd.f32 %v3027_v63, %v2930_v21  ;;  %v2784_v17 = vsub.f32 %v9465_v37, %v7428_v11  ;;  %v9467_v39 = vld [vmem:[#allocation62_spill] sm:$0xff]  ;;  %v9468_v21 = vld [vmem:[#allocation68_spill] sm:$0xff] }
 0x528   : > { %3450 = vperm.xlu2 %4881, %v9463_v2   ;;  %v3229_v52 = vpop.permute.xlu2 %3228  ;;  %v2820_v48 = vadd.f32 %v2804_v59, %v2707_v16  ;;  %v3127_v31 = vsub.f32 %v9466_v33, %v7482_v56  ;;  %v2807_v7 = vand.u32 2147483647, %v2791_v62  ;;  %v3366_v10 = vand.u32 2147483647, %v3350_v28  ;;  %v9469_v11 = vld [vmem:[#allocation42_spill] sm:$0xff] }
 0x529   : > { %v3247_v22 = vsub.f32 %v3229_v52, %v7721_v58  ;;  %3446 = vperm.xlu1 %4883, %v7779_v53   ;;  %v3189_v43 = vpop.permute.xlu1 %3188  ;;  %v3156_v49 = vadd.f32 %v3140_v32, %v3043_v40  ;;  %v3030_v52 = vand.u32 2147483647, %v3014_v13  ;;  %v2904_v60 = vsub.f32 %v9467_v39, %v7458_v44  ;;  %v9470_v28 = vld [vmem:[#allocation58_spill] sm:$0xff] }
 0x52a   : > { %v3237_v42 = vsub.f32 %v3189_v43, %v7721_v58  ;;  %v2933_v12 = vadd.f32 %v2917_v47, %v2820_v48  ;;  %v2590_v41 = vadd.f32 %v2574_v46, %v2477_v3  ;;  %v2897_v59 = vsub.f32 %v9469_v11, %v7458_v44  ;;  %v9472_v44 = vld [vmem:[#allocation52_spill] sm:$0xff] }
 0x52b   : > { %v3263_v34 = vand.u32 2147483647, %v3247_v22  ;;  %3664 = vperm.xlu0 %4887, %v7959_v9   ;;  %v2710_v62 = vadd.f32 %v2694_v0, %v2597_v55  ;;  %v2800_v32 = vand.u32 2147483647, %v2784_v17  ;;  %v3010_v47 = vsub.f32 %v9470_v28, %v7450_v38  ;;  %v8020_v55 = vld [vmem:[%s5272_s18 + $0x8] sm:$0xff] }
 0x52c   : > { %v3253_v54 = vand.u32 2147483647, %v3237_v42  ;;  %v3143_v5 = vand.u32 2147483647, %v3127_v31  ;;  %v2703_v13 = vadd.f32 %v2687_v61, %v2590_v41  ;;  %v9471_v43 = vmov 28   ;;  %v3326_v31 = vpop.permute.xlu0 %3325 }
 0x52d   : > { %v8005_v63 = vadd.f32 %v3263_v34, %v9468_v21  ;;  %v3353_v40 = vsub.f32 %v3314_v8, %v7904_v51  ;;  %v2823_v42 = vadd.f32 %v2807_v7, %v2710_v62  ;;  %v3046_v3 = vadd.f32 %v3030_v52, %v2933_v12 }
 0x52e   : > { %v3269_v16 = vadd.f32 %v3253_v54, %v3156_v49  ;;  %v2920_v46 = vand.u32 2147483647, %v2904_v60  ;;  %v3017_v48 = vsub.f32 %v9472_v44, %v7450_v38  ;;  %v2913_v37 = vand.u32 2147483647, %v2897_v59  ;;  %v9473_v49 = vld [vmem:[#allocation153_spill] sm:$0xff] }
 0x52f   : > { %v3123_v17 = vsub.f32 %v7790_v30, %v7482_v56  ;;  %v2816_v38 = vadd.f32 %v2800_v32, %v2703_v13  ;;  %v3026_v34 = vand.u32 2147483647, %v3010_v47  ;;  %v3159_v7 = vadd.f32 %v3143_v5, %v3046_v3 }
 0x530   : > { %v8012_v22 = vadd.f32 %v3366_v10, %v3269_v16  ;;  %4885 = vset.pattern.permute.xlu2 %v9471_v43  ;;  %v3130_v54 = vsub.f32 %v9473_v49, %v7482_v56  ;;  %v3236_v10 = vsub.f32 %v7858_v25, %v7721_v58  ;;  %v3369_v39 = vand.u32 2147483647, %v3353_v40 }
 0x531   : > { %4884 = vset.pattern.permute.xlu1 %v9471_v43  ;;  %v3201_v0 = vpop.permute.xlu1 %3200  ;;  %3511 = vperm.xlu2 %4885, %v8020_v55   ;;  %v3290_v61 = vpop.permute.xlu2 %3289  ;;  %v2936_v30 = vadd.f32 %v2920_v46, %v2823_v42  ;;  %v3033_v60 = vand.u32 2147483647, %v3017_v48  ;;  %v2929_v21 = vadd.f32 %v2913_v37, %v2816_v38  ;;  %v3139_v41 = vand.u32 2147483647, %v3123_v17 }
 0x532   : > { %v3240_v8 = vsub.f32 %v3201_v0, %v7721_v58  ;;  %v3347_v33 = vsub.f32 %v3290_v61, %v7904_v51  ;;  %3507 = vperm.xlu1 %4884, %v7828_v27   ;;  %v3146_v16 = vand.u32 2147483647, %v3130_v54  ;;  %v3252_v32 = vand.u32 2147483647, %v3236_v10  ;;  %v9476_v10 = vld [vmem:[#allocation53_spill] sm:$0xff] }
 0x533   : > { %3676 = vperm.xlu0 %4887, %v9463_v2   ;;  %v3042_v62 = vadd.f32 %v3026_v34, %v2929_v21  ;;  %v3356_v25 = vsub.f32 %v3326_v31, %v7904_v51  ;;  %v3049_v47 = vadd.f32 %v3033_v60, %v2936_v30  ;;  %v3133_v42 = vsub.f32 %v7782_v24, %v7482_v56  ;;  %v9475_v34 = vld [vmem:[#allocation54_spill] sm:$0xff] }
 0x534   : > { %v3256_v12 = vand.u32 2147483647, %v3240_v8  ;;  %v3363_v52 = vand.u32 2147483647, %v3347_v33  ;;  %v3338_v0 = vpop.permute.xlu0 %3337  ;;  %v5167_v30 = vmov 30  }
 0x535   : > { %v3155_v43 = vadd.f32 %v3139_v41, %v3042_v62  ;;  %v3372_v48 = vand.u32 2147483647, %v3356_v25  ;;  %v3359_v37 = vsub.f32 %v3338_v0, %v7904_v51  ;;  %v3149_v17 = vand.u32 2147483647, %v3133_v42  ;;  %v9477_v62 = vld [vmem:[#allocation51_spill] sm:$0xff] }
 0x536   : > { %v3272_v11 = vadd.f32 %v3256_v12, %v3159_v7  ;;  %v8034_v59 = vadd.f32 %v3363_v52, %v7776_v14  ;;  %v3162_v14 = vadd.f32 %v3146_v16, %v3049_v47  ;;  %v3233_v12 = vsub.f32 %v9476_v10, %v7721_v58  ;;  %v8058_v52 = vld [vmem:[%s5552_s27 + $0x18] sm:$0xff] }
 0x537   : > { %v3268_v3 = vadd.f32 %v3252_v32, %v3155_v43  ;;  %v3375_v38 = vand.u32 2147483647, %v3359_v37  ;;  %v3165_v7 = vadd.f32 %v3149_v17, %v9475_v34  ;;  %v8100_v34 = vld [vmem:[%s5272_s18 + $0x70] sm:$0xff] }
 0x538   : > { %v8036_v28 = vadd.f32 %v3369_v39, %v3272_v11  ;;  %v8061_v39 = vperm.slane %v8058_v52, 3  ;;  %v3249_v16 = vand.u32 2147483647, %v3233_v12 }
 0x539   : > { %v3213_v5 = vpop.permute.xlu1 %3212  ;;  %3523 = vperm.xlu2 %4885, %v7663_v15   ;;  %v3298_v13 = vpop.permute.xlu2 %3297 }
 0x53a   : > { %v3243_v2 = vsub.f32 %v3213_v5, %v7721_v58  ;;  %v3349_v40 = vsub.f32 %v3298_v13, %v7904_v51  ;;  %3519 = vperm.xlu1 %4884, %v7672_v19   ;;  %v9474_v19 = vld [vmem:[#allocation69_spill] sm:$0xff]  ;;  %v9478_v13 = vld [vmem:[#allocation64_spill] sm:$0xff] }
 0x53b   : > { %4891 = vset.pattern.permute.xlu0 %v5167_v30  ;;  %v3265_v43 = vadd.f32 %v3249_v16, %v9478_v13 }
 0x53c   : > { %v3259_v46 = vand.u32 2147483647, %v3243_v2  ;;  %v3365_v44 = vand.u32 2147483647, %v3349_v40  ;;  %v3399_v41 = vpop.permute.xlu0 %3398  ;;  %3737 = vperm.xlu0 %4891, %v8020_v55  }
 0x53d   : > { %v3459_v32 = vsub.f32 %v3399_v41, %v8061_v39 }
 0x53e   : > { %v3275_v61 = vadd.f32 %v3259_v46, %v3162_v14  ;;  %v8045_v15 = vadd.f32 %v3365_v44, %v3268_v3  ;;  %v8083_v44 = vld [vmem:[%s5272_s18 + $0x60] sm:$0xff] }
 0x53f   : > { %v3475_v40 = vand.u32 2147483647, %v3459_v32 }
 0x540   : > { %v8048_v8 = vadd.f32 %v3372_v48, %v3275_v61 }
 0x541   : > { %v3225_v33 = vpop.permute.xlu1 %3224  ;;  %3531 = vperm.xlu2 %4885, %v9474_v19   ;;  %v3310_v31 = vpop.permute.xlu2 %3309 }
 0x542   : > { %v3246_v56 = vsub.f32 %v3225_v33, %v7721_v58  ;;  %v3352_v24 = vsub.f32 %v3310_v31, %v7904_v51  ;;  %3527 = vperm.xlu1 %4884, %v7889_v6  }
 0x544   : > { %v3262_v49 = vand.u32 2147483647, %v3246_v56  ;;  %v3368_v54 = vand.u32 2147483647, %v3352_v24  ;;  %3757 = vperm.xlu0 %4891, %v9474_v19   ;;  %v3419_v3 = vpop.permute.xlu0 %3418  ;;  %v8095_v56 = vld [vmem:[%s5272_s18 + $0x78] sm:$0xff] }
 0x545   : > { %v3464_v24 = vsub.f32 %v3419_v3, %v8061_v39 }
 0x546   : > { %v3278_v60 = vadd.f32 %v3262_v49, %v3165_v7  ;;  %v8065_v21 = vadd.f32 %v3368_v54, %v7851_v57 }
 0x547   : > { %v3480_v12 = vand.u32 2147483647, %v3464_v24 }
 0x548   : > { %v8068_v11 = vadd.f32 %v3375_v38, %v3278_v60 }
 0x549   : > { %3543 = vperm.xlu2 %4885, %v9477_v62   ;;  %v3322_v58 = vpop.permute.xlu2 %3321 }
 0x54a   : > { %v3355_v25 = vsub.f32 %v3322_v58, %v7904_v51  ;;  %3539 = vperm.xlu1 %4884, %v7927_v1   ;;  %v3286_v47 = vpop.permute.xlu1 %3285 }
 0x54b   : > { %v3346_v57 = vsub.f32 %v3286_v47, %v7904_v51 }
 0x54c   : > { %v3371_v5 = vand.u32 2147483647, %v3355_v25  ;;  %3769 = vperm.xlu0 %4891, %v9477_v62   ;;  %v3431_v38 = vpop.permute.xlu0 %3430  ;;  %v8116_v25 = vld [vmem:[%s5272_s18 + $0x10] sm:$0xff] }
 0x54d   : > { %v3362_v2 = vand.u32 2147483647, %v3346_v57  ;;  %v3467_v58 = vsub.f32 %v3431_v38, %v8061_v39 }
 0x54e   : > { %v8077_v14 = vadd.f32 %v3371_v5, %v7886_v26 }
 0x54f   : > { %v3378_v42 = vadd.f32 %v3362_v2, %v3265_v43  ;;  %v3483_v43 = vand.u32 2147483647, %v3467_v58 }
 0x551   : > { %v8080_v46 = vadd.f32 %v3475_v40, %v3378_v42  ;;  %3555 = vperm.xlu2 %4885, %v8083_v44   ;;  %v3334_v48 = vpop.permute.xlu2 %3333 }
 0x552   : > { %v3358_v0 = vsub.f32 %v3334_v48, %v7904_v51  ;;  %3551 = vperm.xlu1 %4884, %v7959_v9   ;;  %v3294_v61 = vpop.permute.xlu1 %3293  ;;  %v8130_v48 = vld [vmem:[%s5272_s18 + $0x20] sm:$0xff] }
 0x553   : > { %v3348_v26 = vsub.f32 %v3294_v61, %v7904_v51 }
 0x554   : > { %v3374_v37 = vand.u32 2147483647, %v3358_v0  ;;  %3781 = vperm.xlu0 %4891, %v8083_v44   ;;  %v3443_v57 = vpop.permute.xlu0 %3442 }
 0x555   : > { %v3364_v17 = vand.u32 2147483647, %v3348_v26  ;;  %v3470_v42 = vsub.f32 %v3443_v57, %v8061_v39 }
 0x556   : > { %v8090_v33 = vadd.f32 %v3374_v37, %v7920_v50  ;;  %v8136_v37 = vld [vmem:[%s5272_s18 + $0x18] sm:$0xff] }
 0x557   : > { %v3380_v31 = vadd.f32 %v3364_v17, %v7984_v18 }
 0x559   : > { %3567 = vperm.xlu2 %4885, %v8095_v56  }
 0x55a   : > { %3563 = vperm.xlu1 %4884, %v8100_v34   ;;  %v3306_v7 = vpop.permute.xlu1 %3305  ;;  %v3395_v49 = vpop.permute.xlu2 %3394 }
 0x55b   : > { %v3351_v50 = vsub.f32 %v3306_v7, %v7904_v51  ;;  %v3458_v54 = vsub.f32 %v3395_v49, %v8061_v39 }
 0x55c   : > { %3793 = vperm.xlu0 %4891, %v8095_v56   ;;  %v3455_v24 = vpop.permute.xlu0 %3454 }
 0x55d   : > { %v3367_v10 = vand.u32 2147483647, %v3351_v50  ;;  %v3474_v18 = vand.u32 2147483647, %v3458_v54  ;;  %v3473_v49 = vsub.f32 %v3455_v24, %v8061_v39 }
 0x55f   : > { %v3383_v60 = vadd.f32 %v3367_v10, %v7910_v4  ;;  %v8108_v41 = vadd.f32 %v3474_v18, %v7956_v23 }
 0x561   : > { %v8110_v16 = vadd.f32 %v3480_v12, %v3383_v60  ;;  %4889 = vset.pattern.permute.xlu2 %v5166_v20  ;;  %v3489_v60 = vand.u32 2147483647, %v3473_v49 }
 0x562   : > { %4888 = vset.pattern.permute.xlu1 %v5166_v20  ;;  %v3318_v32 = vpop.permute.xlu1 %3317  ;;  %3628 = vperm.xlu2 %4889, %v8116_v25   ;;  %v3407_v47 = vpop.permute.xlu2 %3406 }
 0x563   : > { %v3354_v4 = vsub.f32 %v3318_v32, %v7904_v51  ;;  %v3461_v23 = vsub.f32 %v3407_v47, %v8061_v39  ;;  %3624 = vperm.xlu1 %4888, %v8020_v55   ;;  %v5168_v32 = vmov 31  }
 0x564   : > { %4895 = vset.pattern.permute.xlu0 %v5168_v32 }
 0x565   : > { %v3370_v5 = vand.u32 2147483647, %v3354_v4  ;;  %v3477_v13 = vand.u32 2147483647, %v3461_v23  ;;  %3854 = vperm.xlu0 %4895, %v8116_v25  }
 0x567   : > { %v3386_v20 = vadd.f32 %v3370_v5, %v7945_v36  ;;  %v8124_v2 = vadd.f32 %v3477_v13, %v3380_v31  ;;  %v3486_v31 = vand.u32 2147483647, %v3470_v42  ;;  %v8170_v42 = vld [vmem:[%s5272_s18 + $0x38] sm:$0xff] }
 0x569   : > { %v8126_v40 = vadd.f32 %v3483_v43, %v3386_v20 }
 0x56a   : > { %v3330_v3 = vpop.permute.xlu1 %3329  ;;  %3636 = vperm.xlu2 %4889, %v8130_v48   ;;  %v3415_v0 = vpop.permute.xlu2 %3414 }
 0x56b   : > { %v3357_v61 = vsub.f32 %v3330_v3, %v7904_v51  ;;  %v3463_v26 = vsub.f32 %v3415_v0, %v8061_v39  ;;  %3632 = vperm.xlu1 %4888, %v8136_v37  }
 0x56d   : > { %v3373_v36 = vand.u32 2147483647, %v3357_v61  ;;  %v3479_v17 = vand.u32 2147483647, %v3463_v26  ;;  %3874 = vperm.xlu0 %4895, %v8170_v42  }
 0x56f   : > { %v3389_v38 = vadd.f32 %v3373_v36, %v7981_v45  ;;  %v8141_v7 = vadd.f32 %v3479_v17, %v8012_v22  ;;  %v8151_v22 = vperm.slane %v8058_v52, 4 }
 0x571   : > { %v8144_v50 = vadd.f32 %v3486_v31, %v3389_v38 }
 0x572   : > { %v3342_v54 = vpop.permute.xlu1 %3341  ;;  %3648 = vperm.xlu2 %4889, %v7699_v29   ;;  %v3427_v10 = vpop.permute.xlu2 %3426 }
 0x573   : > { %v3360_v18 = vsub.f32 %v3342_v54, %v7904_v51  ;;  %v3466_v12 = vsub.f32 %v3427_v10, %v8061_v39  ;;  %3644 = vperm.xlu1 %4888, %v9474_v19   ;;  %v3516_v51 = vpop.permute.xlu0 %3515 }
 0x574   : > { %v3573_v23 = vsub.f32 %v3516_v51, %v8151_v22 }
 0x575   : > { %v3376_v58 = vand.u32 2147483647, %v3360_v18  ;;  %v3482_v45 = vand.u32 2147483647, %v3466_v12  ;;  %3886 = vperm.xlu0 %4895, %v7737_v35  }
 0x576   : > { %v3589_v43 = vand.u32 2147483647, %v3573_v23 }
 0x577   : > { %v3392_v47 = vadd.f32 %v3376_v58, %v8005_v63  ;;  %v8156_v29 = vadd.f32 %v3482_v45, %v8036_v28 }
 0x579   : > { %v8159_v4 = vadd.f32 %v3489_v60, %v3392_v47 }
 0x57a   : > { %3660 = vperm.xlu2 %4889, %v7737_v35   ;;  %v3439_v19 = vpop.permute.xlu2 %3438 }
 0x57b   : > { %v3469_v57 = vsub.f32 %v3439_v19, %v8061_v39  ;;  %3656 = vperm.xlu1 %4888, %v9477_v62   ;;  %v3403_v5 = vpop.permute.xlu1 %3402  ;;  %v3536_v61 = vpop.permute.xlu0 %3535 }
 0x57c   : > { %v3460_v63 = vsub.f32 %v3403_v5, %v8061_v39  ;;  %v3578_v38 = vsub.f32 %v3536_v61, %v8151_v22 }
 0x57d   : > { %v3485_v13 = vand.u32 2147483647, %v3469_v57  ;;  %3898 = vperm.xlu0 %4895, %v7779_v53  }
 0x57e   : > { %v3476_v28 = vand.u32 2147483647, %v3460_v63  ;;  %v3594_v35 = vand.u32 2147483647, %v3578_v38 }
 0x57f   : > { %v8167_v20 = vadd.f32 %v3485_v13, %v8048_v8 }
 0x580   : > { %v3492_v3 = vadd.f32 %v3476_v28, %v8034_v59 }
 0x582   : > { %v8174_v0 = vadd.f32 %v3589_v43, %v3492_v3  ;;  %3672 = vperm.xlu2 %4889, %v7779_v53   ;;  %v3451_v62 = vpop.permute.xlu2 %3450 }
 0x583   : > { %v3472_v26 = vsub.f32 %v3451_v62, %v8061_v39  ;;  %3668 = vperm.xlu1 %4888, %v8083_v44   ;;  %v3411_v36 = vpop.permute.xlu1 %3410 }
 0x584   : > { %v3462_v8 = vsub.f32 %v3411_v36, %v8061_v39 }
 0x585   : > { %v3488_v17 = vand.u32 2147483647, %v3472_v26 }
 0x586   : > { %v3478_v31 = vand.u32 2147483647, %v3462_v8 }
 0x587   : > { %v8181_v24 = vadd.f32 %v3488_v17, %v8068_v11  ;;  %v3548_v11 = vpop.permute.xlu0 %3547 }
 0x588   : > { %v3494_v59 = vadd.f32 %v3478_v31, %v8045_v15  ;;  %v3581_v47 = vsub.f32 %v3548_v11, %v8151_v22 }
 0x58a   : > { %4890 = vset.pattern.permute.xlu2 %v5167_v30 }
 0x58b   : > { %3680 = vperm.xlu1 %4888, %v8095_v56   ;;  %v3423_v49 = vpop.permute.xlu1 %3422  ;;  %3733 = vperm.xlu2 %4890, %v7828_v27   ;;  %v3512_v54 = vpop.permute.xlu2 %3511 }
 0x58c   : > { %v3465_v10 = vsub.f32 %v3423_v49, %v8061_v39  ;;  %v3572_v18 = vsub.f32 %v3512_v54, %v8151_v22 }
 0x58e   : > { %v3481_v12 = vand.u32 2147483647, %v3465_v10  ;;  %v3588_v60 = vand.u32 2147483647, %v3572_v18 }
 0x58f   : > { %v3560_v5 = vpop.permute.xlu0 %3559 }
 0x590   : > { %v3497_v15 = vadd.f32 %v3481_v12, %v8065_v21  ;;  %v8194_v58 = vadd.f32 %v3588_v60, %v8080_v46  ;;  %v3597_v46 = vand.u32 2147483647, %v3581_v47  ;;  %v5018_v47 = vld [vmem:[%s5272_s18 + $0x50] sm:$0xff] }
 0x592   : > { %v8196_v45 = vadd.f32 %v3594_v35, %v3497_v15 }
 0x593   : > { %4892 = vset.pattern.permute.xlu1 %v5167_v30  ;;  %v3435_v51 = vpop.permute.xlu1 %3434  ;;  %3745 = vperm.xlu2 %4890, %v8136_v37   ;;  %v3524_v19 = vpop.permute.xlu2 %3523  ;;  %v3584_v30 = vsub.f32 %v3560_v5, %v8151_v22  ;;  %v5019_v5 = vld [vmem:[%s5272_s18 + $0x68] sm:$0xff] }
 0x594   : > { %v3468_v23 = vsub.f32 %v3435_v51, %v8061_v39  ;;  %v3575_v57 = vsub.f32 %v3524_v19, %v8151_v22  ;;  %3741 = vperm.xlu1 %4892, %v8116_v25  }
 0x595   : > { %v3600_v36 = vand.u32 2147483647, %v3584_v30 }
 0x596   : > { %v3484_v53 = vand.u32 2147483647, %v3468_v23  ;;  %v3591_v21 = vand.u32 2147483647, %v3575_v57 }
 0x597   : > { %v3621_v31 = vpop.permute.xlu0 %3620 }
 0x598   : > { %v3500_v63 = vadd.f32 %v3484_v53, %v8077_v14  ;;  %v8205_v13 = vadd.f32 %v3591_v21, %v3494_v59  ;;  %v8215_v14 = vperm.slane %v8058_v52, 5 }
 0x59a   : > { %v8207_v28 = vadd.f32 %v3597_v46, %v3500_v63  ;;  %v3684_v38 = vsub.f32 %v3621_v31, %v8215_v14 }
 0x59b   : > { %v3447_v43 = vpop.permute.xlu1 %3446  ;;  %3753 = vperm.xlu2 %4890, %v7889_v6   ;;  %v3532_v3 = vpop.permute.xlu2 %3531 }
 0x59c   : > { %v3471_v62 = vsub.f32 %v3447_v43, %v8061_v39  ;;  %v3577_v25 = vsub.f32 %v3532_v3, %v8151_v22  ;;  %3749 = vperm.xlu1 %4892, %v8130_v48  }
 0x59e   : > { %v3487_v61 = vand.u32 2147483647, %v3471_v62  ;;  %v3593_v26 = vand.u32 2147483647, %v3577_v25 }
 0x59f   : > { %v3641_v60 = vpop.permute.xlu0 %3640 }
 0x5a0   : > { %v3503_v8 = vadd.f32 %v3487_v61, %v8090_v33  ;;  %v8219_v17 = vadd.f32 %v3593_v26, %v8110_v16  ;;  %v3700_v16 = vand.u32 2147483647, %v3684_v38  ;;  %v3689_v21 = vsub.f32 %v3641_v60, %v8215_v14 }
 0x5a2   : > { %v8221_v59 = vadd.f32 %v3600_v36, %v3503_v8 }
 0x5a3   : > { %3765 = vperm.xlu2 %4890, %v7927_v1   ;;  %v3544_v39 = vpop.permute.xlu2 %3543 }
 0x5a4   : > { %v3580_v49 = vsub.f32 %v3544_v39, %v8151_v22  ;;  %3761 = vperm.xlu1 %4892, %v8170_v42   ;;  %v3508_v54 = vpop.permute.xlu1 %3507 }
 0x5a5   : > { %v3571_v10 = vsub.f32 %v3508_v54, %v8151_v22 }
 0x5a6   : > { %v3596_v33 = vand.u32 2147483647, %v3580_v49 }
 0x5a7   : > { %v3587_v18 = vand.u32 2147483647, %v3571_v10  ;;  %v3653_v30 = vpop.permute.xlu0 %3652 }
 0x5a8   : > { %v8229_v11 = vadd.f32 %v3596_v33, %v8126_v40  ;;  %v3692_v26 = vsub.f32 %v3653_v30, %v8215_v14  ;;  %v5021_v30 = vld [vmem:[%s5272_s18 + $0x48] sm:$0xff] }
 0x5a9   : > { %v3603_v12 = vadd.f32 %v3587_v18, %v8108_v41 }
 0x5aa   : > { %v3708_v49 = vand.u32 2147483647, %v3692_v26 }
 0x5ab   : > { %v8232_v35 = vadd.f32 %v3700_v16, %v3603_v12  ;;  %3777 = vperm.xlu2 %4890, %v7959_v9   ;;  %v3556_v15 = vpop.permute.xlu2 %3555 }
 0x5ac   : > { %v3583_v42 = vsub.f32 %v3556_v15, %v8151_v22  ;;  %3773 = vperm.xlu1 %4892, %v5018_v47   ;;  %v3520_v51 = vpop.permute.xlu1 %3519 }
 0x5ad   : > { %v3574_v19 = vsub.f32 %v3520_v51, %v8151_v22 }
 0x5ae   : > { %v3599_v23 = vand.u32 2147483647, %v3583_v42 }
 0x5af   : > { %v3590_v57 = vand.u32 2147483647, %v3574_v19  ;;  %v5020_v19 = vld [vmem:[%s5272_s18 + $0x30] sm:$0xff]  ;;  %s4538_s18 = scalar_lea.sflag [#allocation5], %s277_s10 }
 0x5b0   : > { %v8239_v40 = vadd.f32 %v3599_v23, %v8144_v50  ;;  %v3705_v50 = vand.u32 2147483647, %v3689_v21 }
 0x5b1   : > { %v8242_v41 = vadd.f32 %v3590_v57, %v8124_v2 }
 0x5b3   : > { %3789 = vperm.xlu2 %4890, %v8100_v34   ;;  %v3568_v53 = vpop.permute.xlu2 %3567 }
 0x5b4   : > { %v3586_v46 = vsub.f32 %v3568_v53, %v8151_v22  ;;  %3785 = vperm.xlu1 %4892, %v5019_v5   ;;  %v3528_v63 = vpop.permute.xlu1 %3527 }
 0x5b5   : > { %v3576_v43 = vsub.f32 %v3528_v63, %v8151_v22 }
 0x5b6   : > { %v3602_v3 = vand.u32 2147483647, %v3586_v46 }
 0x5b7   : > { %v3592_v62 = vand.u32 2147483647, %v3576_v43 }
 0x5b8   : > { %v8250_v25 = vadd.f32 %v3602_v3, %v8159_v4  ;;  %v3665_v4 = vpop.permute.xlu0 %3664 }
 0x5b9   : > { %v3608_v2 = vadd.f32 %v3592_v62, %v8141_v7 }
 0x5bb   : > { %v8253_v61 = vadd.f32 %v3705_v50, %v3608_v2  ;;  %4894 = vset.pattern.permute.xlu2 %v5168_v32 }
 0x5bc   : > { %4893 = vset.pattern.permute.xlu1 %v5168_v32  ;;  %v3540_v36 = vpop.permute.xlu1 %3539  ;;  %3850 = vperm.xlu2 %4894, %v8020_v55   ;;  %v3629_v8 = vpop.permute.xlu2 %3628  ;;  %v3695_v55 = vsub.f32 %v3665_v4, %v8215_v14 }
 0x5bd   : > { %v3579_v31 = vsub.f32 %v3540_v36, %v8151_v22  ;;  %v3686_v39 = vsub.f32 %v3629_v8, %v8215_v14  ;;  %3846 = vperm.xlu1 %4893, %v7828_v27  }
 0x5be   : > { %v3711_v60 = vand.u32 2147483647, %v3695_v55 }
 0x5bf   : > { %v3595_v7 = vand.u32 2147483647, %v3579_v31  ;;  %v3702_v38 = vand.u32 2147483647, %v3686_v39  ;;  %v8308_v31 = vperm.slane %v8058_v52, 6 }
 0x5c1   : > { %v3611_v54 = vadd.f32 %v3595_v7, %v8156_v29  ;;  %v8264_v10 = vadd.f32 %v3702_v38, %v8174_v0  ;;  %v3677_v0 = vpop.permute.xlu0 %3676 }
 0x5c3   : > { %v8266_v32 = vadd.f32 %v3708_v49, %v3611_v54 }
 0x5c4   : > { %v3552_v33 = vpop.permute.xlu1 %3551  ;;  %3862 = vperm.xlu2 %4894, %v8130_v48   ;;  %v3637_v18 = vpop.permute.xlu2 %3636  ;;  %v3698_v48 = vsub.f32 %v3677_v0, %v8215_v14 }
 0x5c5   : > { %v3582_v27 = vsub.f32 %v3552_v33, %v8151_v22  ;;  %v3688_v16 = vsub.f32 %v3637_v18, %v8215_v14  ;;  %3858 = vperm.xlu1 %4893, %v8136_v37  }
 0x5c6   : > { %v3714_v21 = vand.u32 2147483647, %v3698_v48 }
 0x5c7   : > { %v3598_v12 = vand.u32 2147483647, %v3582_v27  ;;  %v3704_v29 = vand.u32 2147483647, %v3688_v16 }
 0x5c9   : > { %v3614_v15 = vadd.f32 %v3598_v12, %v8167_v20  ;;  %v8275_v42 = vadd.f32 %v3704_v29, %v8205_v13  ;;  %v8288_v5 = vpop.permute.xlu0 %3737 }
 0x5cb   : > { %v8277_v47 = vadd.f32 %v3711_v60, %v3614_v15 }
 0x5cc   : > { %v3564_v51 = vpop.permute.xlu1 %3563  ;;  %3870 = vperm.xlu2 %4894, %v5020_v19   ;;  %v3649_v23 = vpop.permute.xlu2 %3648 }
 0x5cd   : > { %v3585_v37 = vsub.f32 %v3564_v51, %v8151_v22  ;;  %v3691_v57 = vsub.f32 %v3649_v23, %v8215_v14  ;;  %3866 = vperm.xlu1 %4893, %v7889_v6  }
 0x5cf   : > { %v3601_v53 = vand.u32 2147483647, %v3585_v37  ;;  %v3707_v20 = vand.u32 2147483647, %v3691_v57 }
 0x5d1   : > { %v3617_v13 = vadd.f32 %v3601_v53, %v8181_v24  ;;  %v8286_v46 = vadd.f32 %v3707_v20, %v8196_v45  ;;  %v3758_v24 = vpop.permute.xlu0 %3757 }
 0x5d3   : > { %v8290_v63 = vadd.f32 %v3714_v21, %v3617_v13 }
 0x5d4   : > { %3882 = vperm.xlu2 %4894, %v5021_v30   ;;  %v3661_v43 = vpop.permute.xlu2 %3660 }
 0x5d5   : > { %v3694_v22 = vsub.f32 %v3661_v43, %v8215_v14  ;;  %3878 = vperm.xlu1 %4893, %v7927_v1   ;;  %v8295_v6 = vpop.permute.xlu1 %3624 }
 0x5d7   : > { %v3710_v3 = vand.u32 2147483647, %v3694_v22 }
 0x5d9   : > { %v8298_v62 = vadd.f32 %v3710_v3, %v8207_v28  ;;  %v3770_v39 = vpop.permute.xlu0 %3769 }
 0x5da   : > { %v3806_v33 = vsub.f32 %v3770_v39, %v8308_v31 }
 0x5dc   : > { %3894 = vperm.xlu2 %4894, %v8083_v44   ;;  %v3673_v45 = vpop.permute.xlu2 %3672  ;;  %v3803_v44 = vsub.f32 %v3758_v24, %v8308_v31  ;;  %v3822_v0 = vand.u32 2147483647, %v3806_v33 }
 0x5dd   : > { %v3697_v50 = vsub.f32 %v3673_v45, %v8215_v14  ;;  %3890 = vperm.xlu1 %4893, %v7959_v9   ;;  %v3633_v2 = vpop.permute.xlu1 %3632 }
 0x5de   : > { %v3687_v26 = vsub.f32 %v3633_v2, %v8215_v14  ;;  %v3819_v54 = vand.u32 2147483647, %v3803_v44 }
 0x5df   : > { %v3713_v36 = vand.u32 2147483647, %v3697_v50 }
 0x5e0   : > { %v3703_v8 = vand.u32 2147483647, %v3687_v26 }
 0x5e1   : > { %v8305_v1 = vadd.f32 %v3713_v36, %v8221_v59  ;;  %v3782_v12 = vpop.permute.xlu0 %3781  ;;  %v8343_v36 = vperm.slane %v8058_v52, 7 }
 0x5e2   : > { %v3719_v28 = vadd.f32 %v3703_v8, %v8242_v41  ;;  %v3809_v48 = vsub.f32 %v3782_v12, %v8308_v31 }
 0x5e4   : > { %3906 = vperm.xlu2 %4894, %v8095_v56   ;;  %v3825_v20 = vand.u32 2147483647, %v3809_v48 }
 0x5e5   : > { %3902 = vperm.xlu1 %4893, %v8100_v34   ;;  %v3645_v9 = vpop.permute.xlu1 %3644  ;;  %v3734_v4 = vpop.permute.xlu2 %3733 }
 0x5e6   : > { %v3690_v7 = vsub.f32 %v3645_v9, %v8215_v14  ;;  %v3797_v38 = vsub.f32 %v3734_v4, %v8308_v31 }
 0x5e8   : > { %v3706_v59 = vand.u32 2147483647, %v3690_v7  ;;  %v3813_v49 = vand.u32 2147483647, %v3797_v38  ;;  %v3958_v38 = vlaneseq }
 0x5e9   : > { %v3794_v21 = vpop.permute.xlu0 %3793 }
 0x5ea   : > { %v3722_v55 = vadd.f32 %v3706_v59, %v8219_v17  ;;  %v8318_v41 = vadd.f32 %v3813_v49, %v8232_v35  ;;  %v3812_v43 = vsub.f32 %v3794_v21, %v8308_v31 }
 0x5ec   : > { %v8320_v56 = vadd.f32 %v3819_v54, %v3722_v55  ;;  %v3828_v26 = vand.u32 2147483647, %v3812_v43  ;;  %v8358_v54 = vand.u32 127, %v3958_v38  ;;  %v3685_v55 = vsub.f32 %v8295_v6, %v8215_v14 }
 0x5ed   : > { %v3657_v18 = vpop.permute.xlu1 %3656  ;;  %v3746_v34 = vpop.permute.xlu2 %3745 }
 0x5ee   : > { %v3693_v27 = vsub.f32 %v3657_v18, %v8215_v14  ;;  %v3800_v16 = vsub.f32 %v3746_v34, %v8308_v31  ;;  %vm4008_vm1 = vcmp.lt.s32.totalorder %v8358_v54, 8  ;;  %v4075_v54 = vld [vmem:[%s8492_s7 + $0x10] sm:$0xff] }
 0x5f0   : > { %v3709_v29 = vand.u32 2147483647, %v3693_v27  ;;  %v3816_v60 = vand.u32 2147483647, %v3800_v16 }
 0x5f1   : > { %v3855_v8 = vpop.permute.xlu0 %3854 }
 0x5f2   : > { %v3725_v15 = vadd.f32 %v3709_v29, %v8229_v11  ;;  %v8326_v17 = vadd.f32 %v3816_v60, %v3719_v28  ;;  %v3912_v39 = vsub.f32 %v3855_v8, %v8343_v36  ;;  %v3701_v29 = vand.u32 2147483647, %v3685_v55 }
 0x5f4   : > { %v8328_v35 = vadd.f32 %v3822_v0, %v3725_v15  ;;  %v3928_v49 = vand.u32 2147483647, %v3912_v39  ;;  %v3717_v6 = vadd.f32 %v3701_v29, %v8194_v58 }
 0x5f5   : > { %v3669_v51 = vpop.permute.xlu1 %3668  ;;  %v3754_v19 = vpop.permute.xlu2 %3753 }
 0x5f6   : > { %v3696_v23 = vsub.f32 %v3669_v51, %v8215_v14  ;;  %v3802_v37 = vsub.f32 %v3754_v19, %v8308_v31 }
 0x5f8   : > { %v3712_v57 = vand.u32 2147483647, %v3696_v23  ;;  %v3818_v53 = vand.u32 2147483647, %v3802_v37 }
 0x5f9   : > { %v3875_v43 = vpop.permute.xlu0 %3874 }
 0x5fa   : > { %v3728_v13 = vadd.f32 %v3712_v57, %v8239_v40  ;;  %v8335_v11 = vadd.f32 %v3818_v53, %v8253_v61 }
 0x5fc   : > { %v8337_v30 = vadd.f32 %v3825_v20, %v3728_v13 }
 0x5fd   : > { %v3681_v22 = vpop.permute.xlu1 %3680  ;;  %v3766_v3 = vpop.permute.xlu2 %3765 }
 0x5fe   : > { %v3699_v24 = vsub.f32 %v3681_v22, %v8215_v14  ;;  %v3805_v45 = vsub.f32 %v3766_v3, %v8308_v31 }
 0x600   : > { %v3715_v50 = vand.u32 2147483647, %v3699_v24  ;;  %v3821_v2 = vand.u32 2147483647, %v3805_v45 }
 0x601   : > { %v3887_v55 = vpop.permute.xlu0 %3886 }
 0x602   : > { %v3731_v40 = vadd.f32 %v3715_v50, %v8250_v25  ;;  %v8347_v61 = vadd.f32 %v3821_v2, %v8266_v32 }
 0x604   : > { %v8349_v28 = vadd.f32 %v3828_v26, %v3731_v40  ;;  %v3917_v40 = vsub.f32 %v3875_v43, %v8343_v36 }
 0x605   : > { %v3778_v44 = vpop.permute.xlu2 %3777 }
 0x606   : > { %v3808_v9 = vsub.f32 %v3778_v44, %v8308_v31  ;;  %v3742_v4 = vpop.permute.xlu1 %3741  ;;  %v3933_v38 = vand.u32 2147483647, %v3917_v40 }
 0x607   : > { %v3799_v7 = vsub.f32 %v3742_v4, %v8308_v31 }
 0x608   : > { %v3824_v59 = vand.u32 2147483647, %v3808_v9 }
 0x609   : > { %v3815_v52 = vand.u32 2147483647, %v3799_v7 }
 0x60a   : > { %v8355_v25 = vadd.f32 %v3824_v59, %v8277_v47  ;;  %v3798_v47 = vsub.f32 %v8288_v5, %v8308_v31 }
 0x60b   : > { %v3831_v32 = vadd.f32 %v3815_v52, %v8264_v10 }
 0x60c   : > { %v3814_v0 = vand.u32 2147483647, %v3798_v47 }
 0x60d   : > { %v3944_v33 = vadd.f32 %v3928_v49, %v3831_v32  ;;  %v3790_v18 = vpop.permute.xlu2 %3789 }
 0x60e   : > { %v3811_v34 = vsub.f32 %v3790_v18, %v8308_v31  ;;  %v3750_v27 = vpop.permute.xlu1 %3749  ;;  %v3830_v19 = vadd.f32 %v3814_v0, %v3717_v6 }
 0x60f   : > { %vm3962_vm0 = vcmp.ge.f32.partialorder %v3944_v33, 0.0  ;;  %v3978_v16 = vmul.f32 0.01, %v3944_v33  ;;  %v3801_v21 = vsub.f32 %v3750_v27, %v8308_v31 }
 0x610   : > { %v3827_v12 = vand.u32 2147483647, %v3811_v34 }
 0x611   : > { %v3994_v10 = vsel %vm3962_vm0, %v3944_v33, %v3978_v16  ;;  %v3817_v24 = vand.u32 2147483647, %v3801_v21  ;;  %v3920_v16 = vsub.f32 %v3887_v55, %v8343_v36 }
 0x612   : > { %v8367_v60 = vadd.f32 %v3827_v12, %v8290_v63  ;;  %v8371_v14 = vsel %vm4008_vm1, %v3994_v10, -1e+30 }
 0x613   : > { %4045 = vmax.xlane.f32.xlu2 %v8371_v14  ;;  %v3833_v8 = vadd.f32 %v3817_v24, %v8275_v42 }
 0x616   : > { %v3762_v15 = vpop.permute.xlu1 %3761  ;;  %v3851_v48 = vpop.permute.xlu2 %3850 }
 0x617   : > { %v3911_v51 = vsub.f32 %v3851_v48, %v8343_v36  ;;  %v3804_v45 = vsub.f32 %v3762_v15, %v8308_v31  ;;  %v3936_v15 = vand.u32 2147483647, %v3920_v16 }
 0x619   : > { %v3927_v23 = vand.u32 2147483647, %v3911_v51  ;;  %v3820_v44 = vand.u32 2147483647, %v3804_v45 }
 0x61b   : > { %v3943_v5 = vadd.f32 %v3927_v23, %v3830_v19  ;;  %v3836_v49 = vadd.f32 %v3820_v44, %v8286_v46 }
 0x61d   : > { %vm3961_vm2 = vcmp.ge.f32.partialorder %v3943_v5, 0.0  ;;  %v3977_v37 = vmul.f32 0.01, %v3943_v5  ;;  %v3949_v12 = vadd.f32 %v3933_v38, %v3836_v49 }
 0x61e   : > { %v3774_v63 = vpop.permute.xlu1 %3773  ;;  %v3863_v20 = vpop.permute.xlu2 %3862 }
 0x61f   : > { %v3993_v57 = vsel %vm3961_vm2, %v3943_v5, %v3977_v37  ;;  %v3914_v22 = vsub.f32 %v3863_v20, %v8343_v36  ;;  %v3807_v32 = vsub.f32 %v3774_v63, %v8308_v31  ;;  %v3983_v5 = vmul.f32 0.01, %v3949_v12 }
 0x620   : > { %v8378_v53 = vsel %vm4008_vm1, %v3993_v57, -1e+30  ;;  %vm3967_vm6 = vcmp.ge.f32.partialorder %v3949_v12, 0.0 }
 0x621   : > { %4043 = vmax.xlane.f32.xlu1 %v8378_v53  ;;  %v3930_v2 = vand.u32 2147483647, %v3914_v22  ;;  %v3823_v46 = vand.u32 2147483647, %v3807_v32 }
 0x623   : > { %v3946_v9 = vadd.f32 %v3930_v2, %v3833_v8  ;;  %v3839_v51 = vadd.f32 %v3823_v46, %v8298_v62 }
 0x625   : > { %v3980_v27 = vmul.f32 0.01, %v3946_v9  ;;  %vm3964_vm4 = vcmp.ge.f32.partialorder %v3946_v9, 0.0  ;;  %v3952_v21 = vadd.f32 %v3936_v15, %v3839_v51 }
 0x626   : > { %v8381_v58 = vpop.permute.xlu1 %3785  ;;  %v3871_v13 = vpop.permute.xlu2 %3870 }
 0x627   : > { %v3916_v4 = vsub.f32 %v3871_v13, %v8343_v36  ;;  %v3996_v6 = vsel %vm3964_vm4, %v3946_v9, %v3980_v27  ;;  %v3810_v20 = vsub.f32 %v8381_v58, %v8308_v31  ;;  %v3899_v13 = vpop.permute.xlu0 %3898  ;;  %vm3970_vm10 = vcmp.ge.f32.partialorder %v3952_v21, 0.0 }
 0x629   : > { %v3826_v2 = vand.u32 2147483647, %v3810_v20 }
 0x62e   : > { %v3883_v59 = vpop.permute.xlu2 %3882 }
 0x62f   : > { %v3847_v3 = vpop.permute.xlu1 %3846  ;;  %v3919_v47 = vsub.f32 %v3883_v59, %v8343_v36 }
 0x630   : > { %v3910_v50 = vsub.f32 %v3847_v3, %v8343_v36  ;;  %v3999_v3 = vsel %vm3967_vm6, %v3949_v12, %v3983_v5 }
 0x631   : > { %v3935_v37 = vand.u32 2147483647, %v3919_v47  ;;  %v8424_v58 = vsel %vm4008_vm1, %v3999_v3, -1e+30 }
 0x632   : > { %v3926_v26 = vand.u32 2147483647, %v3910_v50 }
 0x633   : > { %v3951_v22 = vadd.f32 %v3935_v37, %v8328_v35 }
 0x634   : > { %v3942_v39 = vadd.f32 %v3926_v26, %v8318_v41  ;;  %v3932_v41 = vand.u32 2147483647, %v3916_v4  ;;  %v3923_v26 = vsub.f32 %v3899_v13, %v8343_v36 }
 0x635   : > { %vm3969_vm9 = vcmp.ge.f32.partialorder %v3951_v22, 0.0 }
 0x636   : > { %vm3960_vm3 = vcmp.ge.f32.partialorder %v3942_v39, 0.0  ;;  %v3976_v7 = vmul.f32 0.01, %v3942_v39  ;;  %v3948_v10 = vadd.f32 %v3932_v41, %v8320_v56  ;;  %v3895_v63 = vpop.permute.xlu2 %3894  ;;  %v3939_v38 = vand.u32 2147483647, %v3923_v26 }
 0x637   : > { %v3859_v52 = vpop.permute.xlu1 %3858  ;;  %v3922_v24 = vsub.f32 %v3895_v63, %v8343_v36 }
 0x638   : > { %v3913_v33 = vsub.f32 %v3859_v52, %v8343_v36  ;;  %v3992_v18 = vsel %vm3960_vm3, %v3942_v39, %v3976_v7  ;;  %v3982_v62 = vmul.f32 0.01, %v3948_v10  ;;  %vm3966_vm7 = vcmp.ge.f32.partialorder %v3948_v10, 0.0 }
 0x639   : > { %v8396_v42 = vsel %vm4008_vm1, %v3992_v18, -1e+30  ;;  %v3985_v39 = vmul.f32 0.01, %v3951_v22  ;;  %v3938_v9 = vand.u32 2147483647, %v3922_v24  ;;  %v3842_v7 = vadd.f32 %v3826_v2, %v8305_v1 }
 0x63a   : > { %v3929_v34 = vand.u32 2147483647, %v3913_v33  ;;  %4041 = vmax.xlane.f32.xlu0 %v8396_v42  ;;  %v3998_v50 = vsel %vm3966_vm7, %v3948_v10, %v3982_v62  ;;  %v4074_v2 = vld [vmem:[%s8492_s7 + $0x8] sm:$0xff] }
 0x63b   : > { %v8432_v44 = vsel %vm4008_vm1, %v3998_v50, -1e+30  ;;  %v4001_v49 = vsel %vm3969_vm9, %v3951_v22, %v3985_v39  ;;  %v3954_v55 = vadd.f32 %v3938_v9, %v8337_v30  ;;  %v3955_v41 = vadd.f32 %v3939_v38, %v3842_v7  ;;  %v4073_v7 = vld [vmem:[%s8492_s7] sm:$0xff] }
 0x63c   : > { %v3945_v29 = vadd.f32 %v3929_v34, %v8326_v17  ;;  %v8407_v17 = vsel %vm4008_vm1, %v3996_v6, -1e+30 }
 0x63d   : > { %vm3972_vm12 = vcmp.ge.f32.partialorder %v3954_v55, 0.0  ;;  %v3989_v47 = vmul.f32 0.01, %v3955_v41  ;;  %vm3973_vm13 = vcmp.ge.f32.partialorder %v3955_v41, 0.0 }
 0x63e   : > { %vm3963_vm5 = vcmp.ge.f32.partialorder %v3945_v29, 0.0  ;;  %v3979_v0 = vmul.f32 0.01, %v3945_v29  ;;  %v3907_v59 = vpop.permute.xlu2 %3906 }
 0x63f   : > { %v3867_v48 = vpop.permute.xlu1 %3866  ;;  %v3925_v33 = vsub.f32 %v3907_v59, %v8343_v36  ;;  %v4005_v51 = vsel %vm3973_vm13, %v3955_v41, %v3989_v47  ;;  %v4077_v41 = vld [vmem:[%s8492_s7 + $0x20] sm:$0xff] }
 0x640   : > { %v3915_v19 = vsub.f32 %v3867_v48, %v8343_v36  ;;  %v3995_v23 = vsel %vm3963_vm5, %v3945_v29, %v3979_v0  ;;  %v3988_v29 = vmul.f32 0.01, %v3954_v55 }
 0x641   : > { %v8411_v56 = vsel %vm4008_vm1, %v3995_v23, -1e+30  ;;  %v3941_v12 = vand.u32 2147483647, %v3925_v33 }
 0x642   : > { %v3931_v57 = vand.u32 2147483647, %v3915_v19  ;;  %4049 = vmax.xlane.f32.xlu0 %v8407_v17  ;;  %4047 = vmax.xlane.f32.xlu2 %v8411_v56  ;;  %v4004_v15 = vsel %vm3972_vm12, %v3954_v55, %v3988_v29 }
 0x643   : > { %v3957_v6 = vadd.f32 %v3941_v12, %v8349_v28  ;;  %v8466_v37 = vsel %vm4008_vm1, %v4004_v15, -1e+30  ;;  %v8472_v28 = vsel %vm4008_vm1, %v4005_v51, -1e+30 }
 0x644   : > { %v3947_v43 = vadd.f32 %v3931_v57, %v8335_v11  ;;  %v3986_v11 = vmul.f32 0.01, %v3952_v21 }
 0x645   : > { %v3991_v63 = vmul.f32 0.01, %v3957_v6  ;;  %vm3975_vm15 = vcmp.ge.f32.partialorder %v3957_v6, 0.0 }
 0x646   : > { %vm3965_vm8 = vcmp.ge.f32.partialorder %v3947_v43, 0.0  ;;  %v3981_v45 = vmul.f32 0.01, %v3947_v43  ;;  %v4002_v32 = vsel %vm3970_vm10, %v3952_v21, %v3986_v11 }
 0x647   : > { %v3879_v40 = vpop.permute.xlu1 %3878  ;;  %v8452_v30 = vsel %vm4008_vm1, %v4002_v32, -1e+30  ;;  %v4007_v62 = vsel %vm3975_vm15, %v3957_v6, %v3991_v63 }
 0x648   : > { %v3918_v8 = vsub.f32 %v3879_v40, %v8343_v36  ;;  %v3997_v31 = vsel %vm3965_vm8, %v3947_v43, %v3981_v45  ;;  %v8482_v13 = vsel %vm4008_vm1, %v4007_v62, -1e+30 }
 0x649   : > { %v8428_v35 = vsel %vm4008_vm1, %v3997_v31, -1e+30 }
 0x64a   : > { %v3934_v4 = vand.u32 2147483647, %v3918_v8  ;;  %4051 = vmax.xlane.f32.xlu1 %v8428_v35  ;;  %4053 = vmax.xlane.f32.xlu2 %v8432_v44 }
 0x64b   : > { %4055 = vmax.xlane.f32.xlu0 %v8424_v58 }
 0x64c   : > { %v3950_v52 = vadd.f32 %v3934_v4, %v8347_v61  ;;  %v8448_v61 = vsel %vm4008_vm1, %v4001_v49, -1e+30 }
 0x64e   : > { %vm3968_vm11 = vcmp.ge.f32.partialorder %v3950_v52, 0.0  ;;  %v3984_v18 = vmul.f32 0.01, %v3950_v52 }
 0x64f   : > { %v3891_v34 = vpop.permute.xlu1 %3890 }
 0x650   : > { %v3921_v27 = vsub.f32 %v3891_v34, %v8343_v36  ;;  %v4000_v16 = vsel %vm3968_vm11, %v3950_v52, %v3984_v18  ;;  %v4076_v18 = vld [vmem:[%s8492_s7 + $0x18] sm:$0xff] }
 0x651   : > { %v8444_v1 = vsel %vm4008_vm1, %v4000_v16, -1e+30 }
 0x652   : > { %v3937_v46 = vand.u32 2147483647, %v3921_v27  ;;  %4057 = vmax.xlane.f32.xlu1 %v8444_v1  ;;  %4059 = vmax.xlane.f32.xlu2 %v8448_v61 }
 0x653   : > { %4061 = vmax.xlane.f32.xlu0 %v8452_v30 }
 0x654   : > { %v3953_v10 = vadd.f32 %v3937_v46, %v8355_v25 }
 0x656   : > { %vm3971_vm14 = vcmp.ge.f32.partialorder %v3953_v10, 0.0  ;;  %v3987_v0 = vmul.f32 0.01, %v3953_v10 }
 0x657   : > { %v3903_v48 = vpop.permute.xlu1 %3902 }
 0x658   : > { %v3924_v19 = vsub.f32 %v3903_v48, %v8343_v36  ;;  %v4003_v23 = vsel %vm3971_vm14, %v3953_v10, %v3987_v0  ;;  %v4078_v0 = vld [vmem:[%s8492_s7 + $0x28] sm:$0xff]  ;;  %v4079_v48 = vld [vmem:[%s8492_s7 + $0x30] sm:$0xff] }
 0x659   : > { %v8462_v5 = vsel %vm4008_vm1, %v4003_v23, -1e+30 }
 0x65a   : > { %v3940_v25 = vand.u32 2147483647, %v3924_v19  ;;  %4063 = vmax.xlane.f32.xlu1 %v8462_v5  ;;  %4065 = vmax.xlane.f32.xlu2 %v8466_v37 }
 0x65b   : > { %4067 = vmax.xlane.f32.xlu0 %v8472_v28 }
 0x65c   : > { %v3956_v36 = vadd.f32 %v3940_v25, %v8367_v60  ;;  %v4080_v25 = vld [vmem:[%s8492_s7 + $0x38] sm:$0xff] }
 0x65e   : > { %vm3974_vm0 = vcmp.ge.f32.partialorder %v3956_v36, 0.0  ;;  %v3990_v57 = vmul.f32 0.01, %v3956_v36 }
 0x660   : > { %v4006_v20 = vsel %vm3974_vm0, %v3956_v36, %v3990_v57 }
 0x661   : > { %v8478_v21 = vsel %vm4008_vm1, %v4006_v20, -1e+30 }
 0x662   : > { %4069 = vmax.xlane.f32.xlu1 %v8478_v21  ;;  %4071 = vmax.xlane.f32.xlu2 %v8482_v13 }
 0x686   : > { %v4046_v43 = vpop.xlane.xlu2 %4045 }
 0x687   : > { %v4107_v22 = vsub.f32 %v8371_v14, %v4046_v43 }
 0x689   : > { %v4125_v60 = vmul.f32 1.442695, %v4107_v22 }
 0x68b   : > { %4896 = vpow2.f32 %v4125_v60 }
 0x691   : > { %v4897_v3 = vpop.eup %4896 }
 0x692   : > { %v8495_v24 = vmul.f32 %v4897_v3, %v4075_v54  ;;  %v4081_v54 = vld [vmem:[%s8492_s7 + $0x40] sm:$0xff] }
 0x694   : > { %4189 = vadd.xlane.f32.xlu2 %v8495_v24  ;;  %v4044_v45 = vpop.xlane.xlu1 %4043 }
 0x695   : > { %v4106_v14 = vsub.f32 %v8378_v53, %v4044_v45  ;;  %v4082_v45 = vld [vmem:[%s8492_s7 + $0x48] sm:$0xff] }
 0x697   : > { %v4123_v50 = vmul.f32 1.442695, %v4106_v14 }
 0x699   : > { %4898 = vpow2.f32 %v4123_v50 }
 0x69f   : > { %v4899_v26 = vpop.eup %4898 }
 0x6a0   : > { %v8500_v40 = vmul.f32 %v4899_v26, %v4074_v2  ;;  %v4083_v26 = vld [vmem:[%s8492_s7 + $0x50] sm:$0xff] }
 0x6a2   : > { %4187 = vadd.xlane.f32.xlu1 %v8500_v40 }
 0x6ad   : > { %v4042_v8 = vpop.xlane.xlu0 %4041 }
 0x6ae   : > { %v4105_v31 = vsub.f32 %v8396_v42, %v4042_v8 }
 0x6b0   : > { %v4121_v11 = vmul.f32 1.442695, %v4105_v31 }
 0x6b2   : > { %4900 = vpow2.f32 %v4121_v11 }
 0x6b5   : > { %v4048_v39 = vpop.xlane.xlu2 %4047  ;;  %v4050_v9 = vpop.xlane.xlu0 %4049 }
 0x6b6   : > { %v4108_v4 = vsub.f32 %v8411_v56, %v4048_v39  ;;  %v4109_v53 = vsub.f32 %v8407_v17, %v4050_v9 }
 0x6b8   : > { %v4901_v38 = vpop.eup %4900  ;;  %v4127_v59 = vmul.f32 1.442695, %v4108_v4  ;;  %v4129_v52 = vmul.f32 1.442695, %v4109_v53 }
 0x6b9   : > { %v8507_v49 = vmul.f32 %v4901_v38, %v4073_v7  ;;  %v4084_v7 = vld [vmem:[%s8492_s7 + $0x58] sm:$0xff]  ;;  %v4085_v38 = vld [vmem:[%s8492_s7 + $0x60] sm:$0xff] }
 0x6ba   : > { %4902 = vpow2.f32 %v4127_v59 }
 0x6bb   : > { %4904 = vpow2.f32 %v4129_v52  ;;  %4185 = vadd.xlane.f32.xlu0 %v8507_v49 }
 0x6bd   : > { %v4052_v42 = vpop.xlane.xlu1 %4051  ;;  %v4054_v32 = vpop.xlane.xlu2 %4053 }
 0x6be   : > { %v4110_v55 = vsub.f32 %v8428_v35, %v4052_v42  ;;  %v4111_v33 = vsub.f32 %v8432_v44, %v4054_v32  ;;  %v4056_v56 = vpop.xlane.xlu0 %4055  ;;  %v4086_v32 = vld [vmem:[%s8492_s7 + $0x68] sm:$0xff] }
 0x6bf   : > { %v4112_v17 = vsub.f32 %v8424_v58, %v4056_v56 }
 0x6c0   : > { %v4903_v34 = vpop.eup %4902  ;;  %v4131_v27 = vmul.f32 1.442695, %v4110_v55  ;;  %v4133_v16 = vmul.f32 1.442695, %v4111_v33 }
 0x6c1   : > { %v4905_v12 = vpop.eup %4904  ;;  %v4135_v46 = vmul.f32 1.442695, %v4112_v17  ;;  %v8515_v29 = vmul.f32 %v4903_v34, %v4076_v18  ;;  %v4088_v17 = vld [vmem:[%s8492_s7 + $0x78] sm:$0xff] }
 0x6c2   : > { %4906 = vpow2.f32 %v4131_v27  ;;  %v8517_v47 = vmul.f32 %v4905_v12, %v4077_v41 }
 0x6c3   : > { %4908 = vpow2.f32 %v4133_v16  ;;  %4191 = vadd.xlane.f32.xlu0 %v8515_v29 }
 0x6c4   : > { %4910 = vpow2.f32 %v4135_v46  ;;  %4193 = vadd.xlane.f32.xlu1 %v8517_v47 }
 0x6c5   : > { %v4058_v58 = vpop.xlane.xlu1 %4057  ;;  %v4060_v35 = vpop.xlane.xlu2 %4059 }
 0x6c6   : > { %v4113_v44 = vsub.f32 %v8444_v1, %v4058_v58  ;;  %v4114_v10 = vsub.f32 %v8448_v61, %v4060_v35  ;;  %v4062_v6 = vpop.xlane.xlu0 %4061 }
 0x6c7   : > { %v4115_v15 = vsub.f32 %v8452_v30, %v4062_v6 }
 0x6c8   : > { %v4907_v51 = vpop.eup %4906  ;;  %v4137_v19 = vmul.f32 1.442695, %v4113_v44  ;;  %v4139_v23 = vmul.f32 1.442695, %v4114_v10 }
 0x6c9   : > { %v4909_v63 = vpop.eup %4908  ;;  %v4141_v36 = vmul.f32 1.442695, %v4115_v15  ;;  %v8527_v57 = vmul.f32 %v4907_v51, %v4078_v0 }
 0x6ca   : > { %v4911_v62 = vpop.eup %4910  ;;  %4912 = vpow2.f32 %v4137_v19  ;;  %v8529_v1 = vmul.f32 %v4909_v63, %v4079_v48 }
 0x6cb   : > { %4914 = vpow2.f32 %v4139_v23  ;;  %4195 = vadd.xlane.f32.xlu2 %v8527_v57  ;;  %v8532_v61 = vmul.f32 %v4911_v62, %v4080_v25 }
 0x6cc   : > { %4916 = vpow2.f32 %v4141_v36  ;;  %4197 = vadd.xlane.f32.xlu0 %v8529_v1 }
 0x6cd   : > { %4199 = vadd.xlane.f32.xlu1 %v8532_v61  ;;  %v4064_v30 = vpop.xlane.xlu1 %4063  ;;  %v4066_v20 = vpop.xlane.xlu2 %4065 }
 0x6ce   : > { %v4116_v43 = vsub.f32 %v8462_v5, %v4064_v30  ;;  %v4117_v22 = vsub.f32 %v8466_v37, %v4066_v20  ;;  %v4068_v60 = vpop.xlane.xlu0 %4067 }
 0x6cf   : > { %v4118_v3 = vsub.f32 %v8472_v28, %v4068_v60 }
 0x6d0   : > { %v4913_v14 = vpop.eup %4912  ;;  %v4143_v50 = vmul.f32 1.442695, %v4116_v43  ;;  %v4145_v2 = vmul.f32 1.442695, %v4117_v22 }
 0x6d1   : > { %v4915_v8 = vpop.eup %4914  ;;  %v4147_v31 = vmul.f32 1.442695, %v4118_v3  ;;  %v8542_v11 = vmul.f32 %v4913_v14, %v4081_v54 }
 0x6d2   : > { %v4917_v39 = vpop.eup %4916  ;;  %4918 = vpow2.f32 %v4143_v50  ;;  %v8544_v5 = vmul.f32 %v4915_v8, %v4082_v45 }
 0x6d3   : > { %4920 = vpow2.f32 %v4145_v2  ;;  %4201 = vadd.xlane.f32.xlu2 %v8542_v11  ;;  %v8547_v37 = vmul.f32 %v4917_v39, %v4083_v26 }
 0x6d4   : > { %4922 = vpow2.f32 %v4147_v31  ;;  %4203 = vadd.xlane.f32.xlu0 %v8544_v5 }
 0x6d5   : > { %4205 = vadd.xlane.f32.xlu1 %v8547_v37  ;;  %v4070_v28 = vpop.xlane.xlu1 %4069  ;;  %v4072_v9 = vpop.xlane.xlu2 %4071 }
 0x6d6   : > { %v4119_v4 = vsub.f32 %v8478_v21, %v4070_v28  ;;  %v4120_v53 = vsub.f32 %v8482_v13, %v4072_v9  ;;  %v4087_v13 = vld [vmem:[%s8492_s7 + $0x70] sm:$0xff] }
 0x6d8   : > { %v4919_v59 = vpop.eup %4918  ;;  %v4149_v52 = vmul.f32 1.442695, %v4119_v4  ;;  %v4151_v42 = vmul.f32 1.442695, %v4120_v53 }
 0x6d9   : > { %v4921_v55 = vpop.eup %4920  ;;  %v8556_v33 = vmul.f32 %v4919_v59, %v4084_v7 }
 0x6da   : > { %v4923_v56 = vpop.eup %4922  ;;  %4924 = vpow2.f32 %v4149_v52  ;;  %v8558_v18 = vmul.f32 %v4921_v55, %v4085_v38 }
 0x6db   : > { %4926 = vpow2.f32 %v4151_v42  ;;  %4207 = vadd.xlane.f32.xlu2 %v8556_v33  ;;  %v8561_v21 = vmul.f32 %v4923_v56, %v4086_v32 }
 0x6dc   : > { %4209 = vadd.xlane.f32.xlu0 %v8558_v18 }
 0x6dd   : > { %4211 = vadd.xlane.f32.xlu1 %v8561_v21 }
 0x6e0   : > { %v4925_v41 = vpop.eup %4924 }
 0x6e1   : > { %v4927_v34 = vpop.eup %4926  ;;  %v8567_v27 = vmul.f32 %v4925_v41, %v4087_v13 }
 0x6e2   : > { %v8569_v16 = vmul.f32 %v4927_v34, %v4088_v17 }
 0x6e3   : > { %4213 = vadd.xlane.f32.xlu2 %v8567_v27 }
 0x6e4   : > { %4215 = vadd.xlane.f32.xlu0 %v8569_v16 }
 0x707   : > { %v4190_v12 = vpop.xlane.xlu2 %4189 }
 0x708   : > { %v4235_v46 = vmax.f32 %v4190_v12, 1e-30 }
 0x70a   : > { %4928 = vrcp.f32 %v4235_v46  ;;  %v4288_v10 = vand.u32 2147483648, %v4235_v46  ;;  %v4286_v0 = vand.u32 2147483647, %v4235_v46  ;;  %vm4282_vm2 = vweird.f32 %v4235_v46 }
 0x70c   : > { %v4289_v19 = vor.u32 1.1754944e-38, %v4288_v10  ;;  %vm4287_vm4 = vcmp.eq.f32.partialorder %v4286_v0, 8.507059e+37 }
 0x710   : > { %v4929_v58 = vpop.eup %4928 }
 0x711   : > { %v4278_v35 = vmul.f32 %v4929_v58, %v4235_v46  ;;  %vm4283_vm1 = vweird.f32 %v4929_v58 }
 0x712   : > { %vm4284_vm3 = vmor %vm4282_vm2, %vm4283_vm1 }
 0x713   : > { %v4279_v44 = vsub.f32 1.0, %v4278_v35 }
 0x715   : > { %v4280_v6 = vmul.f32 %v4929_v58, %v4279_v44  ;;  %v4188_v15 = vpop.xlane.xlu1 %4187 }
 0x716   : > { %v4234_v48 = vmax.f32 %v4188_v15, 1e-30 }
 0x717   : > { %v4281_v51 = vadd.f32 %v4929_v58, %v4280_v6 }
 0x718   : > { %4930 = vrcp.f32 %v4234_v48  ;;  %v4274_v43 = vand.u32 2147483648, %v4234_v48  ;;  %v4272_v60 = vand.u32 2147483647, %v4234_v48  ;;  %vm4268_vm6 = vweird.f32 %v4234_v48 }
 0x719   : > { %v4285_v23 = vsel %vm4284_vm3, %v4929_v58, %v4281_v51 }
 0x71a   : > { %v4290_v25 = vsel %vm4287_vm4, %v4289_v19, %v4285_v23  ;;  %v4275_v3 = vor.u32 1.1754944e-38, %v4274_v43  ;;  %vm4273_vm8 = vcmp.eq.f32.partialorder %v4272_v60, 8.507059e+37 }
 0x71b   : > { %v4491_v63 = vmul.f32 %v4290_v25, %v8495_v24 }
 0x71d   : > { %v4507_v36 = vadd.f32 1e-10, %v4491_v63 }
 0x71e   : > { %v4931_v62 = vpop.eup %4930 }
 0x71f   : > { %4523 = vst [vmem:[%s8577_s12 + $0x10] sm:$0xff] %v4507_v36  ;;  %v4264_v30 = vmul.f32 %v4931_v62, %v4234_v48  ;;  %vm4269_vm5 = vweird.f32 %v4931_v62 }
 0x720   : > { %vm4270_vm7 = vmor %vm4268_vm6, %vm4269_vm5 }
 0x721   : > { %v4265_v20 = vsub.f32 1.0, %v4264_v30 }
 0x723   : > { %v4266_v22 = vmul.f32 %v4931_v62, %v4265_v20 }
 0x725   : > { %v4267_v54 = vadd.f32 %v4931_v62, %v4266_v22 }
 0x727   : > { %v4271_v45 = vsel %vm4270_vm7, %v4931_v62, %v4267_v54 }
 0x728   : > { %v4276_v24 = vsel %vm4273_vm8, %v4275_v3, %v4271_v45 }
 0x729   : > { %v4490_v14 = vmul.f32 %v4276_v24, %v8500_v40 }
 0x72b   : > { %v4506_v50 = vadd.f32 1e-10, %v4490_v14 }
 0x72d   : > { %4522 = vst [vmem:[%s8577_s12 + $0x8] sm:$0xff] %v4506_v50 }
 0x72e   : > { %v4186_v2 = vpop.xlane.xlu0 %4185 }
 0x72f   : > { %v4233_v26 = vmax.f32 %v4186_v2, 1e-30 }
 0x731   : > { %4932 = vrcp.f32 %v4233_v26  ;;  %v4260_v7 = vand.u32 2147483648, %v4233_v26  ;;  %v4258_v59 = vand.u32 2147483647, %v4233_v26  ;;  %vm4254_vm10 = vweird.f32 %v4233_v26 }
 0x733   : > { %v4261_v32 = vor.u32 1.1754944e-38, %v4260_v7  ;;  %vm4259_vm12 = vcmp.eq.f32.partialorder %v4258_v59, 8.507059e+37 }
 0x736   : > { %v4192_v8 = vpop.xlane.xlu0 %4191 }
 0x737   : > { %v4933_v31 = vpop.eup %4932  ;;  %v4194_v39 = vpop.xlane.xlu1 %4193  ;;  %v4236_v28 = vmax.f32 %v4192_v8, 1e-30 }
 0x738   : > { %v4250_v9 = vmul.f32 %v4933_v31, %v4233_v26  ;;  %v4237_v4 = vmax.f32 %v4194_v39, 1e-30  ;;  %vm4255_vm9 = vweird.f32 %v4933_v31 }
 0x739   : > { %4934 = vrcp.f32 %v4236_v28  ;;  %vm4256_vm11 = vmor %vm4254_vm10, %vm4255_vm9  ;;  %vm4296_vm13 = vweird.f32 %v4236_v28  ;;  %v4300_v10 = vand.u32 2147483647, %v4236_v28  ;;  %v4302_v6 = vand.u32 2147483648, %v4236_v28 }
 0x73a   : > { %v4251_v53 = vsub.f32 1.0, %v4250_v9  ;;  %4936 = vrcp.f32 %v4237_v4  ;;  %v4314_v15 = vand.u32 2147483647, %v4237_v4  ;;  %v4316_v19 = vand.u32 2147483648, %v4237_v4 }
 0x73b   : > { %vm4310_vm0 = vweird.f32 %v4237_v4  ;;  %vm8594_vm1 = vcmp.eq.f32.partialorder %v4300_v10, 8.507059e+37  ;;  %v4303_v62 = vor.u32 1.1754944e-38, %v4302_v6 }
 0x73c   : > { %v4252_v38 = vmul.f32 %v4933_v31, %v4251_v53  ;;  %vm4315_vm2 = vcmp.eq.f32.partialorder %v4314_v15, 8.507059e+37  ;;  %v4317_v54 = vor.u32 1.1754944e-38, %v4316_v19 }
 0x73e   : > { %v4253_v52 = vadd.f32 %v4933_v31, %v4252_v38  ;;  %v4196_v40 = vpop.xlane.xlu2 %4195 }
 0x73f   : > { %v4935_v42 = vpop.eup %4934  ;;  %v8582_v55 = vmax.f32 %v4196_v40, 1e-30  ;;  %v4198_v56 = vpop.xlane.xlu0 %4197 }
 0x740   : > { %v4937_v13 = vpop.eup %4936  ;;  %v4257_v17 = vsel %vm4256_vm11, %v4933_v31, %v4253_v52  ;;  %v4292_v41 = vmul.f32 %v4935_v42, %v4236_v28  ;;  %v4200_v34 = vpop.xlane.xlu1 %4199  ;;  %v8584_v12 = vmax.f32 %v4198_v56, 1e-30  ;;  %vm4297_vm14 = vweird.f32 %v4935_v42 }
 0x741   : > { %v4262_v46 = vsel %vm4259_vm12, %v4261_v32, %v4257_v17  ;;  %v4306_v58 = vmul.f32 %v4937_v13, %v4237_v4  ;;  %4938 = vrcp.f32 %v8582_v55  ;;  %v8588_v48 = vmax.f32 %v4200_v34, 1e-30  ;;  %vm4298_vm3 = vmor %vm4296_vm13, %vm4297_vm14 }
 0x742   : > { %v4489_v35 = vmul.f32 %v4262_v46, %v8507_v49  ;;  %v4293_v44 = vsub.f32 1.0, %v4292_v41  ;;  %4940 = vrcp.f32 %v8584_v12  ;;  %vm4311_vm15 = vweird.f32 %v4937_v13 }
 0x743   : > { %v4307_v0 = vsub.f32 1.0, %v4306_v58  ;;  %v4328_v63 = vand.u32 2147483647, %v8582_v55  ;;  %4942 = vrcp.f32 %v8588_v48  ;;  %v4330_v22 = vand.u32 2147483648, %v8582_v55  ;;  %vm4312_vm4 = vmor %vm4310_vm0, %vm4311_vm15 }
 0x744   : > { %v4505_v51 = vadd.f32 1e-10, %v4489_v35  ;;  %v4294_v23 = vmul.f32 %v4935_v42, %v4293_v44  ;;  %vm4324_vm5 = vweird.f32 %v8582_v55  ;;  %vm4338_vm7 = vweird.f32 %v8584_v12 }
 0x745   : > { %v4308_v25 = vmul.f32 %v4937_v13, %v4307_v0  ;;  %vm8607_vm6 = vcmp.eq.f32.partialorder %v4328_v63, 8.507059e+37  ;;  %v4331_v4 = vor.u32 1.1754944e-38, %v4330_v22  ;;  %vm4352_vm8 = vweird.f32 %v8588_v48 }
 0x746   : > { %4521 = vst [vmem:[%s8577_s12] sm:$0xff] %v4505_v51  ;;  %v4295_v49 = vadd.f32 %v4935_v42, %v4294_v23  ;;  %v4202_v30 = vpop.xlane.xlu2 %4201  ;;  %v4356_v40 = vand.u32 2147483647, %v8588_v48  ;;  %v4342_v34 = vand.u32 2147483647, %v8584_v12 }
 0x747   : > { %v4939_v20 = vpop.eup %4938  ;;  %v4309_v43 = vadd.f32 %v4937_v13, %v4308_v25  ;;  %v8600_v60 = vmax.f32 %v4202_v30, 1e-30 }
 0x748   : > { %v4299_v3 = vsel %vm4298_vm3, %v4935_v42, %v4295_v49  ;;  %v4320_v45 = vmul.f32 %v4939_v20, %v8582_v55  ;;  %v4941_v24 = vpop.eup %4940  ;;  %v4206_v53 = vpop.xlane.xlu1 %4205  ;;  %vm4325_vm9 = vweird.f32 %v4939_v20  ;;  %v4358_v42 = vand.u32 2147483648, %v8588_v48 }
 0x749   : > { %v4313_v14 = vsel %vm4312_vm4, %v4937_v13, %v4309_v43  ;;  %v4304_v50 = vsel %vm8594_vm1, %v4303_v62, %v4299_v3  ;;  %v4334_v39 = vmul.f32 %v4941_v24, %v8584_v12  ;;  %v4943_v28 = vpop.eup %4942  ;;  %4944 = vrcp.f32 %v8600_v60  ;;  %vm4326_vm10 = vmor %vm4324_vm5, %vm4325_vm9 }
 0x74a   : > { %v4318_v26 = vsel %vm4315_vm2, %v4317_v54, %v4313_v14  ;;  %v4492_v8 = vmul.f32 %v4304_v50, %v8515_v29  ;;  %v4321_v31 = vsub.f32 1.0, %v4320_v45  ;;  %v4348_v59 = vmul.f32 %v4943_v28, %v8588_v48  ;;  %v4204_v29 = vpop.xlane.xlu0 %4203 }
 0x74b   : > { %v4493_v9 = vmul.f32 %v4318_v26, %v8517_v47  ;;  %v4335_v32 = vsub.f32 1.0, %v4334_v39  ;;  %v4344_v13 = vand.u32 2147483648, %v8584_v12  ;;  %v8622_v17 = vmax.f32 %v4206_v53, 1e-30 }
 0x74c   : > { %v4508_v7 = vadd.f32 1e-10, %v4492_v8  ;;  %v4322_v38 = vmul.f32 %v4939_v20, %v4321_v31  ;;  %v4349_v56 = vsub.f32 1.0, %v4348_v59  ;;  %vm4339_vm11 = vweird.f32 %v4941_v24 }
 0x74d   : > { %v4509_v52 = vadd.f32 1e-10, %v4493_v9  ;;  %v4336_v41 = vmul.f32 %v4941_v24, %v4335_v32  ;;  %v8628_v46 = vmax.f32 %v4204_v29, 1e-30  ;;  %vm4353_vm12 = vweird.f32 %v4943_v28  ;;  %vm4340_vm14 = vmor %vm4338_vm7, %vm4339_vm11 }
 0x74e   : > { %4524 = vst [vmem:[%s8577_s12 + $0x18] sm:$0xff] %v4508_v7  ;;  %v4323_v47 = vadd.f32 %v4939_v20, %v4322_v38  ;;  %v4350_v35 = vmul.f32 %v4943_v28, %v4349_v56  ;;  %4946 = vrcp.f32 %v8622_v17  ;;  %v4208_v44 = vpop.xlane.xlu2 %4207  ;;  %vm8633_vm13 = vcmp.eq.f32.partialorder %v4356_v40, 8.507059e+37  ;;  %vm4354_vm15 = vmor %vm4352_vm8, %vm4353_vm12 }
 0x74f   : > { %4525 = vst [vmem:[%s8577_s12 + $0x20] sm:$0xff] %v4509_v52  ;;  %v4945_v10 = vpop.eup %4944  ;;  %v4359_v55 = vor.u32 1.1754944e-38, %v4358_v42  ;;  %v4337_v15 = vadd.f32 %v4941_v24, %v4336_v41  ;;  %v4345_v23 = vor.u32 1.1754944e-38, %v4344_v13  ;;  %vm4343_vm0 = vcmp.eq.f32.partialorder %v4342_v34, 8.507059e+37 }
 0x750   : > { %v4327_v58 = vsel %vm4326_vm10, %v4939_v20, %v4323_v47  ;;  %v4351_v19 = vadd.f32 %v4943_v28, %v4350_v35  ;;  %v4362_v25 = vmul.f32 %v4945_v10, %v8600_v60  ;;  %4948 = vrcp.f32 %v8628_v46  ;;  %v4212_v14 = vpop.xlane.xlu1 %4211 }
 0x751   : > { %v4332_v6 = vsel %vm8607_vm6, %v4331_v4, %v4327_v58  ;;  %v4341_v63 = vsel %vm4340_vm14, %v4941_v24, %v4337_v15  ;;  %v8645_v49 = vmax.f32 %v4208_v44, 1e-30  ;;  %v4370_v43 = vand.u32 2147483647, %v8600_v60 }
 0x752   : > { %v4494_v51 = vmul.f32 %v4332_v6, %v8527_v57  ;;  %v4355_v57 = vsel %vm4354_vm15, %v4943_v28, %v4351_v19  ;;  %v4346_v62 = vsel %vm4343_vm0, %v4345_v23, %v4341_v63  ;;  %v4363_v30 = vsub.f32 1.0, %v4362_v25  ;;  %v4210_v50 = vpop.xlane.xlu0 %4209 }
 0x753   : > { %v4360_v12 = vsel %vm8633_vm13, %v4359_v55, %v4355_v57  ;;  %v4495_v20 = vmul.f32 %v4346_v62, %v8529_v1  ;;  %v4372_v48 = vand.u32 2147483648, %v8600_v60  ;;  %vm4367_vm1 = vweird.f32 %v4945_v10 }
 0x754   : > { %v4510_v36 = vadd.f32 1e-10, %v4494_v51  ;;  %v4947_v22 = vpop.eup %4946  ;;  %v4496_v54 = vmul.f32 %v4360_v12, %v8532_v61  ;;  %v4364_v3 = vmul.f32 %v4945_v10, %v4363_v30  ;;  %4950 = vrcp.f32 %v8645_v49 }
 0x755   : > { %v4511_v45 = vadd.f32 1e-10, %v4495_v20  ;;  %v4390_v24 = vmul.f32 %v4947_v22, %v8622_v17  ;;  %vm4366_vm2 = vweird.f32 %v8600_v60  ;;  %vm4371_vm4 = vcmp.eq.f32.partialorder %v4370_v43, 8.507059e+37 }
 0x756   : > { %4526 = vst [vmem:[%s8577_s12 + $0x28] sm:$0xff] %v4510_v36  ;;  %v4512_v1 = vadd.f32 1e-10, %v4496_v54  ;;  %v4365_v2 = vadd.f32 %v4945_v10, %v4364_v3  ;;  %v4949_v26 = vpop.eup %4948  ;;  %vm4368_vm3 = vmor %vm4366_vm2, %vm4367_vm1  ;;  %v4373_v8 = vor.u32 1.1754944e-38, %v4372_v48  ;;  %v4400_v31 = vand.u32 2147483648, %v8622_v17  ;;  %v4214_v13 = vpop.xlane.xlu2 %4213 }
 0x757   : > { %4527 = vst [vmem:[%s8577_s12 + $0x30] sm:$0xff] %v4511_v45  ;;  %v4391_v61 = vsub.f32 1.0, %v4390_v24  ;;  %vm4394_vm5 = vweird.f32 %v8622_v17  ;;  %v4376_v28 = vmul.f32 %v4949_v26, %v8628_v46  ;;  %v8662_v9 = vmax.f32 %v4212_v14, 1e-30 }
 0x758   : > { %4528 = vst [vmem:[%s8577_s12 + $0x38] sm:$0xff] %v4512_v1  ;;  %v4369_v39 = vsel %vm4368_vm3, %v4945_v10, %v4365_v2  ;;  %vm4395_vm6 = vweird.f32 %v4947_v22  ;;  %v4398_v60 = vand.u32 2147483647, %v8622_v17  ;;  %v4384_v59 = vand.u32 2147483647, %v8628_v46 }
 0x759   : > { %v4374_v4 = vsel %vm4371_vm4, %v4373_v8, %v4369_v39  ;;  %v4392_v53 = vmul.f32 %v4947_v22, %v4391_v61  ;;  %v4377_v38 = vsub.f32 1.0, %v4376_v28  ;;  %4952 = vrcp.f32 %v8662_v9  ;;  %vm4396_vm7 = vmor %vm4394_vm5, %vm4395_vm6 }
 0x75a   : > { %v4497_v7 = vmul.f32 %v4374_v4, %v8542_v11  ;;  %v4951_v29 = vpop.eup %4950  ;;  %v4401_v40 = vor.u32 1.1754944e-38, %v4400_v31  ;;  %v4386_v42 = vand.u32 2147483648, %v8628_v46  ;;  %v8669_v32 = vmax.f32 %v4210_v50, 1e-30  ;;  %v4216_v0 = vpop.xlane.xlu0 %4215 }
 0x75b   : > { %v4393_v52 = vadd.f32 %v4947_v22, %v4392_v53  ;;  %v4378_v56 = vmul.f32 %v4949_v26, %v4377_v38  ;;  %vm4381_vm8 = vweird.f32 %v4949_v26  ;;  %v4404_v11 = vmul.f32 %v4951_v29, %v8645_v49 }
 0x75c   : > { %v4513_v47 = vadd.f32 1e-10, %v4497_v7  ;;  %vm4399_vm9 = vcmp.eq.f32.partialorder %v4398_v60, 8.507059e+37  ;;  %vm4380_vm10 = vweird.f32 %v8628_v46  ;;  %4954 = vrcp.f32 %v8669_v32 }
 0x75d   : > { %v4397_v41 = vsel %vm4396_vm7, %v4947_v22, %v4393_v52  ;;  %v4379_v58 = vadd.f32 %v4949_v26, %v4378_v56  ;;  %vm4385_vm11 = vcmp.eq.f32.partialorder %v4384_v59, 8.507059e+37  ;;  %v4405_v35 = vsub.f32 1.0, %v4404_v11  ;;  %vm4382_vm12 = vmor %vm4380_vm10, %vm4381_vm8 }
 0x75e   : > { %4529 = vst [vmem:[%s8577_s12 + $0x40] sm:$0xff] %v4513_v47  ;;  %v4402_v34 = vsel %vm4399_vm9, %v4401_v40, %v4397_v41  ;;  %v4387_v17 = vor.u32 1.1754944e-38, %v4386_v42  ;;  %v4414_v10 = vand.u32 2147483648, %v8645_v49  ;;  %v8679_v6 = vmax.f32 %v4214_v13, 1e-30 }
 0x75f   : > { %v4499_v44 = vmul.f32 %v4402_v34, %v8547_v37  ;;  %v4953_v55 = vpop.eup %4952  ;;  %v4383_v15 = vsel %vm4382_vm12, %v4949_v26, %v4379_v58  ;;  %v4406_v46 = vmul.f32 %v4951_v29, %v4405_v35  ;;  %vm4409_vm13 = vweird.f32 %v4951_v29 }
 0x760   : > { %v4412_v51 = vand.u32 2147483647, %v8645_v49  ;;  %v4388_v23 = vsel %vm4385_vm11, %v4387_v17, %v4383_v15  ;;  %v4432_v25 = vmul.f32 %v4953_v55, %v8662_v9  ;;  %vm4408_vm14 = vweird.f32 %v8645_v49 }
 0x761   : > { %v4515_v19 = vadd.f32 1e-10, %v4499_v44  ;;  %v4498_v37 = vmul.f32 %v4388_v23, %v8544_v5  ;;  %v4407_v63 = vadd.f32 %v4951_v29, %v4406_v46  ;;  %v8685_v36 = vmax.f32 %v4216_v0, 1e-30  ;;  %vm4410_vm15 = vmor %vm4408_vm14, %vm4409_vm13 }
 0x762   : > { %v4955_v57 = vpop.eup %4954  ;;  %v4415_v62 = vor.u32 1.1754944e-38, %v4414_v10  ;;  %v4433_v30 = vsub.f32 1.0, %v4432_v25  ;;  %v4442_v12 = vand.u32 2147483648, %v8662_v9  ;;  %4956 = vrcp.f32 %v8679_v6 }
 0x763   : > { %4531 = vst [vmem:[%s8577_s12 + $0x50] sm:$0xff] %v4515_v19  ;;  %v4514_v20 = vadd.f32 1e-10, %v4498_v37  ;;  %v4411_v43 = vsel %vm4410_vm15, %v4951_v29, %v4407_v63  ;;  %vm4413_vm0 = vcmp.eq.f32.partialorder %v4412_v51, 8.507059e+37  ;;  %v4418_v5 = vmul.f32 %v4955_v57, %v8669_v32 }
 0x764   : > { %v4416_v48 = vsel %vm4413_vm0, %v4415_v62, %v4411_v43  ;;  %v4434_v22 = vmul.f32 %v4953_v55, %v4433_v30  ;;  %vm4437_vm1 = vweird.f32 %v4953_v55  ;;  %v4440_v49 = vand.u32 2147483647, %v8662_v9 }
 0x765   : > { %4530 = vst [vmem:[%s8577_s12 + $0x48] sm:$0xff] %v4514_v20  ;;  %v4500_v54 = vmul.f32 %v4416_v48, %v8556_v33  ;;  %v4419_v3 = vsub.f32 1.0, %v4418_v5  ;;  %4958 = vrcp.f32 %v8685_v36  ;;  %vm4436_vm2 = vweird.f32 %v8662_v9 }
 0x766   : > { %v4435_v45 = vadd.f32 %v4953_v55, %v4434_v22  ;;  %v4443_v24 = vor.u32 1.1754944e-38, %v4442_v12  ;;  %v4428_v14 = vand.u32 2147483648, %v8669_v32  ;;  %vm4438_vm3 = vmor %vm4436_vm2, %vm4437_vm1  ;;  %vm4423_vm4 = vweird.f32 %v4955_v57 }
 0x767   : > { %v4516_v50 = vadd.f32 1e-10, %v4500_v54  ;;  %v4420_v1 = vmul.f32 %v4955_v57, %v4419_v3  ;;  %v4426_v2 = vand.u32 2147483647, %v8669_v32  ;;  %vm4441_vm5 = vcmp.eq.f32.partialorder %v4440_v49, 8.507059e+37 }
 0x768   : > { %v4957_v26 = vpop.eup %4956  ;;  %v4439_v8 = vsel %vm4438_vm3, %v4953_v55, %v4435_v45  ;;  %vm4422_vm6 = vweird.f32 %v8669_v32  ;;  %v4429_v28 = vor.u32 1.1754944e-38, %v4428_v14  ;;  %v4456_v38 = vand.u32 2147483648, %v8679_v6 }
 0x769   : > { %4532 = vst [vmem:[%s8577_s12 + $0x58] sm:$0xff] %v4516_v50  ;;  %v4444_v33 = vsel %vm4441_vm5, %v4443_v24, %v4439_v8  ;;  %v4421_v61 = vadd.f32 %v4955_v57, %v4420_v1  ;;  %v4446_v31 = vmul.f32 %v4957_v26, %v8679_v6  ;;  %vm4424_vm7 = vmor %vm4422_vm6, %vm4423_vm4  ;;  %vm4427_vm8 = vcmp.eq.f32.partialorder %v4426_v2, 8.507059e+37 }
 0x76a   : > { %v4502_v39 = vmul.f32 %v4444_v33, %v8561_v21  ;;  %vm4451_vm9 = vweird.f32 %v4957_v26  ;;  %v4454_v21 = vand.u32 2147483647, %v8679_v6  ;;  %vm4450_vm10 = vweird.f32 %v8679_v6 }
 0x76b   : > { %v4959_v9 = vpop.eup %4958  ;;  %v4425_v4 = vsel %vm4424_vm7, %v4955_v57, %v4421_v61  ;;  %v4447_v53 = vsub.f32 1.0, %v4446_v31  ;;  %v4470_v47 = vand.u32 2147483648, %v8685_v36  ;;  %vm4452_vm11 = vmor %vm4450_vm10, %vm4451_vm9  ;;  %v4457_v56 = vor.u32 1.1754944e-38, %v4456_v38 }
 0x76c   : > { %v4518_v60 = vadd.f32 1e-10, %v4502_v39  ;;  %v4430_v7 = vsel %vm4427_vm8, %v4429_v28, %v4425_v4  ;;  %v4460_v59 = vmul.f32 %v4959_v9, %v8685_v36  ;;  %vm4465_vm12 = vweird.f32 %v4959_v9 }
 0x76d   : > { %v4501_v29 = vmul.f32 %v4430_v7, %v8558_v18  ;;  %v4448_v52 = vmul.f32 %v4957_v26, %v4447_v53  ;;  %v4468_v18 = vand.u32 2147483647, %v8685_v36  ;;  %vm4455_vm13 = vcmp.eq.f32.partialorder %v4454_v21, 8.507059e+37 }
 0x76e   : > { %4534 = vst [vmem:[%s8577_s12 + $0x68] sm:$0xff] %v4518_v60  ;;  %v4461_v40 = vsub.f32 1.0, %v4460_v59  ;;  %vm4464_vm14 = vweird.f32 %v8685_v36  ;;  %v4471_v35 = vor.u32 1.1754944e-38, %v4470_v47 }
 0x76f   : > { %v4517_v42 = vadd.f32 1e-10, %v4501_v29  ;;  %v4449_v32 = vadd.f32 %v4957_v26, %v4448_v52  ;;  %vm4466_vm15 = vmor %vm4464_vm14, %vm4465_vm12  ;;  %vm4469_vm0 = vcmp.eq.f32.partialorder %v4468_v18, 8.507059e+37 }
 0x770   : > { %v4462_v11 = vmul.f32 %v4959_v9, %v4461_v40 }
 0x771   : > { %4533 = vst [vmem:[%s8577_s12 + $0x60] sm:$0xff] %v4517_v42  ;;  %v4453_v13 = vsel %vm4452_vm11, %v4957_v26, %v4449_v32 }
 0x772   : > { %v4458_v41 = vsel %vm4455_vm13, %v4457_v56, %v4453_v13  ;;  %v4463_v34 = vadd.f32 %v4959_v9, %v4462_v11 }
 0x773   : > { %v4503_v58 = vmul.f32 %v4458_v41, %v8567_v27 }
 0x774   : > { %v4467_v44 = vsel %vm4466_vm15, %v4959_v9, %v4463_v34 }
 0x775   : > { %v4519_v17 = vadd.f32 1e-10, %v4503_v58  ;;  %v4472_v10 = vsel %vm4469_vm0, %v4471_v35, %v4467_v44 }
 0x776   : > { %v4504_v6 = vmul.f32 %v4472_v10, %v8569_v16 }
 0x777   : > { %4535 = vst [vmem:[%s8577_s12 + $0x70] sm:$0xff] %v4519_v17 }
 0x778   : > { %v4520_v0 = vadd.f32 1e-10, %v4504_v6 }
 0x77a   : > { %4536 = vst [vmem:[%s8577_s12 + $0x78] sm:$0xff] %v4520_v0 }
 0x77b   : > { %5076 = shalt.err (!%p5073_p9)
}
 0x77c   : > { %s5169_s10 = smov 128   ;;  %s5170_s11 = smov 8  }
 0x77d   : > { %4703 = dma.vmem_to_hbm [thread:$0]  (%p5244_p4), %s4553_s16, 2048, %s4555_s17, %s4538_s18, %s5169_s10, %s5169_s10, %s5170_s11  }
 0x77e PF: > { %p4715_p10 = scmp.ge.s32.totalorder %s5133_s0, 2  ;;  %s4569_s12 = sand.u32 1, %s5113_s22  }
 0x77f   : > { %s4570_s13 = scalar_lea.sflag [#allocation5], %s4569_s12 }
 0x780   : > { %p4710_p11 = pnand %p4715_p10, %p5251_p8 }
 0x782   : > { %p4711_p12 = pneg %p4710_p11 }
 0x784   : > { %5108 = dma.done.wait (%p4711_p12), %s4570_s13, 2048  }
 0x785   : > { %5110 = vsyncadd (%p4711_p12), %s4570_s13, 4294965248  ;;  %s27_s0 = sadd.s32 1, %s5133_s0   ;;  %s9485_s22 = smov %s5117_s23 }
 0x786   : > { %p24_p13 = scmp.ge.s32.totalorder %s27_s0, 4   ;;  %s9486_s23 = smov %s5121_s24 }
 0x787   : > { %s9487_s24 = smov %s5257_s9  ;;  %s9488_s25 = smov %s5129_s26 }
 0x788   : > { %s9489_s26 = smov %s9491_s29  ;;  %26 = sbr.rel (!%p24_p13) target bundleno = 11 (0xb), region = 82 }
 0x78d   :  { %4576 = vsyncpa [#allocation5], 1 }
 0x78e   :  { %4578 = vsyncpa [#allocation5 + $0x1], 1 }
 0x78f   :  { %4579 = vsyncpa [#allocation6], 1 }
 0x790   :  { %4581 = vsyncpa [#allocation6 + $0x1], 1 }

</bundles_post_ra>
